<compile_context>
chip_gen: v7x
topology: tpu7x:2x2x1
jax: 0.10.0
libtpu: 0.0.40
codegen_flags: <defaults>
</compile_context>

<pallas_src>
import math

import jax
import jax.numpy as jnp
import numpy as np
from jax.experimental import pallas as pl
from jax.experimental.pallas import tpu as pltpu


# ---------------------------------------------------------------------------
# in-kernel helpers
# ---------------------------------------------------------------------------
def _layernorm(v, a, b, eps=1e-6):
    # torch: a_2 * (x - mean) / (std + eps) + b_2 , std unbiased (N-1)
    n = v.shape[-1]
    mean = jnp.mean(v, axis=-1, keepdims=True)
    centered = v - mean
    var = jnp.sum(centered * centered, axis=-1, keepdims=True) * (1.0 / (n - 1))
    std = jnp.sqrt(var)
    inv = pl.reciprocal(std + eps, approx=False)   # exact (strict f32 check)
    return a * centered * inv + b


def _gelu(x):
    # BERT tanh-approx GELU (kept f32; bf16 EUP is a v6e/v7x-only micro-opt)
    return 0.5 * x * (1.0 + jnp.tanh(math.sqrt(2.0 / math.pi) *
                                     (x + 0.044715 * x * x * x)))


# ---------------------------------------------------------------------------
# kernel factory
# ---------------------------------------------------------------------------
def make_kernel(num_heads, ts, kb, seq, hidden, compute_dtype):
    nkb = seq // kb
    d_k = hidden // num_heads
    scale = 1.0 / math.sqrt(d_k)
    cdt = compute_dtype
    approx_recip = (jnp.dtype(cdt) == jnp.dtype(jnp.bfloat16))

    def kernel(x_ref, mask_ref,
               ln1a_ref, ln1b_ref, wq_ref, bq_ref, wkv_ref, bkv_ref,
               wo_ref, bo_ref, ln2a_ref, ln2b_ref,
               w1_ref, b1_ref, w2_ref, b2_ref,
               o_ref,
               k_s, v_s, m_s, l_s, acc_s):
        qt = pl.program_id(1)

        # ---- once per batch element: full-sequence K/V into VMEM scratch ----
        @pl.when(qt == 0)
        def _():
            xa = x_ref[0]                                             # (S, H)
            ha = _layernorm(xa, ln1a_ref[0], ln1b_ref[0])
            kv = jnp.dot(ha.astype(cdt), wkv_ref[...],
                         preferred_element_type=jnp.float32) + bkv_ref[0]   # (S, 2H)
            k_all = jnp.transpose(
                kv[:, :hidden].reshape(seq, num_heads, d_k), (1, 0, 2))     # (nh, S, dk)
            v_all = jnp.transpose(
                kv[:, hidden:].reshape(seq, num_heads, d_k), (1, 0, 2))
            k_s[...] = k_all.reshape(num_heads, nkb, kb, d_k).astype(cdt)
            v_s[...] = v_all.reshape(num_heads, nkb, kb, d_k).astype(cdt)

        # ---- Q for this query tile ----
        row0 = pl.multiple_of(qt * ts, ts)
        x_t = x_ref[0, pl.ds(row0, ts), :]                            # (TS, H) f32
        h1 = _layernorm(x_t, ln1a_ref[0], ln1b_ref[0])
        q = jnp.dot(h1.astype(cdt), wq_ref[...],
                    preferred_element_type=jnp.float32) + bq_ref[0]   # (TS, H) f32
        # pre-scale, head-major (nh, TS, dk); transpose hoisted out of the loop
        qh = jnp.transpose((q * scale).reshape(ts, num_heads, d_k),
                           (1, 0, 2)).astype(cdt)

        # ---- flash-style online softmax over key blocks ----
        m_s[...] = jnp.full_like(m_s, -jnp.inf)
        l_s[...] = jnp.zeros_like(l_s)
        acc_s[...] = jnp.zeros_like(acc_s)

        @pl.loop(0, nkb)
        def _(j):
            k_blk = k_s[:, j]                                         # (nh, KB, dk)
            v_blk = v_s[:, j]
            s = jnp.einsum("hqd,hkd->hqk", qh, k_blk,
                           preferred_element_type=jnp.float32)        # (nh, TS, KB) f32
            mvals = mask_ref[0, j]                                    # (TS, KB)
            # exact masked_fill(-8192); compare done once per (TS, KB) block
            s = jnp.where(mvals[None] == 0, -8192.0, s)

            m_prev = m_s[...]
            m_new = jnp.maximum(m_prev, jnp.max(s, axis=-1, keepdims=True))
            alpha = jnp.exp(m_prev - m_new)
            p = jnp.exp(s - m_new)
            l_s[...] = alpha * l_s[...] + jnp.sum(p, axis=-1, keepdims=True)
            acc_s[...] = alpha * acc_s[...] + jnp.einsum(
                "hqk,hkd->hqd", p.astype(cdt), v_blk,
                preferred_element_type=jnp.float32)
            m_s[...] = m_new

        inv_l = pl.reciprocal(l_s[...], approx=approx_recip)
        ctx = acc_s[...] * inv_l                                      # (nh, TS, dk) f32
        ctx2 = jnp.transpose(ctx, (1, 0, 2)).reshape(ts, hidden)      # (TS, H)
        attn = jnp.dot(ctx2.astype(cdt), wo_ref[...],
                       preferred_element_type=jnp.float32) + bo_ref[0]

        # TODO(synk): dropout (attention probs / sublayers / block output) is
        # identity here (inference mode); no RNG applied.
        x1 = x_t + attn

        # ---- sublayer 2: positionwise feed-forward on LayerNorm(x1) ----
        h2 = _layernorm(x1, ln2a_ref[0], ln2b_ref[0])
        f = jnp.dot(h2.astype(cdt), w1_ref[...],
                    preferred_element_type=jnp.float32) + b1_ref[0]
        f = _gelu(f)
        f = jnp.dot(f.astype(cdt), w2_ref[...],
                    preferred_element_type=jnp.float32) + b2_ref[0]

        o_ref[0] = (x1 + f).astype(o_ref.dtype)

    return kernel


# ---------------------------------------------------------------------------
# wrapper
# ---------------------------------------------------------------------------
def _vmem_limit_bytes():
    try:
        cap = int(pltpu.get_tpu_info().vmem_capacity_bytes)
    except Exception:
        cap = 64 * 1024 * 1024
    # leave headroom for double buffers; clamp to sane range
    return max(32 * 1024 * 1024, min(int(cap * 0.85), 120 * 1024 * 1024))


def transformer_block(x, mask, params, num_heads, *,
                      compute_dtype=jnp.float32,
                      ts=None, kb=None,
                      single_buffer_weights=True):
    B, S, H = x.shape
    assert H % num_heads == 0
    d_k = H // num_heads
    cdt = compute_dtype

    if ts is None:
        ts = min(S, 128)          # query-tile rows
    if kb is None:
        kb = min(S, 256)          # key-block size
    assert S % ts == 0 and S % kb == 0
    n_tiles = S // ts
    nkb = S // kb

    # host-side weight prep: fused K/V projection; matmul weights in compute dtype
    wq = params["wq"].astype(cdt)
    wkv = jnp.concatenate([params["wk"], params["wv"]], axis=1).astype(cdt)   # (H, 2H)
    wo = params["wo"].astype(cdt)
    w1 = params["w1"].astype(cdt)
    w2 = params["w2"].astype(cdt)
    bkv = jnp.concatenate([params["bk"], params["bv"]], axis=1)               # (1, 2H)

    weight_args = [
        params["ln1_a"], params["ln1_b"],
        wq, params["bq"], wkv, bkv, wo, params["bo"],
        params["ln2_a"], params["ln2_b"],
        w1, params["b1"], w2, params["b2"],
    ]

    # rearrange mask so each (TS, KB) key block is a leading-dim slice in-kernel
    mask_r = jnp.transpose(mask[:, 0].reshape(B, S, nkb, kb), (0, 2, 1, 3))   # (B,nkb,S,kb)

    wspec_kwargs = {}
    if single_buffer_weights:
        # constant-index resident weights: one DMA, no double buffer
        wspec_kwargs = dict(pipeline_mode=pl.Buffered(buffer_count=1))

    in_specs = [
        pl.BlockSpec((1, S, H), lambda b, t: (b, 0, 0)),               # full-seq x
        pl.BlockSpec((1, nkb, ts, kb), lambda b, t: (b, 0, t, 0)),     # mask tile
    ]
    for w in weight_args:
        in_specs.append(pl.BlockSpec(w.shape,
                                     lambda b, t, nd=w.ndim: (0,) * nd,
                                     **wspec_kwargs))

    out_specs = pl.BlockSpec((1, ts, H), lambda b, t: (b, t, 0))

    scratch_shapes = [
        pltpu.VMEM((num_heads, nkb, kb, d_k), cdt),     # K cache (head-major)
        pltpu.VMEM((num_heads, nkb, kb, d_k), cdt),     # V cache (head-major)
        pltpu.VMEM((num_heads, ts, 1), jnp.float32),    # running max
        pltpu.VMEM((num_heads, ts, 1), jnp.float32),    # running sum
        pltpu.VMEM((num_heads, ts, d_k), jnp.float32),  # running context acc
    ]

    d_ff = params["w1"].shape[1]
    flops = B * (2 * S * H * H            # Q proj
                 + 2 * S * H * 2 * H      # fused K/V proj
                 + 2 * 2 * S * S * H      # scores + context
                 + 2 * S * H * H          # output proj
                 + 2 * 2 * S * H * d_ff)  # FFN
    transcendentals = B * (num_heads * S * S + S * d_ff)
    bytes_accessed = (2 * x.size * x.dtype.itemsize          # x in + out
                      + mask_r.size * mask_r.dtype.itemsize
                      + sum(w.size * w.dtype.itemsize for w in weight_args))

    return pl.pallas_call(
        make_kernel(num_heads, ts, kb, S, H, cdt),
        out_shape=jax.ShapeDtypeStruct((B, S, H), x.dtype),
        grid_spec=pltpu.PrefetchScalarGridSpec(
            num_scalar_prefetch=0,
            grid=(B, n_tiles),
            in_specs=in_specs,
            out_specs=out_specs,
            scratch_shapes=scratch_shapes),
        compiler_params=pltpu.CompilerParams(
            dimension_semantics=("parallel", "arbitrary"),
            vmem_limit_bytes=_vmem_limit_bytes()),
        cost_estimate=pl.CostEstimate(flops=int(flops),
                                      transcendentals=int(transcendentals),
                                      bytes_accessed=int(bytes_accessed)),
    )(x, mask_r, *weight_args)


def _run_block(x, mask, params, num_heads, compute_dtype):
    try:
        out = transformer_block(x, mask, params, num_heads,
                                compute_dtype=compute_dtype)
        return jax.block_until_ready(out)
    except Exception:
        # pl.Buffered(1) (single-buffered resident weights) may be unsupported
        # on some jax/libtpu versions; fall back to default double buffering.
        out = transformer_block(x, mask, params, num_heads,
                                compute_dtype=compute_dtype,
                                single_buffer_weights=False)
        return jax.block_until_ready(out)


# ---------------------------------------------------------------------------
# pure-JAX reference (matches the PyTorch module)
# ---------------------------------------------------------------------------
def reference(x, mask, p, num_heads):
    B, S, H = x.shape
    d_k = H // num_heads

    def ln(v, a, b):
        mean = jnp.mean(v, axis=-1, keepdims=True)
        c = v - mean
        var = jnp.sum(c * c, axis=-1, keepdims=True) / (H - 1)
        return a[0] * c / (jnp.sqrt(var) + 1e-6) + b[0]

    h = ln(x, p["ln1_a"], p["ln1_b"])
    q = h @ p["wq"] + p["bq"][0]
    k = h @ p["wk"] + p["bk"][0]
    v = h @ p["wv"] + p["bv"][0]
    q = q.reshape(B, S, num_heads, d_k).transpose(0, 2, 1, 3)
    k = k.reshape(B, S, num_heads, d_k).transpose(0, 2, 1, 3)
    v = v.reshape(B, S, num_heads, d_k).transpose(0, 2, 1, 3)
    scores = jnp.einsum("bhqd,bhkd->bhqk", q, k) / math.sqrt(d_k)
    scores = jnp.where(mask == 0, -8192.0, scores)
    p_attn = jax.nn.softmax(scores, axis=-1)
    a = jnp.einsum("bhqk,bhkd->bhqd", p_attn, v)
    a = a.transpose(0, 2, 1, 3).reshape(B, S, H)
    a = a @ p["wo"] + p["bo"][0]
    x1 = x + a
    h2 = ln(x1, p["ln2_a"], p["ln2_b"])
    f = h2 @ p["w1"] + p["b1"][0]
    f = 0.5 * f * (1.0 + jnp.tanh(math.sqrt(2.0 / math.pi) * (f + 0.044715 * f ** 3)))
    f = f @ p["w2"] + p["b2"][0]
    return x1 + f


# ---------------------------------------------------------------------------
# main
# ---------------------------------------------------------------------------
if __name__ == "__main__":
    B, S, H = 2, 8, 32
    NUM_HEADS = 4
    D_FF = 4 * H

    key = jax.random.PRNGKey(0)
    keys = jax.random.split(key, 10)

    def w(k, shape):
        return (0.02 * jax.random.normal(k, shape)).astype(jnp.float32)

    params = {
        "ln1_a": jnp.ones((1, H), jnp.float32),
        "ln1_b": jnp.zeros((1, H), jnp.float32),
        "wq": w(keys[0], (H, H)), "bq": jnp.zeros((1, H), jnp.float32),
        "wk": w(keys[1], (H, H)), "bk": jnp.zeros((1, H), jnp.float32),
        "wv": w(keys[2], (H, H)), "bv": jnp.zeros((1, H), jnp.float32),
        "wo": w(keys[3], (H, H)), "bo": jnp.zeros((1, H), jnp.float32),
        "ln2_a": jnp.ones((1, H), jnp.float32),
        "ln2_b": jnp.zeros((1, H), jnp.float32),
        "w1": w(keys[4], (H, D_FF)), "b1": jnp.zeros((1, D_FF), jnp.float32),
        "w2": w(keys[5], (D_FF, H)), "b2": jnp.zeros((1, H), jnp.float32),
    }

    x = jax.random.normal(keys[6], (B, S, H), jnp.float32)
    mask = (jax.random.uniform(keys[7], (B, 1, S, S)) > 0.2).astype(jnp.float32)

    ref = reference(x, mask, params, NUM_HEADS)

    # strict f32 path (matches PyTorch-equivalent reference to 1e-4)
    out_f32 = _run_block(x, mask, params, NUM_HEADS, jnp.float32)
    np.testing.assert_allclose(np.asarray(out_f32), np.asarray(ref),
                               rtol=1e-4, atol=1e-4)

    # production bf16-MXU path (f32 accumulation / stats), loose tolerance
    out_bf16 = _run_block(x, mask, params, NUM_HEADS, jnp.bfloat16)
    np.testing.assert_allclose(np.asarray(out_bf16), np.asarray(ref),
                               rtol=5e-2, atol=5e-2)

    print("KERNEL_OK")
</pallas_src>

<mosaic_0001>
module attributes {stable_mosaic.version = 11 : i64} {
  func.func @kernel(%arg0: i32, %arg1: i32, %arg2: memref<1x8x32xf32, #tpu.memory_space<vmem>>, %arg3: memref<1x1x8x8xf32, #tpu.memory_space<vmem>>, %arg4: memref<1x32xf32, #tpu.memory_space<vmem>>, %arg5: memref<1x32xf32, #tpu.memory_space<vmem>>, %arg6: memref<32x32xf32, #tpu.memory_space<vmem>>, %arg7: memref<1x32xf32, #tpu.memory_space<vmem>>, %arg8: memref<32x64xf32, #tpu.memory_space<vmem>>, %arg9: memref<1x64xf32, #tpu.memory_space<vmem>>, %arg10: memref<32x32xf32, #tpu.memory_space<vmem>>, %arg11: memref<1x32xf32, #tpu.memory_space<vmem>>, %arg12: memref<1x32xf32, #tpu.memory_space<vmem>>, %arg13: memref<1x32xf32, #tpu.memory_space<vmem>>, %arg14: memref<32x128xf32, #tpu.memory_space<vmem>>, %arg15: memref<1x128xf32, #tpu.memory_space<vmem>>, %arg16: memref<128x32xf32, #tpu.memory_space<vmem>>, %arg17: memref<1x32xf32, #tpu.memory_space<vmem>>, %arg18: memref<1x8x32xf32, #tpu.memory_space<vmem>>, %arg19: memref<4x1x8x8xf32, #tpu.memory_space<vmem>>, %arg20: memref<4x1x8x8xf32, #tpu.memory_space<vmem>>, %arg21: memref<4x8x1xf32, #tpu.memory_space<vmem>>, %arg22: memref<4x8x1xf32, #tpu.memory_space<vmem>>, %arg23: memref<4x8x8xf32, #tpu.memory_space<vmem>>) attributes {dimension_semantics = [#tpu.dimension_semantics<parallel>, #tpu.dimension_semantics<arbitrary>], iteration_bounds = array<i64: 2, 1>, scalar_prefetch = 0 : i64, scratch_operands = 5 : i64, tpu.core_type = #tpu.core_type<tc>, window_params = [{transform_indices = @transform_0, window_bounds = array<i64: 1, 8, 32>}, {transform_indices = @transform_1, window_bounds = array<i64: 1, 1, 8, 8>}, {pipeline_mode = #tpu.pipeline_mode<synchronous>, transform_indices = @transform_2, window_bounds = array<i64: 1, 32>}, {pipeline_mode = #tpu.pipeline_mode<synchronous>, transform_indices = @transform_3, window_bounds = array<i64: 1, 32>}, {pipeline_mode = #tpu.pipeline_mode<synchronous>, transform_indices = @transform_4, window_bounds = array<i64: 32, 32>}, {pipeline_mode = #tpu.pipeline_mode<synchronous>, transform_indices = @transform_5, window_bounds = array<i64: 1, 32>}, {pipeline_mode = #tpu.pipeline_mode<synchronous>, transform_indices = @transform_6, window_bounds = array<i64: 32, 64>}, {pipeline_mode = #tpu.pipeline_mode<synchronous>, transform_indices = @transform_7, window_bounds = array<i64: 1, 64>}, {pipeline_mode = #tpu.pipeline_mode<synchronous>, transform_indices = @transform_8, window_bounds = array<i64: 32, 32>}, {pipeline_mode = #tpu.pipeline_mode<synchronous>, transform_indices = @transform_9, window_bounds = array<i64: 1, 32>}, {pipeline_mode = #tpu.pipeline_mode<synchronous>, transform_indices = @transform_10, window_bounds = array<i64: 1, 32>}, {pipeline_mode = #tpu.pipeline_mode<synchronous>, transform_indices = @transform_11, window_bounds = array<i64: 1, 32>}, {pipeline_mode = #tpu.pipeline_mode<synchronous>, transform_indices = @transform_12, window_bounds = array<i64: 32, 128>}, {pipeline_mode = #tpu.pipeline_mode<synchronous>, transform_indices = @transform_13, window_bounds = array<i64: 1, 128>}, {pipeline_mode = #tpu.pipeline_mode<synchronous>, transform_indices = @transform_14, window_bounds = array<i64: 128, 32>}, {pipeline_mode = #tpu.pipeline_mode<synchronous>, transform_indices = @transform_15, window_bounds = array<i64: 1, 32>}, {transform_indices = @transform_16, window_bounds = array<i64: 1, 8, 32>}]} {
    %c0_i32 = arith.constant 0 : i32
    %0 = arith.cmpi eq, %arg1, %c0_i32 : i32
    %1 = arith.extui %0 : i1 to i32
    %c0_i32_0 = arith.constant 0 : i32
    %2 = arith.cmpi ne, %1, %c0_i32_0 : i32
    scf.if %2 {
      %c0_101 = arith.constant 0 : index
      %c0_102 = arith.constant 0 : index
      %c0_103 = arith.constant 0 : index
      %166 = vector.load %arg2[%c0_101, %c0_102, %c0_103] : memref<1x8x32xf32, #tpu.memory_space<vmem>>, vector<1x8x32xf32>
      %167 = vector.shape_cast %166 : vector<1x8x32xf32> to vector<8x32xf32>
      %c0_104 = arith.constant 0 : index
      %c0_105 = arith.constant 0 : index
      %168 = vector.load %arg4[%c0_104, %c0_105] : memref<1x32xf32, #tpu.memory_space<vmem>>, vector<1x32xf32>
      %169 = vector.shape_cast %168 : vector<1x32xf32> to vector<32xf32>
      %c0_106 = arith.constant 0 : index
      %c0_107 = arith.constant 0 : index
      %170 = vector.load %arg5[%c0_106, %c0_107] : memref<1x32xf32, #tpu.memory_space<vmem>>, vector<1x32xf32>
      %171 = vector.shape_cast %170 : vector<1x32xf32> to vector<32xf32>
      %cst_108 = arith.constant dense<0.000000e+00> : vector<8xf32>
      %172 = vector.multi_reduction <add>, %167, %cst_108 [1] : vector<8x32xf32> to vector<8xf32>
      %173 = vector.shape_cast %172 : vector<8xf32> to vector<8x1xf32>
      %cst_109 = arith.constant 3.200000e+01 : f32
      %174 = vector.broadcast %cst_109 : f32 to vector<8x1xf32>
      %175 = arith.divf %173, %174 : vector<8x1xf32>
      %176 = vector.broadcast %175 : vector<8x1xf32> to vector<8x32xf32>
      %177 = arith.subf %167, %176 : vector<8x32xf32>
      %178 = arith.mulf %177, %177 : vector<8x32xf32>
      %cst_110 = arith.constant dense<0.000000e+00> : vector<8xf32>
      %179 = vector.multi_reduction <add>, %178, %cst_110 [1] : vector<8x32xf32> to vector<8xf32>
      %180 = vector.shape_cast %179 : vector<8xf32> to vector<8x1xf32>
      %cst_111 = arith.constant 0.0322580636 : f32
      %181 = vector.broadcast %cst_111 : f32 to vector<8x1xf32>
      %182 = arith.mulf %180, %181 : vector<8x1xf32>
      %183 = math.sqrt %182 : vector<8x1xf32>
      %cst_112 = arith.constant 9.99999997E-7 : f32
      %184 = vector.broadcast %cst_112 : f32 to vector<8x1xf32>
      %185 = arith.addf %183, %184 : vector<8x1xf32>
      %186 = tpu.reciprocal %185 : vector<8x1xf32> -> vector<8x1xf32>
      %187 = vector.shape_cast %169 : vector<32xf32> to vector<1x32xf32>
      %188 = vector.broadcast %187 : vector<1x32xf32> to vector<8x32xf32>
      %189 = arith.mulf %188, %177 : vector<8x32xf32>
      %190 = vector.broadcast %186 : vector<8x1xf32> to vector<8x32xf32>
      %191 = arith.mulf %189, %190 : vector<8x32xf32>
      %192 = vector.shape_cast %171 : vector<32xf32> to vector<1x32xf32>
      %193 = vector.broadcast %192 : vector<1x32xf32> to vector<8x32xf32>
      %194 = arith.addf %191, %193 : vector<8x32xf32>
      %c0_113 = arith.constant 0 : index
      %c0_114 = arith.constant 0 : index
      %195 = vector.load %arg8[%c0_113, %c0_114] : memref<32x64xf32, #tpu.memory_space<vmem>>, vector<32x64xf32>
      %cst_115 = arith.constant dense<0.000000e+00> : vector<8x64xf32>
      %196 = tpu.matmul %194, %195, %cst_115 {dimension_numbers = #tpu.dot_dimension_numbers<[1], [0], [0], [1], [0, 0, 1, 1], [], []>} : vector<8x32xf32>, vector<32x64xf32>, vector<8x64xf32> -> vector<8x64xf32>
      %c0_116 = arith.constant 0 : index
      %c0_117 = arith.constant 0 : index
      %197 = vector.load %arg9[%c0_116, %c0_117] : memref<1x64xf32, #tpu.memory_space<vmem>>, vector<1x64xf32>
      %198 = vector.shape_cast %197 : vector<1x64xf32> to vector<64xf32>
      %199 = vector.shape_cast %198 : vector<64xf32> to vector<1x64xf32>
      %200 = vector.broadcast %199 : vector<1x64xf32> to vector<8x64xf32>
      %201 = arith.addf %196, %200 : vector<8x64xf32>
      %202 = vector.extract_strided_slice %201 {offsets = [0, 0], sizes = [8, 32], strides = [1, 1]} : vector<8x64xf32> to vector<8x32xf32>
      %203 = vector.shape_cast %202 : vector<8x32xf32> to vector<8x4x8xf32>
      %204 = tpu.transpose %203, [1, 0, 2] : vector<8x4x8xf32> -> vector<4x8x8xf32>
      %205 = vector.extract_strided_slice %201 {offsets = [0, 32], sizes = [8, 32], strides = [1, 1]} : vector<8x64xf32> to vector<8x32xf32>
      %206 = vector.shape_cast %205 : vector<8x32xf32> to vector<8x4x8xf32>
      %207 = tpu.transpose %206, [1, 0, 2] : vector<8x4x8xf32> -> vector<4x8x8xf32>
      %208 = vector.shape_cast %204 : vector<4x8x8xf32> to vector<4x1x8x8xf32>
      %c0_118 = arith.constant 0 : index
      %c0_119 = arith.constant 0 : index
      %c0_120 = arith.constant 0 : index
      %c0_121 = arith.constant 0 : index
      %209 = vector.load %arg19[%c0_118, %c0_119, %c0_120, %c0_121] : memref<4x1x8x8xf32, #tpu.memory_space<vmem>>, vector<4x1x8x8xf32>
      tpu.vector_store %arg19[%c0_118, %c0_119, %c0_120, %c0_121], %208 {strides = array<i32>} : memref<4x1x8x8xf32, #tpu.memory_space<vmem>>, vector<4x1x8x8xf32>,
      %210 = vector.shape_cast %207 : vector<4x8x8xf32> to vector<4x1x8x8xf32>
      %c0_122 = arith.constant 0 : index
      %c0_123 = arith.constant 0 : index
      %c0_124 = arith.constant 0 : index
      %c0_125 = arith.constant 0 : index
      %211 = vector.load %arg20[%c0_122, %c0_123, %c0_124, %c0_125] : memref<4x1x8x8xf32, #tpu.memory_space<vmem>>, vector<4x1x8x8xf32>
      tpu.vector_store %arg20[%c0_122, %c0_123, %c0_124, %c0_125], %210 {strides = array<i32>} : memref<4x1x8x8xf32, #tpu.memory_space<vmem>>, vector<4x1x8x8xf32>,
    } else {
    }
    %c8_i32 = arith.constant 8 : i32
    %3 = arith.muli %arg1, %c8_i32 : i32
    %4 = tpu.assume_multiple %3, 8 : i32
    %c0 = arith.constant 0 : index
    %5 = arith.index_cast %4 : i32 to index
    %c0_1 = arith.constant 0 : index
    %6 = vector.load %arg2[%c0, %5, %c0_1] : memref<1x8x32xf32, #tpu.memory_space<vmem>>, vector<1x8x32xf32>
    %7 = vector.shape_cast %6 : vector<1x8x32xf32> to vector<8x32xf32>
    %c0_2 = arith.constant 0 : index
    %c0_3 = arith.constant 0 : index
    %8 = vector.load %arg4[%c0_2, %c0_3] : memref<1x32xf32, #tpu.memory_space<vmem>>, vector<1x32xf32>
    %9 = vector.shape_cast %8 : vector<1x32xf32> to vector<32xf32>
    %c0_4 = arith.constant 0 : index
    %c0_5 = arith.constant 0 : index
    %10 = vector.load %arg5[%c0_4, %c0_5] : memref<1x32xf32, #tpu.memory_space<vmem>>, vector<1x32xf32>
    %11 = vector.shape_cast %10 : vector<1x32xf32> to vector<32xf32>
    %cst = arith.constant dense<0.000000e+00> : vector<8xf32>
    %12 = vector.multi_reduction <add>, %7, %cst [1] : vector<8x32xf32> to vector<8xf32>
    %13 = vector.shape_cast %12 : vector<8xf32> to vector<8x1xf32>
    %cst_6 = arith.constant 3.200000e+01 : f32
    %14 = vector.broadcast %cst_6 : f32 to vector<8x1xf32>
    %15 = arith.divf %13, %14 : vector<8x1xf32>
    %16 = vector.broadcast %15 : vector<8x1xf32> to vector<8x32xf32>
    %17 = arith.subf %7, %16 : vector<8x32xf32>
    %18 = arith.mulf %17, %17 : vector<8x32xf32>
    %cst_7 = arith.constant dense<0.000000e+00> : vector<8xf32>
    %19 = vector.multi_reduction <add>, %18, %cst_7 [1] : vector<8x32xf32> to vector<8xf32>
    %20 = vector.shape_cast %19 : vector<8xf32> to vector<8x1xf32>
    %cst_8 = arith.constant 0.0322580636 : f32
    %21 = vector.broadcast %cst_8 : f32 to vector<8x1xf32>
    %22 = arith.mulf %20, %21 : vector<8x1xf32>
    %23 = math.sqrt %22 : vector<8x1xf32>
    %cst_9 = arith.constant 9.99999997E-7 : f32
    %24 = vector.broadcast %cst_9 : f32 to vector<8x1xf32>
    %25 = arith.addf %23, %24 : vector<8x1xf32>
    %26 = tpu.reciprocal %25 : vector<8x1xf32> -> vector<8x1xf32>
    %27 = vector.shape_cast %9 : vector<32xf32> to vector<1x32xf32>
    %28 = vector.broadcast %27 : vector<1x32xf32> to vector<8x32xf32>
    %29 = arith.mulf %28, %17 : vector<8x32xf32>
    %30 = vector.broadcast %26 : vector<8x1xf32> to vector<8x32xf32>
    %31 = arith.mulf %29, %30 : vector<8x32xf32>
    %32 = vector.shape_cast %11 : vector<32xf32> to vector<1x32xf32>
    %33 = vector.broadcast %32 : vector<1x32xf32> to vector<8x32xf32>
    %34 = arith.addf %31, %33 : vector<8x32xf32>
    %c0_10 = arith.constant 0 : index
    %c0_11 = arith.constant 0 : index
    %35 = vector.load %arg6[%c0_10, %c0_11] : memref<32x32xf32, #tpu.memory_space<vmem>>, vector<32x32xf32>
    %cst_12 = arith.constant dense<0.000000e+00> : vector<8x32xf32>
    %36 = tpu.matmul %34, %35, %cst_12 {dimension_numbers = #tpu.dot_dimension_numbers<[1], [0], [0], [1], [0, 0, 1, 1], [], []>} : vector<8x32xf32>, vector<32x32xf32>, vector<8x32xf32> -> vector<8x32xf32>
    %c0_13 = arith.constant 0 : index
    %c0_14 = arith.constant 0 : index
    %37 = vector.load %arg7[%c0_13, %c0_14] : memref<1x32xf32, #tpu.memory_space<vmem>>, vector<1x32xf32>
    %38 = vector.shape_cast %37 : vector<1x32xf32> to vector<32xf32>
    %39 = vector.shape_cast %38 : vector<32xf32> to vector<1x32xf32>
    %40 = vector.broadcast %39 : vector<1x32xf32> to vector<8x32xf32>
    %41 = arith.addf %36, %40 : vector<8x32xf32>
    %cst_15 = arith.constant 0.353553385 : f32
    %42 = vector.broadcast %cst_15 : f32 to vector<8x32xf32>
    %43 = arith.mulf %41, %42 : vector<8x32xf32>
    %44 = vector.shape_cast %43 : vector<8x32xf32> to vector<8x4x8xf32>
    %45 = tpu.transpose %44, [1, 0, 2] : vector<8x4x8xf32> -> vector<4x8x8xf32>
    %cst_16 = arith.constant 0xFF800000 : f32
    %46 = vector.broadcast %cst_16 : f32 to vector<4x8x1xf32>
    %c0_17 = arith.constant 0 : index
    %c0_18 = arith.constant 0 : index
    %c0_19 = arith.constant 0 : index
    %47 = vector.load %arg21[%c0_17, %c0_18, %c0_19] : memref<4x8x1xf32, #tpu.memory_space<vmem>>, vector<4x8x1xf32>
    tpu.vector_store %arg21[%c0_17, %c0_18, %c0_19], %46 {strides = array<i32>} : memref<4x8x1xf32, #tpu.memory_space<vmem>>, vector<4x8x1xf32>,
    %cst_20 = arith.constant 0.000000e+00 : f32
    %48 = vector.broadcast %cst_20 : f32 to vector<4x8x1xf32>
    %c0_21 = arith.constant 0 : index
    %c0_22 = arith.constant 0 : index
    %c0_23 = arith.constant 0 : index
    %49 = vector.load %arg22[%c0_21, %c0_22, %c0_23] : memref<4x8x1xf32, #tpu.memory_space<vmem>>, vector<4x8x1xf32>
    tpu.vector_store %arg22[%c0_21, %c0_22, %c0_23], %48 {strides = array<i32>} : memref<4x8x1xf32, #tpu.memory_space<vmem>>, vector<4x8x1xf32>,
    %cst_24 = arith.constant 0.000000e+00 : f32
    %50 = vector.broadcast %cst_24 : f32 to vector<4x8x8xf32>
    %c0_25 = arith.constant 0 : index
    %c0_26 = arith.constant 0 : index
    %c0_27 = arith.constant 0 : index
    %51 = vector.load %arg23[%c0_25, %c0_26, %c0_27] : memref<4x8x8xf32, #tpu.memory_space<vmem>>, vector<4x8x8xf32>
    tpu.vector_store %arg23[%c0_25, %c0_26, %c0_27], %50 {strides = array<i32>} : memref<4x8x8xf32, #tpu.memory_space<vmem>>, vector<4x8x8xf32>,
    %c0_i32_28 = arith.constant 0 : i32
    %c1_i32 = arith.constant 1 : i32
    %52 = arith.muli %c0_i32_28, %c1_i32 : i32
    %c0_i32_29 = arith.constant 0 : i32
    %53 = arith.addi %c0_i32_29, %52 : i32
    %c0_30 = arith.constant 0 : index
    %54 = arith.index_cast %53 : i32 to index
    %c0_31 = arith.constant 0 : index
    %c0_32 = arith.constant 0 : index
    %55 = vector.load %arg19[%c0_30, %54, %c0_31, %c0_32] : memref<4x1x8x8xf32, #tpu.memory_space<vmem>>, vector<4x1x8x8xf32>
    %56 = vector.shape_cast %55 : vector<4x1x8x8xf32> to vector<4x8x8xf32>
    %c0_33 = arith.constant 0 : index
    %57 = arith.index_cast %53 : i32 to index
    %c0_34 = arith.constant 0 : index
    %c0_35 = arith.constant 0 : index
    %58 = vector.load %arg20[%c0_33, %57, %c0_34, %c0_35] : memref<4x1x8x8xf32, #tpu.memory_space<vmem>>, vector<4x1x8x8xf32>
    %59 = vector.shape_cast %58 : vector<4x1x8x8xf32> to vector<4x8x8xf32>
    "tpu.trace_start"() <{level = 10 : i32, message = "hqd,hkd->hqk"}> : () -> ()
    %cst_36 = arith.constant dense<0.000000e+00> : vector<4x8x8xf32>
    %60 = tpu.matmul %45, %56, %cst_36 {dimension_numbers = #tpu.dot_dimension_numbers<[2], [2], [1], [1], [0, 0, 0, 1, 1, 1], [0], [0]>} : vector<4x8x8xf32>, vector<4x8x8xf32>, vector<4x8x8xf32> -> vector<4x8x8xf32>
    "tpu.trace_stop"() : () -> ()
    %c0_37 = arith.constant 0 : index
    %61 = arith.index_cast %53 : i32 to index
    %c0_38 = arith.constant 0 : index
    %c0_39 = arith.constant 0 : index
    %62 = vector.load %arg3[%c0_37, %61, %c0_38, %c0_39] : memref<1x1x8x8xf32, #tpu.memory_space<vmem>>, vector<1x1x8x8xf32>
    %63 = vector.shape_cast %62 : vector<1x1x8x8xf32> to vector<8x8xf32>
    %64 = vector.shape_cast %63 : vector<8x8xf32> to vector<1x8x8xf32>
    %cst_40 = arith.constant 0.000000e+00 : f32
    %65 = vector.broadcast %cst_40 : f32 to vector<1x8x8xf32>
    %66 = arith.cmpf oeq, %64, %65 : vector<1x8x8xf32>
    %cst_41 = arith.constant -8.192000e+03 : f32
    %67 = vector.shape_cast %66 : vector<1x8x8xi1> to vector<1x8x8xi1>
    %68 = vector.broadcast %67 : vector<1x8x8xi1> to vector<4x8x8xi1>
    %69 = vector.broadcast %cst_41 : f32 to vector<4x8x8xf32>
    %70 = arith.select %68, %69, %60 : vector<4x8x8xi1>, vector<4x8x8xf32>
    %c0_42 = arith.constant 0 : index
    %c0_43 = arith.constant 0 : index
    %c0_44 = arith.constant 0 : index
    %71 = vector.load %arg21[%c0_42, %c0_43, %c0_44] : memref<4x8x1xf32, #tpu.memory_space<vmem>>, vector<4x8x1xf32>
    %cst_45 = arith.constant dense<0xFF800000> : vector<4x8xf32>
    %72 = vector.multi_reduction <maximumf>, %70, %cst_45 [2] : vector<4x8x8xf32> to vector<4x8xf32>
    %73 = vector.shape_cast %72 : vector<4x8xf32> to vector<4x8x1xf32>
    %74 = arith.maximumf %71, %73 : vector<4x8x1xf32>
    %75 = arith.subf %71, %74 : vector<4x8x1xf32>
    %76 = math.exp %75 : vector<4x8x1xf32>
    %77 = vector.broadcast %74 : vector<4x8x1xf32> to vector<4x8x8xf32>
    %78 = arith.subf %70, %77 : vector<4x8x8xf32>
    %79 = math.exp %78 : vector<4x8x8xf32>
    %c0_46 = arith.constant 0 : index
    %c0_47 = arith.constant 0 : index
    %c0_48 = arith.constant 0 : index
    %80 = vector.load %arg22[%c0_46, %c0_47, %c0_48] : memref<4x8x1xf32, #tpu.memory_space<vmem>>, vector<4x8x1xf32>
    %81 = arith.mulf %76, %80 : vector<4x8x1xf32>
    %cst_49 = arith.constant dense<0.000000e+00> : vector<4x8xf32>
    %82 = vector.multi_reduction <add>, %79, %cst_49 [2] : vector<4x8x8xf32> to vector<4x8xf32>
    %83 = vector.shape_cast %82 : vector<4x8xf32> to vector<4x8x1xf32>
    %84 = arith.addf %81, %83 : vector<4x8x1xf32>
    %c0_50 = arith.constant 0 : index
    %c0_51 = arith.constant 0 : index
    %c0_52 = arith.constant 0 : index
    %85 = vector.load %arg22[%c0_50, %c0_51, %c0_52] : memref<4x8x1xf32, #tpu.memory_space<vmem>>, vector<4x8x1xf32>
    tpu.vector_store %arg22[%c0_50, %c0_51, %c0_52], %84 {strides = array<i32>} : memref<4x8x1xf32, #tpu.memory_space<vmem>>, vector<4x8x1xf32>,
    %c0_53 = arith.constant 0 : index
    %c0_54 = arith.constant 0 : index
    %c0_55 = arith.constant 0 : index
    %86 = vector.load %arg23[%c0_53, %c0_54, %c0_55] : memref<4x8x8xf32, #tpu.memory_space<vmem>>, vector<4x8x8xf32>
    %87 = vector.broadcast %76 : vector<4x8x1xf32> to vector<4x8x8xf32>
    %88 = arith.mulf %87, %86 : vector<4x8x8xf32>
    "tpu.trace_start"() <{level = 10 : i32, message = "hqk,hkd->hqd"}> : () -> ()
    %cst_56 = arith.constant dense<0.000000e+00> : vector<4x8x8xf32>
    %89 = tpu.matmul %79, %59, %cst_56 {dimension_numbers = #tpu.dot_dimension_numbers<[2], [1], [1], [2], [0, 0, 0, 1, 1, 2], [0], [0]>} : vector<4x8x8xf32>, vector<4x8x8xf32>, vector<4x8x8xf32> -> vector<4x8x8xf32>
    "tpu.trace_stop"() : () -> ()
    %90 = arith.addf %88, %89 : vector<4x8x8xf32>
    %c0_57 = arith.constant 0 : index
    %c0_58 = arith.constant 0 : index
    %c0_59 = arith.constant 0 : index
    %91 = vector.load %arg23[%c0_57, %c0_58, %c0_59] : memref<4x8x8xf32, #tpu.memory_space<vmem>>, vector<4x8x8xf32>
    tpu.vector_store %arg23[%c0_57, %c0_58, %c0_59], %90 {strides = array<i32>} : memref<4x8x8xf32, #tpu.memory_space<vmem>>, vector<4x8x8xf32>,
    %c0_60 = arith.constant 0 : index
    %c0_61 = arith.constant 0 : index
    %c0_62 = arith.constant 0 : index
    %92 = vector.load %arg21[%c0_60, %c0_61, %c0_62] : memref<4x8x1xf32, #tpu.memory_space<vmem>>, vector<4x8x1xf32>
    tpu.vector_store %arg21[%c0_60, %c0_61, %c0_62], %74 {strides = array<i32>} : memref<4x8x1xf32, #tpu.memory_space<vmem>>, vector<4x8x1xf32>,
    %c1_i32_63 = arith.constant 1 : i32
    %c0_64 = arith.constant 0 : index
    %c0_65 = arith.constant 0 : index
    %c0_66 = arith.constant 0 : index
    %93 = vector.load %arg22[%c0_64, %c0_65, %c0_66] : memref<4x8x1xf32, #tpu.memory_space<vmem>>, vector<4x8x1xf32>
    %94 = tpu.reciprocal %93 : vector<4x8x1xf32> -> vector<4x8x1xf32>
    %c0_67 = arith.constant 0 : index
    %c0_68 = arith.constant 0 : index
    %c0_69 = arith.constant 0 : index
    %95 = vector.load %arg23[%c0_67, %c0_68, %c0_69] : memref<4x8x8xf32, #tpu.memory_space<vmem>>, vector<4x8x8xf32>
    %96 = vector.broadcast %94 : vector<4x8x1xf32> to vector<4x8x8xf32>
    %97 = arith.mulf %95, %96 : vector<4x8x8xf32>
    %98 = tpu.transpose %97, [1, 0, 2] : vector<4x8x8xf32> -> vector<8x4x8xf32>
    %99 = vector.shape_cast %98 : vector<8x4x8xf32> to vector<8x32xf32>
    %c0_70 = arith.constant 0 : index
    %c0_71 = arith.constant 0 : index
    %100 = vector.load %arg10[%c0_70, %c0_71] : memref<32x32xf32, #tpu.memory_space<vmem>>, vector<32x32xf32>
    %cst_72 = arith.constant dense<0.000000e+00> : vector<8x32xf32>
    %101 = tpu.matmul %99, %100, %cst_72 {dimension_numbers = #tpu.dot_dimension_numbers<[1], [0], [0], [1], [0, 0, 1, 1], [], []>} : vector<8x32xf32>, vector<32x32xf32>, vector<8x32xf32> -> vector<8x32xf32>
    %c0_73 = arith.constant 0 : index
    %c0_74 = arith.constant 0 : index
    %102 = vector.load %arg11[%c0_73, %c0_74] : memref<1x32xf32, #tpu.memory_space<vmem>>, vector<1x32xf32>
    %103 = vector.shape_cast %102 : vector<1x32xf32> to vector<32xf32>
    %104 = vector.shape_cast %103 : vector<32xf32> to vector<1x32xf32>
    %105 = vector.broadcast %104 : vector<1x32xf32> to vector<8x32xf32>
    %106 = arith.addf %101, %105 : vector<8x32xf32>
    %107 = arith.addf %7, %106 : vector<8x32xf32>
    %c0_75 = arith.constant 0 : index
    %c0_76 = arith.constant 0 : index
    %108 = vector.load %arg12[%c0_75, %c0_76] : memref<1x32xf32, #tpu.memory_space<vmem>>, vector<1x32xf32>
    %109 = vector.shape_cast %108 : vector<1x32xf32> to vector<32xf32>
    %c0_77 = arith.constant 0 : index
    %c0_78 = arith.constant 0 : index
    %110 = vector.load %arg13[%c0_77, %c0_78] : memref<1x32xf32, #tpu.memory_space<vmem>>, vector<1x32xf32>
    %111 = vector.shape_cast %110 : vector<1x32xf32> to vector<32xf32>
    %cst_79 = arith.constant dense<0.000000e+00> : vector<8xf32>
    %112 = vector.multi_reduction <add>, %107, %cst_79 [1] : vector<8x32xf32> to vector<8xf32>
    %113 = vector.shape_cast %112 : vector<8xf32> to vector<8x1xf32>
    %cst_80 = arith.constant 3.200000e+01 : f32
    %114 = vector.broadcast %cst_80 : f32 to vector<8x1xf32>
    %115 = arith.divf %113, %114 : vector<8x1xf32>
    %116 = vector.broadcast %115 : vector<8x1xf32> to vector<8x32xf32>
    %117 = arith.subf %107, %116 : vector<8x32xf32>
    %118 = arith.mulf %117, %117 : vector<8x32xf32>
    %cst_81 = arith.constant dense<0.000000e+00> : vector<8xf32>
    %119 = vector.multi_reduction <add>, %118, %cst_81 [1] : vector<8x32xf32> to vector<8xf32>
    %120 = vector.shape_cast %119 : vector<8xf32> to vector<8x1xf32>
    %cst_82 = arith.constant 0.0322580636 : f32
    %121 = vector.broadcast %cst_82 : f32 to vector<8x1xf32>
    %122 = arith.mulf %120, %121 : vector<8x1xf32>
    %123 = math.sqrt %122 : vector<8x1xf32>
    %cst_83 = arith.constant 9.99999997E-7 : f32
    %124 = vector.broadcast %cst_83 : f32 to vector<8x1xf32>
    %125 = arith.addf %123, %124 : vector<8x1xf32>
    %126 = tpu.reciprocal %125 : vector<8x1xf32> -> vector<8x1xf32>
    %127 = vector.shape_cast %109 : vector<32xf32> to vector<1x32xf32>
    %128 = vector.broadcast %127 : vector<1x32xf32> to vector<8x32xf32>
    %129 = arith.mulf %128, %117 : vector<8x32xf32>
    %130 = vector.broadcast %126 : vector<8x1xf32> to vector<8x32xf32>
    %131 = arith.mulf %129, %130 : vector<8x32xf32>
    %132 = vector.shape_cast %111 : vector<32xf32> to vector<1x32xf32>
    %133 = vector.broadcast %132 : vector<1x32xf32> to vector<8x32xf32>
    %134 = arith.addf %131, %133 : vector<8x32xf32>
    %c0_84 = arith.constant 0 : index
    %c0_85 = arith.constant 0 : index
    %135 = vector.load %arg14[%c0_84, %c0_85] : memref<32x128xf32, #tpu.memory_space<vmem>>, vector<32x128xf32>
    %cst_86 = arith.constant dense<0.000000e+00> : vector<8x128xf32>
    %136 = tpu.matmul %134, %135, %cst_86 {dimension_numbers = #tpu.dot_dimension_numbers<[1], [0], [0], [1], [0, 0, 1, 1], [], []>} : vector<8x32xf32>, vector<32x128xf32>, vector<8x128xf32> -> vector<8x128xf32>
    %c0_87 = arith.constant 0 : index
    %c0_88 = arith.constant 0 : index
    %137 = vector.load %arg15[%c0_87, %c0_88] : memref<1x128xf32, #tpu.memory_space<vmem>>, vector<1x128xf32>
    %138 = vector.shape_cast %137 : vector<1x128xf32> to vector<128xf32>
    %139 = vector.shape_cast %138 : vector<128xf32> to vector<1x128xf32>
    %140 = vector.broadcast %139 : vector<1x128xf32> to vector<8x128xf32>
    %141 = arith.addf %136, %140 : vector<8x128xf32>
    %cst_89 = arith.constant 5.000000e-01 : f32
    %142 = vector.broadcast %cst_89 : f32 to vector<8x128xf32>
    %143 = arith.mulf %142, %141 : vector<8x128xf32>
    %cst_90 = arith.constant 4.471500e-02 : f32
    %144 = vector.broadcast %cst_90 : f32 to vector<8x128xf32>
    %145 = arith.mulf %144, %141 : vector<8x128xf32>
    %146 = arith.mulf %145, %141 : vector<8x128xf32>
    %147 = arith.mulf %146, %141 : vector<8x128xf32>
    %148 = arith.addf %141, %147 : vector<8x128xf32>
    %cst_91 = arith.constant 0.797884583 : f32
    %149 = vector.broadcast %cst_91 : f32 to vector<8x128xf32>
    %150 = arith.mulf %149, %148 : vector<8x128xf32>
    %151 = math.tanh %150 : vector<8x128xf32>
    %cst_92 = arith.constant 1.000000e+00 : f32
    %152 = vector.broadcast %cst_92 : f32 to vector<8x128xf32>
    %153 = arith.addf %152, %151 : vector<8x128xf32>
    %154 = arith.mulf %143, %153 : vector<8x128xf32>
    %c0_93 = arith.constant 0 : index
    %c0_94 = arith.constant 0 : index
    %155 = vector.load %arg16[%c0_93, %c0_94] : memref<128x32xf32, #tpu.memory_space<vmem>>, vector<128x32xf32>
    %cst_95 = arith.constant dense<0.000000e+00> : vector<8x32xf32>
    %156 = tpu.matmul %154, %155, %cst_95 {dimension_numbers = #tpu.dot_dimension_numbers<[1], [0], [0], [1], [0, 0, 1, 1], [], []>} : vector<8x128xf32>, vector<128x32xf32>, vector<8x32xf32> -> vector<8x32xf32>
    %c0_96 = arith.constant 0 : index
    %c0_97 = arith.constant 0 : index
    %157 = vector.load %arg17[%c0_96, %c0_97] : memref<1x32xf32, #tpu.memory_space<vmem>>, vector<1x32xf32>
    %158 = vector.shape_cast %157 : vector<1x32xf32> to vector<32xf32>
    %159 = vector.shape_cast %158 : vector<32xf32> to vector<1x32xf32>
    %160 = vector.broadcast %159 : vector<1x32xf32> to vector<8x32xf32>
    %161 = arith.addf %156, %160 : vector<8x32xf32>
    %162 = arith.addf %107, %161 : vector<8x32xf32>
    %c0_98 = arith.constant 0 : index
    %c0_99 = arith.constant 0 : index
    %c0_100 = arith.constant 0 : index
    %163 = vector.load %arg18[%c0_98, %c0_99, %c0_100] : memref<1x8x32xf32, #tpu.memory_space<vmem>>, vector<1x8x32xf32>
    %164 = vector.shape_cast %163 : vector<1x8x32xf32> to vector<8x32xf32>
    %165 = vector.shape_cast %162 : vector<8x32xf32> to vector<1x8x32xf32>
    tpu.vector_store %arg18[%c0_98, %c0_99, %c0_100], %165 {strides = array<i32>} : memref<1x8x32xf32, #tpu.memory_space<vmem>>, vector<1x8x32xf32>,
    return
  }
  func.func @transform_0(%arg0: i32, %arg1: i32) -> (i32, i32, i32) {
    %c0_i32 = arith.constant 0 : i32
    %c0_i32_0 = arith.constant 0 : i32
    %c0_i32_1 = arith.constant 0 : i32
    return %arg0, %c0_i32, %c0_i32_0 : i32, i32, i32
  }
  func.func @transform_1(%arg0: i32, %arg1: i32) -> (i32, i32, i32, i32) {
    %c0_i32 = arith.constant 0 : i32
    %c0_i32_0 = arith.constant 0 : i32
    %c0_i32_1 = arith.constant 0 : i32
    return %arg0, %c0_i32, %arg1, %c0_i32_0 : i32, i32, i32, i32
  }
  func.func @transform_2(%arg0: i32, %arg1: i32) -> (i32, i32) {
    %c0_i32 = arith.constant 0 : i32
    %c0_i32_0 = arith.constant 0 : i32
    %c0_i32_1 = arith.constant 0 : i32
    return %c0_i32, %c0_i32_0 : i32, i32
  }
  func.func @transform_3(%arg0: i32, %arg1: i32) -> (i32, i32) {
    %c0_i32 = arith.constant 0 : i32
    %c0_i32_0 = arith.constant 0 : i32
    %c0_i32_1 = arith.constant 0 : i32
    return %c0_i32, %c0_i32_0 : i32, i32
  }
  func.func @transform_4(%arg0: i32, %arg1: i32) -> (i32, i32) {
    %c0_i32 = arith.constant 0 : i32
    %c0_i32_0 = arith.constant 0 : i32
    %c0_i32_1 = arith.constant 0 : i32
    return %c0_i32, %c0_i32_0 : i32, i32
  }
  func.func @transform_5(%arg0: i32, %arg1: i32) -> (i32, i32) {
    %c0_i32 = arith.constant 0 : i32
    %c0_i32_0 = arith.constant 0 : i32
    %c0_i32_1 = arith.constant 0 : i32
    return %c0_i32, %c0_i32_0 : i32, i32
  }
  func.func @transform_6(%arg0: i32, %arg1: i32) -> (i32, i32) {
    %c0_i32 = arith.constant 0 : i32
    %c0_i32_0 = arith.constant 0 : i32
    %c0_i32_1 = arith.constant 0 : i32
    return %c0_i32, %c0_i32_0 : i32, i32
  }
  func.func @transform_7(%arg0: i32, %arg1: i32) -> (i32, i32) {
    %c0_i32 = arith.constant 0 : i32
    %c0_i32_0 = arith.constant 0 : i32
    %c0_i32_1 = arith.constant 0 : i32
    return %c0_i32, %c0_i32_0 : i32, i32
  }
  func.func @transform_8(%arg0: i32, %arg1: i32) -> (i32, i32) {
    %c0_i32 = arith.constant 0 : i32
    %c0_i32_0 = arith.constant 0 : i32
    %c0_i32_1 = arith.constant 0 : i32
    return %c0_i32, %c0_i32_0 : i32, i32
  }
  func.func @transform_9(%arg0: i32, %arg1: i32) -> (i32, i32) {
    %c0_i32 = arith.constant 0 : i32
    %c0_i32_0 = arith.constant 0 : i32
    %c0_i32_1 = arith.constant 0 : i32
    return %c0_i32, %c0_i32_0 : i32, i32
  }
  func.func @transform_10(%arg0: i32, %arg1: i32) -> (i32, i32) {
    %c0_i32 = arith.constant 0 : i32
    %c0_i32_0 = arith.constant 0 : i32
    %c0_i32_1 = arith.constant 0 : i32
    return %c0_i32, %c0_i32_0 : i32, i32
  }
  func.func @transform_11(%arg0: i32, %arg1: i32) -> (i32, i32) {
    %c0_i32 = arith.constant 0 : i32
    %c0_i32_0 = arith.constant 0 : i32
    %c0_i32_1 = arith.constant 0 : i32
    return %c0_i32, %c0_i32_0 : i32, i32
  }
  func.func @transform_12(%arg0: i32, %arg1: i32) -> (i32, i32) {
    %c0_i32 = arith.constant 0 : i32
    %c0_i32_0 = arith.constant 0 : i32
    %c0_i32_1 = arith.constant 0 : i32
    return %c0_i32, %c0_i32_0 : i32, i32
  }
  func.func @transform_13(%arg0: i32, %arg1: i32) -> (i32, i32) {
    %c0_i32 = arith.constant 0 : i32
    %c0_i32_0 = arith.constant 0 : i32
    %c0_i32_1 = arith.constant 0 : i32
    return %c0_i32, %c0_i32_0 : i32, i32
  }
  func.func @transform_14(%arg0: i32, %arg1: i32) -> (i32, i32) {
    %c0_i32 = arith.constant 0 : i32
    %c0_i32_0 = arith.constant 0 : i32
    %c0_i32_1 = arith.constant 0 : i32
    return %c0_i32, %c0_i32_0 : i32, i32
  }
  func.func @transform_15(%arg0: i32, %arg1: i32) -> (i32, i32) {
    %c0_i32 = arith.constant 0 : i32
    %c0_i32_0 = arith.constant 0 : i32
    %c0_i32_1 = arith.constant 0 : i32
    return %c0_i32, %c0_i32_0 : i32, i32
  }
  func.func @transform_16(%arg0: i32, %arg1: i32) -> (i32, i32, i32) {
    %c0_i32 = arith.constant 0 : i32
    %c0_i32_0 = arith.constant 0 : i32
    return %arg0, %arg1, %c0_i32 : i32, i32, i32
  }
}

module attributes {stable_mosaic.version = 11 : i64} {
  func.func @kernel(%arg0: i32, %arg1: i32, %arg2: memref<1x8x32xf32, #tpu.memory_space<vmem>>, %arg3: memref<1x1x8x8xf32, #tpu.memory_space<vmem>>, %arg4: memref<1x32xf32, #tpu.memory_space<vmem>>, %arg5: memref<1x32xf32, #tpu.memory_space<vmem>>, %arg6: memref<32x32xf32, #tpu.memory_space<vmem>>, %arg7: memref<1x32xf32, #tpu.memory_space<vmem>>, %arg8: memref<32x64xf32, #tpu.memory_space<vmem>>, %arg9: memref<1x64xf32, #tpu.memory_space<vmem>>, %arg10: memref<32x32xf32, #tpu.memory_space<vmem>>, %arg11: memref<1x32xf32, #tpu.memory_space<vmem>>, %arg12: memref<1x32xf32, #tpu.memory_space<vmem>>, %arg13: memref<1x32xf32, #tpu.memory_space<vmem>>, %arg14: memref<32x128xf32, #tpu.memory_space<vmem>>, %arg15: memref<1x128xf32, #tpu.memory_space<vmem>>, %arg16: memref<128x32xf32, #tpu.memory_space<vmem>>, %arg17: memref<1x32xf32, #tpu.memory_space<vmem>>, %arg18: memref<1x8x32xf32, #tpu.memory_space<vmem>>, %arg19: memref<4x1x8x8xf32, #tpu.memory_space<vmem>>, %arg20: memref<4x1x8x8xf32, #tpu.memory_space<vmem>>, %arg21: memref<4x8x1xf32, #tpu.memory_space<vmem>>, %arg22: memref<4x8x1xf32, #tpu.memory_space<vmem>>, %arg23: memref<4x8x8xf32, #tpu.memory_space<vmem>>) attributes {dimension_semantics = [#tpu.dimension_semantics<parallel>, #tpu.dimension_semantics<arbitrary>], iteration_bounds = array<i64: 2, 1>, scalar_prefetch = 0 : i64, scratch_operands = 5 : i64, tpu.core_type = #tpu.core_type<tc>, window_params = [{transform_indices = @transform_0, window_bounds = array<i64: 1, 8, 32>}, {transform_indices = @transform_1, window_bounds = array<i64: 1, 1, 8, 8>}, {pipeline_mode = #tpu.pipeline_mode<synchronous>, transform_indices = @transform_2, window_bounds = array<i64: 1, 32>}, {pipeline_mode = #tpu.pipeline_mode<synchronous>, transform_indices = @transform_3, window_bounds = array<i64: 1, 32>}, {pipeline_mode = #tpu.pipeline_mode<synchronous>, transform_indices = @transform_4, window_bounds = array<i64: 32, 32>}, {pipeline_mode = #tpu.pipeline_mode<synchronous>, transform_indices = @transform_5, window_bounds = array<i64: 1, 32>}, {pipeline_mode = #tpu.pipeline_mode<synchronous>, transform_indices = @transform_6, window_bounds = array<i64: 32, 64>}, {pipeline_mode = #tpu.pipeline_mode<synchronous>, transform_indices = @transform_7, window_bounds = array<i64: 1, 64>}, {pipeline_mode = #tpu.pipeline_mode<synchronous>, transform_indices = @transform_8, window_bounds = array<i64: 32, 32>}, {pipeline_mode = #tpu.pipeline_mode<synchronous>, transform_indices = @transform_9, window_bounds = array<i64: 1, 32>}, {pipeline_mode = #tpu.pipeline_mode<synchronous>, transform_indices = @transform_10, window_bounds = array<i64: 1, 32>}, {pipeline_mode = #tpu.pipeline_mode<synchronous>, transform_indices = @transform_11, window_bounds = array<i64: 1, 32>}, {pipeline_mode = #tpu.pipeline_mode<synchronous>, transform_indices = @transform_12, window_bounds = array<i64: 32, 128>}, {pipeline_mode = #tpu.pipeline_mode<synchronous>, transform_indices = @transform_13, window_bounds = array<i64: 1, 128>}, {pipeline_mode = #tpu.pipeline_mode<synchronous>, transform_indices = @transform_14, window_bounds = array<i64: 128, 32>}, {pipeline_mode = #tpu.pipeline_mode<synchronous>, transform_indices = @transform_15, window_bounds = array<i64: 1, 32>}, {transform_indices = @transform_16, window_bounds = array<i64: 1, 8, 32>}]} {
    %c0_i32 = arith.constant 0 : i32
    %0 = arith.cmpi eq, %arg1, %c0_i32 : i32
    %1 = arith.extui %0 : i1 to i32
    %c0_i32_0 = arith.constant 0 : i32
    %2 = arith.cmpi ne, %1, %c0_i32_0 : i32
    scf.if %2 {
      %c0_101 = arith.constant 0 : index
      %c0_102 = arith.constant 0 : index
      %c0_103 = arith.constant 0 : index
      %166 = vector.load %arg2[%c0_101, %c0_102, %c0_103] : memref<1x8x32xf32, #tpu.memory_space<vmem>>, vector<1x8x32xf32>
      %167 = vector.shape_cast %166 : vector<1x8x32xf32> to vector<8x32xf32>
      %c0_104 = arith.constant 0 : index
      %c0_105 = arith.constant 0 : index
      %168 = vector.load %arg4[%c0_104, %c0_105] : memref<1x32xf32, #tpu.memory_space<vmem>>, vector<1x32xf32>
      %169 = vector.shape_cast %168 : vector<1x32xf32> to vector<32xf32>
      %c0_106 = arith.constant 0 : index
      %c0_107 = arith.constant 0 : index
      %170 = vector.load %arg5[%c0_106, %c0_107] : memref<1x32xf32, #tpu.memory_space<vmem>>, vector<1x32xf32>
      %171 = vector.shape_cast %170 : vector<1x32xf32> to vector<32xf32>
      %cst_108 = arith.constant dense<0.000000e+00> : vector<8xf32>
      %172 = vector.multi_reduction <add>, %167, %cst_108 [1] : vector<8x32xf32> to vector<8xf32>
      %173 = vector.shape_cast %172 : vector<8xf32> to vector<8x1xf32>
      %cst_109 = arith.constant 3.200000e+01 : f32
      %174 = vector.broadcast %cst_109 : f32 to vector<8x1xf32>
      %175 = arith.divf %173, %174 : vector<8x1xf32>
      %176 = vector.broadcast %175 : vector<8x1xf32> to vector<8x32xf32>
      %177 = arith.subf %167, %176 : vector<8x32xf32>
      %178 = arith.mulf %177, %177 : vector<8x32xf32>
      %cst_110 = arith.constant dense<0.000000e+00> : vector<8xf32>
      %179 = vector.multi_reduction <add>, %178, %cst_110 [1] : vector<8x32xf32> to vector<8xf32>
      %180 = vector.shape_cast %179 : vector<8xf32> to vector<8x1xf32>
      %cst_111 = arith.constant 0.0322580636 : f32
      %181 = vector.broadcast %cst_111 : f32 to vector<8x1xf32>
      %182 = arith.mulf %180, %181 : vector<8x1xf32>
      %183 = math.sqrt %182 : vector<8x1xf32>
      %cst_112 = arith.constant 9.99999997E-7 : f32
      %184 = vector.broadcast %cst_112 : f32 to vector<8x1xf32>
      %185 = arith.addf %183, %184 : vector<8x1xf32>
      %186 = tpu.reciprocal %185 : vector<8x1xf32> -> vector<8x1xf32>
      %187 = vector.shape_cast %169 : vector<32xf32> to vector<1x32xf32>
      %188 = vector.broadcast %187 : vector<1x32xf32> to vector<8x32xf32>
      %189 = arith.mulf %188, %177 : vector<8x32xf32>
      %190 = vector.broadcast %186 : vector<8x1xf32> to vector<8x32xf32>
      %191 = arith.mulf %189, %190 : vector<8x32xf32>
      %192 = vector.shape_cast %171 : vector<32xf32> to vector<1x32xf32>
      %193 = vector.broadcast %192 : vector<1x32xf32> to vector<8x32xf32>
      %194 = arith.addf %191, %193 : vector<8x32xf32>
      %c0_113 = arith.constant 0 : index
      %c0_114 = arith.constant 0 : index
      %195 = vector.load %arg8[%c0_113, %c0_114] : memref<32x64xf32, #tpu.memory_space<vmem>>, vector<32x64xf32>
      %cst_115 = arith.constant dense<0.000000e+00> : vector<8x64xf32>
      %196 = tpu.matmul %194, %195, %cst_115 {dimension_numbers = #tpu.dot_dimension_numbers<[1], [0], [0], [1], [0, 0, 1, 1], [], []>} : vector<8x32xf32>, vector<32x64xf32>, vector<8x64xf32> -> vector<8x64xf32>
      %c0_116 = arith.constant 0 : index
      %c0_117 = arith.constant 0 : index
      %197 = vector.load %arg9[%c0_116, %c0_117] : memref<1x64xf32, #tpu.memory_space<vmem>>, vector<1x64xf32>
      %198 = vector.shape_cast %197 : vector<1x64xf32> to vector<64xf32>
      %199 = vector.shape_cast %198 : vector<64xf32> to vector<1x64xf32>
      %200 = vector.broadcast %199 : vector<1x64xf32> to vector<8x64xf32>
      %201 = arith.addf %196, %200 : vector<8x64xf32>
      %202 = vector.extract_strided_slice %201 {offsets = [0, 0], sizes = [8, 32], strides = [1, 1]} : vector<8x64xf32> to vector<8x32xf32>
      %203 = vector.shape_cast %202 : vector<8x32xf32> to vector<8x4x8xf32>
      %204 = tpu.transpose %203, [1, 0, 2] : vector<8x4x8xf32> -> vector<4x8x8xf32>
      %205 = vector.extract_strided_slice %201 {offsets = [0, 32], sizes = [8, 32], strides = [1, 1]} : vector<8x64xf32> to vector<8x32xf32>
      %206 = vector.shape_cast %205 : vector<8x32xf32> to vector<8x4x8xf32>
      %207 = tpu.transpose %206, [1, 0, 2] : vector<8x4x8xf32> -> vector<4x8x8xf32>
      %208 = vector.shape_cast %204 : vector<4x8x8xf32> to vector<4x1x8x8xf32>
      %c0_118 = arith.constant 0 : index
      %c0_119 = arith.constant 0 : index
      %c0_120 = arith.constant 0 : index
      %c0_121 = arith.constant 0 : index
      %209 = vector.load %arg19[%c0_118, %c0_119, %c0_120, %c0_121] : memref<4x1x8x8xf32, #tpu.memory_space<vmem>>, vector<4x1x8x8xf32>
      tpu.vector_store %arg19[%c0_118, %c0_119, %c0_120, %c0_121], %208 {strides = array<i32>} : memref<4x1x8x8xf32, #tpu.memory_space<vmem>>, vector<4x1x8x8xf32>,
      %210 = vector.shape_cast %207 : vector<4x8x8xf32> to vector<4x1x8x8xf32>
      %c0_122 = arith.constant 0 : index
      %c0_123 = arith.constant 0 : index
      %c0_124 = arith.constant 0 : index
      %c0_125 = arith.constant 0 : index
      %211 = vector.load %arg20[%c0_122, %c0_123, %c0_124, %c0_125] : memref<4x1x8x8xf32, #tpu.memory_space<vmem>>, vector<4x1x8x8xf32>
      tpu.vector_store %arg20[%c0_122, %c0_123, %c0_124, %c0_125], %210 {strides = array<i32>} : memref<4x1x8x8xf32, #tpu.memory_space<vmem>>, vector<4x1x8x8xf32>,
    } else {
    }
    %c8_i32 = arith.constant 8 : i32
    %3 = arith.muli %arg1, %c8_i32 : i32
    %4 = tpu.assume_multiple %3, 8 : i32
    %c0 = arith.constant 0 : index
    %5 = arith.index_cast %4 : i32 to index
    %c0_1 = arith.constant 0 : index
    %6 = vector.load %arg2[%c0, %5, %c0_1] : memref<1x8x32xf32, #tpu.memory_space<vmem>>, vector<1x8x32xf32>
    %7 = vector.shape_cast %6 : vector<1x8x32xf32> to vector<8x32xf32>
    %c0_2 = arith.constant 0 : index
    %c0_3 = arith.constant 0 : index
    %8 = vector.load %arg4[%c0_2, %c0_3] : memref<1x32xf32, #tpu.memory_space<vmem>>, vector<1x32xf32>
    %9 = vector.shape_cast %8 : vector<1x32xf32> to vector<32xf32>
    %c0_4 = arith.constant 0 : index
    %c0_5 = arith.constant 0 : index
    %10 = vector.load %arg5[%c0_4, %c0_5] : memref<1x32xf32, #tpu.memory_space<vmem>>, vector<1x32xf32>
    %11 = vector.shape_cast %10 : vector<1x32xf32> to vector<32xf32>
    %cst = arith.constant dense<0.000000e+00> : vector<8xf32>
    %12 = vector.multi_reduction <add>, %7, %cst [1] : vector<8x32xf32> to vector<8xf32>
    %13 = vector.shape_cast %12 : vector<8xf32> to vector<8x1xf32>
    %cst_6 = arith.constant 3.200000e+01 : f32
    %14 = vector.broadcast %cst_6 : f32 to vector<8x1xf32>
    %15 = arith.divf %13, %14 : vector<8x1xf32>
    %16 = vector.broadcast %15 : vector<8x1xf32> to vector<8x32xf32>
    %17 = arith.subf %7, %16 : vector<8x32xf32>
    %18 = arith.mulf %17, %17 : vector<8x32xf32>
    %cst_7 = arith.constant dense<0.000000e+00> : vector<8xf32>
    %19 = vector.multi_reduction <add>, %18, %cst_7 [1] : vector<8x32xf32> to vector<8xf32>
    %20 = vector.shape_cast %19 : vector<8xf32> to vector<8x1xf32>
    %cst_8 = arith.constant 0.0322580636 : f32
    %21 = vector.broadcast %cst_8 : f32 to vector<8x1xf32>
    %22 = arith.mulf %20, %21 : vector<8x1xf32>
    %23 = math.sqrt %22 : vector<8x1xf32>
    %cst_9 = arith.constant 9.99999997E-7 : f32
    %24 = vector.broadcast %cst_9 : f32 to vector<8x1xf32>
    %25 = arith.addf %23, %24 : vector<8x1xf32>
    %26 = tpu.reciprocal %25 : vector<8x1xf32> -> vector<8x1xf32>
    %27 = vector.shape_cast %9 : vector<32xf32> to vector<1x32xf32>
    %28 = vector.broadcast %27 : vector<1x32xf32> to vector<8x32xf32>
    %29 = arith.mulf %28, %17 : vector<8x32xf32>
    %30 = vector.broadcast %26 : vector<8x1xf32> to vector<8x32xf32>
    %31 = arith.mulf %29, %30 : vector<8x32xf32>
    %32 = vector.shape_cast %11 : vector<32xf32> to vector<1x32xf32>
    %33 = vector.broadcast %32 : vector<1x32xf32> to vector<8x32xf32>
    %34 = arith.addf %31, %33 : vector<8x32xf32>
    %c0_10 = arith.constant 0 : index
    %c0_11 = arith.constant 0 : index
    %35 = vector.load %arg6[%c0_10, %c0_11] : memref<32x32xf32, #tpu.memory_space<vmem>>, vector<32x32xf32>
    %cst_12 = arith.constant dense<0.000000e+00> : vector<8x32xf32>
    %36 = tpu.matmul %34, %35, %cst_12 {dimension_numbers = #tpu.dot_dimension_numbers<[1], [0], [0], [1], [0, 0, 1, 1], [], []>} : vector<8x32xf32>, vector<32x32xf32>, vector<8x32xf32> -> vector<8x32xf32>
    %c0_13 = arith.constant 0 : index
    %c0_14 = arith.constant 0 : index
    %37 = vector.load %arg7[%c0_13, %c0_14] : memref<1x32xf32, #tpu.memory_space<vmem>>, vector<1x32xf32>
    %38 = vector.shape_cast %37 : vector<1x32xf32> to vector<32xf32>
    %39 = vector.shape_cast %38 : vector<32xf32> to vector<1x32xf32>
    %40 = vector.broadcast %39 : vector<1x32xf32> to vector<8x32xf32>
    %41 = arith.addf %36, %40 : vector<8x32xf32>
    %cst_15 = arith.constant 0.353553385 : f32
    %42 = vector.broadcast %cst_15 : f32 to vector<8x32xf32>
    %43 = arith.mulf %41, %42 : vector<8x32xf32>
    %44 = vector.shape_cast %43 : vector<8x32xf32> to vector<8x4x8xf32>
    %45 = tpu.transpose %44, [1, 0, 2] : vector<8x4x8xf32> -> vector<4x8x8xf32>
    %cst_16 = arith.constant 0xFF800000 : f32
    %46 = vector.broadcast %cst_16 : f32 to vector<4x8x1xf32>
    %c0_17 = arith.constant 0 : index
    %c0_18 = arith.constant 0 : index
    %c0_19 = arith.constant 0 : index
    %47 = vector.load %arg21[%c0_17, %c0_18, %c0_19] : memref<4x8x1xf32, #tpu.memory_space<vmem>>, vector<4x8x1xf32>
    tpu.vector_store %arg21[%c0_17, %c0_18, %c0_19], %46 {strides = array<i32>} : memref<4x8x1xf32, #tpu.memory_space<vmem>>, vector<4x8x1xf32>,
    %cst_20 = arith.constant 0.000000e+00 : f32
    %48 = vector.broadcast %cst_20 : f32 to vector<4x8x1xf32>
    %c0_21 = arith.constant 0 : index
    %c0_22 = arith.constant 0 : index
    %c0_23 = arith.constant 0 : index
    %49 = vector.load %arg22[%c0_21, %c0_22, %c0_23] : memref<4x8x1xf32, #tpu.memory_space<vmem>>, vector<4x8x1xf32>
    tpu.vector_store %arg22[%c0_21, %c0_22, %c0_23], %48 {strides = array<i32>} : memref<4x8x1xf32, #tpu.memory_space<vmem>>, vector<4x8x1xf32>,
    %cst_24 = arith.constant 0.000000e+00 : f32
    %50 = vector.broadcast %cst_24 : f32 to vector<4x8x8xf32>
    %c0_25 = arith.constant 0 : index
    %c0_26 = arith.constant 0 : index
    %c0_27 = arith.constant 0 : index
    %51 = vector.load %arg23[%c0_25, %c0_26, %c0_27] : memref<4x8x8xf32, #tpu.memory_space<vmem>>, vector<4x8x8xf32>
    tpu.vector_store %arg23[%c0_25, %c0_26, %c0_27], %50 {strides = array<i32>} : memref<4x8x8xf32, #tpu.memory_space<vmem>>, vector<4x8x8xf32>,
    %c0_i32_28 = arith.constant 0 : i32
    %c1_i32 = arith.constant 1 : i32
    %52 = arith.muli %c0_i32_28, %c1_i32 : i32
    %c0_i32_29 = arith.constant 0 : i32
    %53 = arith.addi %c0_i32_29, %52 : i32
    %c0_30 = arith.constant 0 : index
    %54 = arith.index_cast %53 : i32 to index
    %c0_31 = arith.constant 0 : index
    %c0_32 = arith.constant 0 : index
    %55 = vector.load %arg19[%c0_30, %54, %c0_31, %c0_32] : memref<4x1x8x8xf32, #tpu.memory_space<vmem>>, vector<4x1x8x8xf32>
    %56 = vector.shape_cast %55 : vector<4x1x8x8xf32> to vector<4x8x8xf32>
    %c0_33 = arith.constant 0 : index
    %57 = arith.index_cast %53 : i32 to index
    %c0_34 = arith.constant 0 : index
    %c0_35 = arith.constant 0 : index
    %58 = vector.load %arg20[%c0_33, %57, %c0_34, %c0_35] : memref<4x1x8x8xf32, #tpu.memory_space<vmem>>, vector<4x1x8x8xf32>
    %59 = vector.shape_cast %58 : vector<4x1x8x8xf32> to vector<4x8x8xf32>
    "tpu.trace_start"() <{level = 10 : i32, message = "hqd,hkd->hqk"}> : () -> ()
    %cst_36 = arith.constant dense<0.000000e+00> : vector<4x8x8xf32>
    %60 = tpu.matmul %45, %56, %cst_36 {dimension_numbers = #tpu.dot_dimension_numbers<[2], [2], [1], [1], [0, 0, 0, 1, 1, 1], [0], [0]>} : vector<4x8x8xf32>, vector<4x8x8xf32>, vector<4x8x8xf32> -> vector<4x8x8xf32>
    "tpu.trace_stop"() : () -> ()
    %c0_37 = arith.constant 0 : index
    %61 = arith.index_cast %53 : i32 to index
    %c0_38 = arith.constant 0 : index
    %c0_39 = arith.constant 0 : index
    %62 = vector.load %arg3[%c0_37, %61, %c0_38, %c0_39] : memref<1x1x8x8xf32, #tpu.memory_space<vmem>>, vector<1x1x8x8xf32>
    %63 = vector.shape_cast %62 : vector<1x1x8x8xf32> to vector<8x8xf32>
    %64 = vector.shape_cast %63 : vector<8x8xf32> to vector<1x8x8xf32>
    %cst_40 = arith.constant 0.000000e+00 : f32
    %65 = vector.broadcast %cst_40 : f32 to vector<1x8x8xf32>
    %66 = arith.cmpf oeq, %64, %65 : vector<1x8x8xf32>
    %cst_41 = arith.constant -8.192000e+03 : f32
    %67 = vector.shape_cast %66 : vector<1x8x8xi1> to vector<1x8x8xi1>
    %68 = vector.broadcast %67 : vector<1x8x8xi1> to vector<4x8x8xi1>
    %69 = vector.broadcast %cst_41 : f32 to vector<4x8x8xf32>
    %70 = arith.select %68, %69, %60 : vector<4x8x8xi1>, vector<4x8x8xf32>
    %c0_42 = arith.constant 0 : index
    %c0_43 = arith.constant 0 : index
    %c0_44 = arith.constant 0 : index
    %71 = vector.load %arg21[%c0_42, %c0_43, %c0_44] : memref<4x8x1xf32, #tpu.memory_space<vmem>>, vector<4x8x1xf32>
    %cst_45 = arith.constant dense<0xFF800000> : vector<4x8xf32>
    %72 = vector.multi_reduction <maximumf>, %70, %cst_45 [2] : vector<4x8x8xf32> to vector<4x8xf32>
    %73 = vector.shape_cast %72 : vector<4x8xf32> to vector<4x8x1xf32>
    %74 = arith.maximumf %71, %73 : vector<4x8x1xf32>
    %75 = arith.subf %71, %74 : vector<4x8x1xf32>
    %76 = math.exp %75 : vector<4x8x1xf32>
    %77 = vector.broadcast %74 : vector<4x8x1xf32> to vector<4x8x8xf32>
    %78 = arith.subf %70, %77 : vector<4x8x8xf32>
    %79 = math.exp %78 : vector<4x8x8xf32>
    %c0_46 = arith.constant 0 : index
    %c0_47 = arith.constant 0 : index
    %c0_48 = arith.constant 0 : index
    %80 = vector.load %arg22[%c0_46, %c0_47, %c0_48] : memref<4x8x1xf32, #tpu.memory_space<vmem>>, vector<4x8x1xf32>
    %81 = arith.mulf %76, %80 : vector<4x8x1xf32>
    %cst_49 = arith.constant dense<0.000000e+00> : vector<4x8xf32>
    %82 = vector.multi_reduction <add>, %79, %cst_49 [2] : vector<4x8x8xf32> to vector<4x8xf32>
    %83 = vector.shape_cast %82 : vector<4x8xf32> to vector<4x8x1xf32>
    %84 = arith.addf %81, %83 : vector<4x8x1xf32>
    %c0_50 = arith.constant 0 : index
    %c0_51 = arith.constant 0 : index
    %c0_52 = arith.constant 0 : index
    %85 = vector.load %arg22[%c0_50, %c0_51, %c0_52] : memref<4x8x1xf32, #tpu.memory_space<vmem>>, vector<4x8x1xf32>
    tpu.vector_store %arg22[%c0_50, %c0_51, %c0_52], %84 {strides = array<i32>} : memref<4x8x1xf32, #tpu.memory_space<vmem>>, vector<4x8x1xf32>,
    %c0_53 = arith.constant 0 : index
    %c0_54 = arith.constant 0 : index
    %c0_55 = arith.constant 0 : index
    %86 = vector.load %arg23[%c0_53, %c0_54, %c0_55] : memref<4x8x8xf32, #tpu.memory_space<vmem>>, vector<4x8x8xf32>
    %87 = vector.broadcast %76 : vector<4x8x1xf32> to vector<4x8x8xf32>
    %88 = arith.mulf %87, %86 : vector<4x8x8xf32>
    "tpu.trace_start"() <{level = 10 : i32, message = "hqk,hkd->hqd"}> : () -> ()
    %cst_56 = arith.constant dense<0.000000e+00> : vector<4x8x8xf32>
    %89 = tpu.matmul %79, %59, %cst_56 {dimension_numbers = #tpu.dot_dimension_numbers<[2], [1], [1], [2], [0, 0, 0, 1, 1, 2], [0], [0]>} : vector<4x8x8xf32>, vector<4x8x8xf32>, vector<4x8x8xf32> -> vector<4x8x8xf32>
    "tpu.trace_stop"() : () -> ()
    %90 = arith.addf %88, %89 : vector<4x8x8xf32>
    %c0_57 = arith.constant 0 : index
    %c0_58 = arith.constant 0 : index
    %c0_59 = arith.constant 0 : index
    %91 = vector.load %arg23[%c0_57, %c0_58, %c0_59] : memref<4x8x8xf32, #tpu.memory_space<vmem>>, vector<4x8x8xf32>
    tpu.vector_store %arg23[%c0_57, %c0_58, %c0_59], %90 {strides = array<i32>} : memref<4x8x8xf32, #tpu.memory_space<vmem>>, vector<4x8x8xf32>,
    %c0_60 = arith.constant 0 : index
    %c0_61 = arith.constant 0 : index
    %c0_62 = arith.constant 0 : index
    %92 = vector.load %arg21[%c0_60, %c0_61, %c0_62] : memref<4x8x1xf32, #tpu.memory_space<vmem>>, vector<4x8x1xf32>
    tpu.vector_store %arg21[%c0_60, %c0_61, %c0_62], %74 {strides = array<i32>} : memref<4x8x1xf32, #tpu.memory_space<vmem>>, vector<4x8x1xf32>,
    %c1_i32_63 = arith.constant 1 : i32
    %c0_64 = arith.constant 0 : index
    %c0_65 = arith.constant 0 : index
    %c0_66 = arith.constant 0 : index
    %93 = vector.load %arg22[%c0_64, %c0_65, %c0_66] : memref<4x8x1xf32, #tpu.memory_space<vmem>>, vector<4x8x1xf32>
    %94 = tpu.reciprocal %93 : vector<4x8x1xf32> -> vector<4x8x1xf32>
    %c0_67 = arith.constant 0 : index
    %c0_68 = arith.constant 0 : index
    %c0_69 = arith.constant 0 : index
    %95 = vector.load %arg23[%c0_67, %c0_68, %c0_69] : memref<4x8x8xf32, #tpu.memory_space<vmem>>, vector<4x8x8xf32>
    %96 = vector.broadcast %94 : vector<4x8x1xf32> to vector<4x8x8xf32>
    %97 = arith.mulf %95, %96 : vector<4x8x8xf32>
    %98 = tpu.transpose %97, [1, 0, 2] : vector<4x8x8xf32> -> vector<8x4x8xf32>
    %99 = vector.shape_cast %98 : vector<8x4x8xf32> to vector<8x32xf32>
    %c0_70 = arith.constant 0 : index
    %c0_71 = arith.constant 0 : index
    %100 = vector.load %arg10[%c0_70, %c0_71] : memref<32x32xf32, #tpu.memory_space<vmem>>, vector<32x32xf32>
    %cst_72 = arith.constant dense<0.000000e+00> : vector<8x32xf32>
    %101 = tpu.matmul %99, %100, %cst_72 {dimension_numbers = #tpu.dot_dimension_numbers<[1], [0], [0], [1], [0, 0, 1, 1], [], []>} : vector<8x32xf32>, vector<32x32xf32>, vector<8x32xf32> -> vector<8x32xf32>
    %c0_73 = arith.constant 0 : index
    %c0_74 = arith.constant 0 : index
    %102 = vector.load %arg11[%c0_73, %c0_74] : memref<1x32xf32, #tpu.memory_space<vmem>>, vector<1x32xf32>
    %103 = vector.shape_cast %102 : vector<1x32xf32> to vector<32xf32>
    %104 = vector.shape_cast %103 : vector<32xf32> to vector<1x32xf32>
    %105 = vector.broadcast %104 : vector<1x32xf32> to vector<8x32xf32>
    %106 = arith.addf %101, %105 : vector<8x32xf32>
    %107 = arith.addf %7, %106 : vector<8x32xf32>
    %c0_75 = arith.constant 0 : index
    %c0_76 = arith.constant 0 : index
    %108 = vector.load %arg12[%c0_75, %c0_76] : memref<1x32xf32, #tpu.memory_space<vmem>>, vector<1x32xf32>
    %109 = vector.shape_cast %108 : vector<1x32xf32> to vector<32xf32>
    %c0_77 = arith.constant 0 : index
    %c0_78 = arith.constant 0 : index
    %110 = vector.load %arg13[%c0_77, %c0_78] : memref<1x32xf32, #tpu.memory_space<vmem>>, vector<1x32xf32>
    %111 = vector.shape_cast %110 : vector<1x32xf32> to vector<32xf32>
    %cst_79 = arith.constant dense<0.000000e+00> : vector<8xf32>
    %112 = vector.multi_reduction <add>, %107, %cst_79 [1] : vector<8x32xf32> to vector<8xf32>
    %113 = vector.shape_cast %112 : vector<8xf32> to vector<8x1xf32>
    %cst_80 = arith.constant 3.200000e+01 : f32
    %114 = vector.broadcast %cst_80 : f32 to vector<8x1xf32>
    %115 = arith.divf %113, %114 : vector<8x1xf32>
    %116 = vector.broadcast %115 : vector<8x1xf32> to vector<8x32xf32>
    %117 = arith.subf %107, %116 : vector<8x32xf32>
    %118 = arith.mulf %117, %117 : vector<8x32xf32>
    %cst_81 = arith.constant dense<0.000000e+00> : vector<8xf32>
    %119 = vector.multi_reduction <add>, %118, %cst_81 [1] : vector<8x32xf32> to vector<8xf32>
    %120 = vector.shape_cast %119 : vector<8xf32> to vector<8x1xf32>
    %cst_82 = arith.constant 0.0322580636 : f32
    %121 = vector.broadcast %cst_82 : f32 to vector<8x1xf32>
    %122 = arith.mulf %120, %121 : vector<8x1xf32>
    %123 = math.sqrt %122 : vector<8x1xf32>
    %cst_83 = arith.constant 9.99999997E-7 : f32
    %124 = vector.broadcast %cst_83 : f32 to vector<8x1xf32>
    %125 = arith.addf %123, %124 : vector<8x1xf32>
    %126 = tpu.reciprocal %125 : vector<8x1xf32> -> vector<8x1xf32>
    %127 = vector.shape_cast %109 : vector<32xf32> to vector<1x32xf32>
    %128 = vector.broadcast %127 : vector<1x32xf32> to vector<8x32xf32>
    %129 = arith.mulf %128, %117 : vector<8x32xf32>
    %130 = vector.broadcast %126 : vector<8x1xf32> to vector<8x32xf32>
    %131 = arith.mulf %129, %130 : vector<8x32xf32>
    %132 = vector.shape_cast %111 : vector<32xf32> to vector<1x32xf32>
    %133 = vector.broadcast %132 : vector<1x32xf32> to vector<8x32xf32>
    %134 = arith.addf %131, %133 : vector<8x32xf32>
    %c0_84 = arith.constant 0 : index
    %c0_85 = arith.constant 0 : index
    %135 = vector.load %arg14[%c0_84, %c0_85] : memref<32x128xf32, #tpu.memory_space<vmem>>, vector<32x128xf32>
    %cst_86 = arith.constant dense<0.000000e+00> : vector<8x128xf32>
    %136 = tpu.matmul %134, %135, %cst_86 {dimension_numbers = #tpu.dot_dimension_numbers<[1], [0], [0], [1], [0, 0, 1, 1], [], []>} : vector<8x32xf32>, vector<32x128xf32>, vector<8x128xf32> -> vector<8x128xf32>
    %c0_87 = arith.constant 0 : index
    %c0_88 = arith.constant 0 : index
    %137 = vector.load %arg15[%c0_87, %c0_88] : memref<1x128xf32, #tpu.memory_space<vmem>>, vector<1x128xf32>
    %138 = vector.shape_cast %137 : vector<1x128xf32> to vector<128xf32>
    %139 = vector.shape_cast %138 : vector<128xf32> to vector<1x128xf32>
    %140 = vector.broadcast %139 : vector<1x128xf32> to vector<8x128xf32>
    %141 = arith.addf %136, %140 : vector<8x128xf32>
    %cst_89 = arith.constant 5.000000e-01 : f32
    %142 = vector.broadcast %cst_89 : f32 to vector<8x128xf32>
    %143 = arith.mulf %142, %141 : vector<8x128xf32>
    %cst_90 = arith.constant 4.471500e-02 : f32
    %144 = vector.broadcast %cst_90 : f32 to vector<8x128xf32>
    %145 = arith.mulf %144, %141 : vector<8x128xf32>
    %146 = arith.mulf %145, %141 : vector<8x128xf32>
    %147 = arith.mulf %146, %141 : vector<8x128xf32>
    %148 = arith.addf %141, %147 : vector<8x128xf32>
    %cst_91 = arith.constant 0.797884583 : f32
    %149 = vector.broadcast %cst_91 : f32 to vector<8x128xf32>
    %150 = arith.mulf %149, %148 : vector<8x128xf32>
    %151 = math.tanh %150 : vector<8x128xf32>
    %cst_92 = arith.constant 1.000000e+00 : f32
    %152 = vector.broadcast %cst_92 : f32 to vector<8x128xf32>
    %153 = arith.addf %152, %151 : vector<8x128xf32>
    %154 = arith.mulf %143, %153 : vector<8x128xf32>
    %c0_93 = arith.constant 0 : index
    %c0_94 = arith.constant 0 : index
    %155 = vector.load %arg16[%c0_93, %c0_94] : memref<128x32xf32, #tpu.memory_space<vmem>>, vector<128x32xf32>
    %cst_95 = arith.constant dense<0.000000e+00> : vector<8x32xf32>
    %156 = tpu.matmul %154, %155, %cst_95 {dimension_numbers = #tpu.dot_dimension_numbers<[1], [0], [0], [1], [0, 0, 1, 1], [], []>} : vector<8x128xf32>, vector<128x32xf32>, vector<8x32xf32> -> vector<8x32xf32>
    %c0_96 = arith.constant 0 : index
    %c0_97 = arith.constant 0 : index
    %157 = vector.load %arg17[%c0_96, %c0_97] : memref<1x32xf32, #tpu.memory_space<vmem>>, vector<1x32xf32>
    %158 = vector.shape_cast %157 : vector<1x32xf32> to vector<32xf32>
    %159 = vector.shape_cast %158 : vector<32xf32> to vector<1x32xf32>
    %160 = vector.broadcast %159 : vector<1x32xf32> to vector<8x32xf32>
    %161 = arith.addf %156, %160 : vector<8x32xf32>
    %162 = arith.addf %107, %161 : vector<8x32xf32>
    %c0_98 = arith.constant 0 : index
    %c0_99 = arith.constant 0 : index
    %c0_100 = arith.constant 0 : index
    %163 = vector.load %arg18[%c0_98, %c0_99, %c0_100] : memref<1x8x32xf32, #tpu.memory_space<vmem>>, vector<1x8x32xf32>
    %164 = vector.shape_cast %163 : vector<1x8x32xf32> to vector<8x32xf32>
    %165 = vector.shape_cast %162 : vector<8x32xf32> to vector<1x8x32xf32>
    tpu.vector_store %arg18[%c0_98, %c0_99, %c0_100], %165 {strides = array<i32>} : memref<1x8x32xf32, #tpu.memory_space<vmem>>, vector<1x8x32xf32>,
    return
  }
  func.func @transform_0(%arg0: i32, %arg1: i32) -> (i32, i32, i32) {
    %c0_i32 = arith.constant 0 : i32
    %c0_i32_0 = arith.constant 0 : i32
    %c0_i32_1 = arith.constant 0 : i32
    return %arg0, %c0_i32, %c0_i32_0 : i32, i32, i32
  }
  func.func @transform_1(%arg0: i32, %arg1: i32) -> (i32, i32, i32, i32) {
    %c0_i32 = arith.constant 0 : i32
    %c0_i32_0 = arith.constant 0 : i32
    %c0_i32_1 = arith.constant 0 : i32
    return %arg0, %c0_i32, %arg1, %c0_i32_0 : i32, i32, i32, i32
  }
  func.func @transform_2(%arg0: i32, %arg1: i32) -> (i32, i32) {
    %c0_i32 = arith.constant 0 : i32
    %c0_i32_0 = arith.constant 0 : i32
    %c0_i32_1 = arith.constant 0 : i32
    return %c0_i32, %c0_i32_0 : i32, i32
  }
  func.func @transform_3(%arg0: i32, %arg1: i32) -> (i32, i32) {
    %c0_i32 = arith.constant 0 : i32
    %c0_i32_0 = arith.constant 0 : i32
    %c0_i32_1 = arith.constant 0 : i32
    return %c0_i32, %c0_i32_0 : i32, i32
  }
  func.func @transform_4(%arg0: i32, %arg1: i32) -> (i32, i32) {
    %c0_i32 = arith.constant 0 : i32
    %c0_i32_0 = arith.constant 0 : i32
    %c0_i32_1 = arith.constant 0 : i32
    return %c0_i32, %c0_i32_0 : i32, i32
  }
  func.func @transform_5(%arg0: i32, %arg1: i32) -> (i32, i32) {
    %c0_i32 = arith.constant 0 : i32
    %c0_i32_0 = arith.constant 0 : i32
    %c0_i32_1 = arith.constant 0 : i32
    return %c0_i32, %c0_i32_0 : i32, i32
  }
  func.func @transform_6(%arg0: i32, %arg1: i32) -> (i32, i32) {
    %c0_i32 = arith.constant 0 : i32
    %c0_i32_0 = arith.constant 0 : i32
    %c0_i32_1 = arith.constant 0 : i32
    return %c0_i32, %c0_i32_0 : i32, i32
  }
  func.func @transform_7(%arg0: i32, %arg1: i32) -> (i32, i32) {
    %c0_i32 = arith.constant 0 : i32
    %c0_i32_0 = arith.constant 0 : i32
    %c0_i32_1 = arith.constant 0 : i32
    return %c0_i32, %c0_i32_0 : i32, i32
  }
  func.func @transform_8(%arg0: i32, %arg1: i32) -> (i32, i32) {
    %c0_i32 = arith.constant 0 : i32
    %c0_i32_0 = arith.constant 0 : i32
    %c0_i32_1 = arith.constant 0 : i32
    return %c0_i32, %c0_i32_0 : i32, i32
  }
  func.func @transform_9(%arg0: i32, %arg1: i32) -> (i32, i32) {
    %c0_i32 = arith.constant 0 : i32
    %c0_i32_0 = arith.constant 0 : i32
    %c0_i32_1 = arith.constant 0 : i32
    return %c0_i32, %c0_i32_0 : i32, i32
  }
  func.func @transform_10(%arg0: i32, %arg1: i32) -> (i32, i32) {
    %c0_i32 = arith.constant 0 : i32
    %c0_i32_0 = arith.constant 0 : i32
    %c0_i32_1 = arith.constant 0 : i32
    return %c0_i32, %c0_i32_0 : i32, i32
  }
  func.func @transform_11(%arg0: i32, %arg1: i32) -> (i32, i32) {
    %c0_i32 = arith.constant 0 : i32
    %c0_i32_0 = arith.constant 0 : i32
    %c0_i32_1 = arith.constant 0 : i32
    return %c0_i32, %c0_i32_0 : i32, i32
  }
  func.func @transform_12(%arg0: i32, %arg1: i32) -> (i32, i32) {
    %c0_i32 = arith.constant 0 : i32
    %c0_i32_0 = arith.constant 0 : i32
    %c0_i32_1 = arith.constant 0 : i32
    return %c0_i32, %c0_i32_0 : i32, i32
  }
  func.func @transform_13(%arg0: i32, %arg1: i32) -> (i32, i32) {
    %c0_i32 = arith.constant 0 : i32
    %c0_i32_0 = arith.constant 0 : i32
    %c0_i32_1 = arith.constant 0 : i32
    return %c0_i32, %c0_i32_0 : i32, i32
  }
  func.func @transform_14(%arg0: i32, %arg1: i32) -> (i32, i32) {
    %c0_i32 = arith.constant 0 : i32
    %c0_i32_0 = arith.constant 0 : i32
    %c0_i32_1 = arith.constant 0 : i32
    return %c0_i32, %c0_i32_0 : i32, i32
  }
  func.func @transform_15(%arg0: i32, %arg1: i32) -> (i32, i32) {
    %c0_i32 = arith.constant 0 : i32
    %c0_i32_0 = arith.constant 0 : i32
    %c0_i32_1 = arith.constant 0 : i32
    return %c0_i32, %c0_i32_0 : i32, i32
  }
  func.func @transform_16(%arg0: i32, %arg1: i32) -> (i32, i32, i32) {
    %c0_i32 = arith.constant 0 : i32
    %c0_i32_0 = arith.constant 0 : i32
    return %arg0, %arg1, %c0_i32 : i32, i32, i32
  }
}

</mosaic_0001>

<bundles_post_ra>
// kernel: tpu_custom_call.1
= control target key start
LH: loop header
LB: loop body
LE: loop exit
PB: predicated region body
PF: predicated region fallthrough
CT: control target
= control target key end

     0   :  { %s3704_s0 = inlined_call_operand.vmem [shape: f32[2,8,32], index: 0, kind: input, shape index: {}]   ;;  %s3705_s1 = inlined_call_operand.vmem [shape: f32[2,1,8,8], index: 1, kind: input, shape index: {}]   ;;  %s3706_s2 = inlined_call_operand.vmem [shape: f32[1,32], index: 2, kind: input, shape index: {}]   ;;  %s3707_s3 = inlined_call_operand.vmem [shape: f32[1,32], index: 3, kind: input, shape index: {}]   ;;  %s3708_s4 = inlined_call_operand.vmem [shape: f32[32,32], index: 4, kind: input, shape index: {}]   ;;  %s3709_s5 = inlined_call_operand.vmem [shape: f32[1,32], index: 5, kind: input, shape index: {}]   ;;  %s3710_s6 = inlined_call_operand.vmem [shape: f32[32,64], index: 6, kind: input, shape index: {}]   ;;  %s3711_s7 = inlined_call_operand.vmem [shape: f32[1,64], index: 7, kind: input, shape index: {}]   ;;  %s3712_s8 = inlined_call_operand.vmem [shape: f32[32,32], index: 8, kind: input, shape index: {}]   ;;  %s3713_s9 = inlined_call_operand.vmem [shape: f32[1,32], index: 9, kind: input, shape index: {}]   ;;  %s3714_s10 = inlined_call_operand.vmem [shape: f32[1,32], index: 10, kind: input, shape index: {}]   ;;  %s3715_s11 = inlined_call_operand.vmem [shape: f32[1,32], index: 11, kind: input, shape index: {}]   ;;  %s3716_s12 = inlined_call_operand.vmem [shape: f32[32,128], index: 12, kind: input, shape index: {}]   ;;  %s3717_s13 = inlined_call_operand.vmem [shape: f32[1,128], index: 13, kind: input, shape index: {}]   ;;  %s3718_s14 = inlined_call_operand.vmem [shape: f32[128,32], index: 14, kind: input, shape index: {}]   ;;  %s3719_s15 = inlined_call_operand.vmem [shape: f32[1,32], index: 15, kind: input, shape index: {}]   ;;  %s3720_s16 = inlined_call_operand.hbm [shape: f32[2,8,32], index: 16, kind: output, shape index: {}]  }
   0x1   :  { %3726 = sst [smem:[#allocation15_spill]] %s3704_s0 }
   0x2   :  { %3727 = sst [smem:[#allocation16_spill]] %s3706_s2 }
   0x3   :  { %3728 = sst [smem:[#allocation17_spill]] %s3710_s6 }
   0x4   :  { %21 = vsyncpa [#allocation8], 0 }
   0x5   :  { %23 = vsyncpa [#allocation8 + $0x1], 0  ;;  %s3174_s21 = smov 0   ;;  %s3176_s22 = smov 0  }
   0x6   :  { %s3178_s23 = smov 0   ;;  %s3180_s24 = smov 0  }
   0x7   :  { %s3182_s25 = smov 0   ;;  %s3184_s26 = smov 0  }
   0x8 LB: > { %3729 = sst [smem:[#allocation10_spill]] %s3060_s23  ;;  %s2617_s27 = sadd.s32 4294967295, %s3072_s26   ;;  %s3072_s26 = sphi %s3184_s26, %s29_s26   ;;  %s3068_s25 = sphi %s3182_s25, %s3744_s25   ;;  %s3064_s24 = sphi %s3180_s24, %s3743_s24   ;;  %s3060_s23 = sphi %s3178_s23, %s3742_s23   ;;  %s3056_s22 = sphi %s3176_s22, %s3746_s22   ;;  %s3052_s21 = sphi %s3174_s21, %s3745_s21  }
   0x9   : > { %3730 = sst [smem:[#allocation11_spill]] %s3068_s25  ;;  %s2618_s28 = sadd.s32 4294967294, %s3072_s26  }
   0xa   : > { %s41_s29 = sadd.s32 1, %s3068_s25  ;;  %s398_s30 = sadd.s32 1, %s3060_s23 }
   0xb   : > { %p43_p0 = scmp.ge.s32.totalorder %s41_s29, 2  ;;  %p408_p1 = scmp.ne.s32.totalorder %s3060_s23, %s3056_s22 }
   0xc   : > { %p409_p2 = scmp.eq.s32.totalorder %s2617_s27, 1  ;;  %p414_p3 = scmp.ne.s32.totalorder %s3056_s22, %s3052_s21 }
   0xd   : > { %s3748_s29 = smov (%p43_p0, %s41_s29), 0  ;;  %p415_p5 = scmp.eq.s32.totalorder %s2618_s28, 1 }
   0xe   : > { %3731 = sst [smem:[#allocation12_spill]] %s3748_s29  ;;  %p3214_p4 = por %p409_p2, %p408_p1 }
   0xf   : > { %s393_s17 = ssub.s32 %s3068_s25, %s3748_s29  ;;  %p2621_p6 = scmp.ge.s32.totalorder %s3072_s26, 1 }
  0x10   : > { %p396_p7 = scmp.eq.s32.totalorder %s393_s17, 0  ;;  %p3221_p8 = por %p415_p5, %p414_p3 }
  0x11   : > { %p492_p9 = scmp.lt.s32.totalorder %s3072_s26, 3 }
  0x12   : > { %s3733_s18 = scalar_select %p3221_p8, 1, 0 }
  0x13   : > { %s3227_s19 = scalar_select %p396_p7, %s3060_s23, %s398_s30  }
  0x14   : > { %3734 = sst [smem:[#allocation13_spill]] %s3733_s18  ;;  %p493_p10 = pnand %p2621_p6, %p492_p9 }
  0x15   : > { %3735 = sst [smem:[#allocation14_spill]] %s3227_s19  ;;  %p548_p11 = scmp.lt.s32.totalorder (!%p493_p10), %s3064_s24, 1  ;;  %vm566_vm0 = vcmask (!%p493_p10), 261120   ;;  %v3074_v15 = vmov (!%p493_p10), 0.0|0.0   ;;  %vm3075_vm1 = vmmov (!%p493_p10), 0   ;;  %v3076_v18 = vmov (!%p493_p10), 0.0  }
  0x16   : > { %496 = sbr.rel (%p493_p10) target bundleno = 2676 (0xa74), region = 84  ;;  %s3736_s29 = sld [smem:[#allocation15_spill]] (!%p493_p10)  ;;  %2836 = vmatprep.subr.bf16.mxu1 (!%p493_p10), %v3074_v15  ;;  %2725 = vmatprep.mubr.msk.f32.mxu1 (!%p493_p10), %vm3075_vm1, %v3076_v18  ;;  %v1030_v38 = vld [vmem:[%s3708_s4] sm:$0xff] (!%p493_p10)  ;;  %v1031_v39 = vld [vmem:[%s3708_s4 + $0x8] sm:$0xff] (!%p493_p10)  ;;  %v1032_v45 = vld [vmem:[%s3708_s4 + $0x10] sm:$0xff] (!%p493_p10)  ;;  %vm980_vm6 = vcmask (!%p493_p10), 64512   ;;  %v701_v63 = vlaneseq (!%p493_p10) }
  0x17   : > { %s3737_s6 = sld [smem:[#allocation17_spill]] (!%p493_p10)  ;;  %2739 = vmatprep.subr.mxu0 (!%p493_p10), %v3076_v18  ;;  %2741 = vmatprep.mubr.msk.f32.mxu0 (!%p493_p10), %vm3075_vm1, %v3076_v18  ;;  %s3738_s2 = sld [smem:[#allocation16_spill]] (!%p493_p10)  ;;  %v2626_v41 = vld [vmem:[%s3707_s3] ss:$0 sm:$0xff] (!%p493_p10)  ;;  %v2843_v43 = vpack.c.bf16 (!%p493_p10), %v1031_v39, %v1030_v38  ;;  %v1033_v46 = vld [vmem:[%s3708_s4 + $0x18] sm:$0xff] (!%p493_p10)  ;;  %1271 = vst.msk [vmem:[#allocation6] sm:$0xff] (!%p493_p10), %vm980_vm6, %v3076_v18 }
  0x18   : > { %v2846_v49 = vpack.c.bf16 (!%p493_p10), %v1033_v46, %v1032_v45  ;;  %1272 = vst.msk [vmem:[#allocation6 + $0x8] sm:$0xff] (!%p493_p10), %vm980_vm6, %v3076_v18  ;;  %1273 = vst.msk [vmem:[#allocation6 + $0x10] sm:$0xff] (!%p493_p10), %vm980_vm6, %v3076_v18  ;;  %v2627_v52 = vld [vmem:[%s3711_s7] ss:$0 sm:$0xff] (!%p493_p10)  ;;  %s3077_s19 = smov (!%p493_p10), 120   ;;  %s3079_s28 = smov (!%p493_p10), 104  }
  0x19   : > { %1274 = vst.msk [vmem:[#allocation6 + $0x18] sm:$0xff] (!%p493_p10), %vm980_vm6, %v3076_v18  ;;  %v2635_v56 = vld [vmem:[%s3709_s5] ss:$0 sm:$0xff] (!%p493_p10)  ;;  %v3080_v61 = vmov (!%p493_p10), 1983009808   ;;  %vm1261_vm7 = vcmask (!%p493_p10), 7168  }
  0x1a   : > { %v699_v62 = vunpack.c.l.s4 (!%p493_p10), %v3080_v61  ;;  %1266 = vst.msk [vmem:[#allocation5] sm:$0xff] (!%p493_p10), %vm1261_vm7, %v3076_v18  ;;  %1267 = vst.msk [vmem:[#allocation5 + $0x8] sm:$0xff] (!%p493_p10), %vm1261_vm7, %v3076_v18  ;;  %s3085_s18 = smov (!%p493_p10), 16   ;;  %vm2204_vm9 = vcmask (!%p493_p10), 130048   ;;  %vm2206_vm10 = vcmask (!%p493_p10), 195584   ;;  %s2661_s30 = sshll.u32 (!%p493_p10), %s3064_s24, 7 }
  0x1b   : > { %1268 = vst.msk [vmem:[#allocation5 + $0x10] sm:$0xff] (!%p493_p10), %vm1261_vm7, %v3076_v18  ;;  %1269 = vst.msk [vmem:[#allocation5 + $0x18] sm:$0xff] (!%p493_p10), %vm1261_vm7, %v3076_v18 }
  0x1d   : > { %s3231_s20 = scalar_select %p548_p11, %s3064_s24, 1  ;;  %v602_v12 = vld [vmem:[%s3737_s6] sm:$0xff]  ;;  %v603_v13 = vld [vmem:[%s3737_s6 + $0x8] sm:$0xff]  ;;  %v604_v14 = vld [vmem:[%s3737_s6 + $0x10] sm:$0xff] }
  0x1e   : > { %v2837_v16 = vpack.c.bf16 %v603_v13, %v602_v12  ;;  %v605_v17 = vld [vmem:[%s3737_s6 + $0x18] sm:$0xff]  ;;  %v2625_v36 = vld [vmem:[%s3738_s2] ss:$0 sm:$0xff]  ;;  %s545_s6 = sand.u32 1, %s3056_s22  }
  0x1f   : > { %s3723_s27 = sshll.u32 %s3231_s20, 3  ;;  %v2840_v19 = vpack.c.bf16 %v605_v17, %v604_v14  ;;  %s3739_s17 = sshll.u32 %s3231_s20, 3 }
  0x20   : > { %s3239_s25 = scalar_lea.vmem %s3736_s29, %s3723_s27  ;;  %2838 = vmatpush3.bf16.msra.mxu1 %v2837_v16  ;;  %s3078_s27 = smov 112  }
  0x21   : > { %v563_v0 = vld [vmem:[%s3239_s25] sm:$0xff]  ;;  %2839 = vmatprep.subr.bf16.mxu1 %v3074_v15  ;;  %s558_s2 = scalar_lea.vmem %s3705_s1, %s3739_s17  ;;  %s3083_s20 = smov 96  }
  0x22   : > { %v567_v1 = vsel %vm566_vm0, %v563_v0, 0.0 }
  0x23   : > { %568 = vadd.xlane.f32.xlu0 %v567_v1 }
  0x24   : > { %2841 = vmatpush3.bf16.msra.mxu1 %v2840_v19 }
  0x25   : > { %2842 = vmatprep.subr.bf16.mxu1 %v3074_v15 }
  0x27   : > { %996 = vadd.xlane.f32.xlu0 %v567_v1 }
  0xb0   : > { %v569_v2 = vpop.xlane.xlu0 %568 }
  0xb1   : > { %v571_v3 = vmul.f32 0.03125, %v569_v2  ;;  %v700_v2 = vunpack.c.0.s8 %v699_v62 }
  0xb3   : > { %v572_v4 = vsub.f32 %v563_v0, %v571_v3  ;;  %v702_v3 = vshrl.u32 %v701_v63, 7 }
  0xb4   : > { %v997_v5 = vpop.xlane.xlu0 %996 }
  0xb5   : > { %v999_v6 = vmul.f32 0.03125, %v997_v5  ;;  %v573_v7 = vmul.f32 %v572_v4, %v572_v4  ;;  %v593_v37 = vmul.f32 %v2625_v36, %v572_v4 }
  0xb7   : > { %v1000_v8 = vsub.f32 %v563_v0, %v999_v6  ;;  %v574_v9 = vsel %vm566_vm0, %v573_v7, 0.0  ;;  %v3081_v0 = vmov 1934713408   ;;  %v3312_v6 = vsub.s32 %v700_v2, %v702_v3 }
  0xb8   : > { %575 = vadd.xlane.f32.xlu1 %v574_v9  ;;  %v731_v1 = vunpack.c.l.s4 %v3081_v0 }
  0xb9   : > { %v1001_v10 = vmul.f32 %v1000_v8, %v1000_v8  ;;  %v1021_v48 = vmul.f32 %v2625_v36, %v1000_v8 }
  0xba   : > { %v732_v5 = vunpack.c.0.s8 %v731_v1 }
  0xbb   : > { %v1002_v11 = vsel %vm566_vm0, %v1001_v10, 0.0 }
  0xbc   : > { %1003 = vadd.xlane.f32.xlu1 %v1002_v11  ;;  %v3326_v13 = vsub.s32 %v732_v5, %v702_v3 }
 0x145   : > { %v576_v20 = vpop.xlane.xlu1 %575 }
 0x146   : > { %v577_v21 = vmul.f32 0.032258064, %v576_v20 }
 0x148   : > { %2955 = vrsqrt.f32 %v577_v21  ;;  %vm580_vm2 = vcmp.eq.f32.partialorder %v577_v21, inf  ;;  %v583_v26 = vand.u32 2147483648, %v577_v21  ;;  %vm582_vm3 = vcmp.eq.f32.partialorder %v577_v21, 0.0 }
 0x149   : > { %v1004_v22 = vpop.xlane.xlu1 %1003 }
 0x14a   : > { %v1005_v23 = vmul.f32 0.032258064, %v1004_v22 }
 0x14c   : > { %2957 = vrsqrt.f32 %v1005_v23  ;;  %vm1008_vm4 = vcmp.eq.f32.partialorder %v1005_v23, inf  ;;  %v1011_v32 = vand.u32 2147483648, %v1005_v23  ;;  %vm1010_vm5 = vcmp.eq.f32.partialorder %v1005_v23, 0.0 }
 0x152   : > { %v2956_v24 = vpop.eup %2955 }
 0x153   : > { %v579_v25 = vmul.f32 %v2956_v24, %v577_v21 }
 0x155   : > { %v581_v27 = vsel %vm580_vm2, %v577_v21, %v579_v25 }
 0x156   : > { %v2958_v28 = vpop.eup %2957  ;;  %v584_v29 = vsel %vm582_vm3, %v583_v26, %v581_v27 }
 0x157   : > { %v1007_v30 = vmul.f32 %v2958_v28, %v1005_v23  ;;  %v585_v31 = vadd.f32 1e-06, %v584_v29 }
 0x159   : > { %v1009_v33 = vsel %vm1008_vm4, %v1005_v23, %v1007_v30  ;;  %2959 = vrcp.f32 %v585_v31 }
 0x15a   : > { %v1012_v34 = vsel %vm1010_vm5, %v1011_v32, %v1009_v33 }
 0x15b   : > { %v1013_v35 = vadd.f32 1e-06, %v1012_v34 }
 0x15d   : > { %2961 = vrcp.f32 %v1013_v35 }
 0x163   : > { %v2960_v40 = vpop.eup %2959 }
 0x164   : > { %v594_v42 = vmul.f32 %v2960_v40, %v593_v37 }
 0x166   : > { %v601_v44 = vadd.f32 %v2626_v41, %v594_v42 }
 0x167   : > { %v2962_v47 = vpop.eup %2961 }
 0x168   : > { %2726 = vmatmul.mubr.msk.f32.vlgmr.msra.gmra.mrb[0].mxu1 %vm566_vm0, %v601_v44  ;;  %v1022_v50 = vmul.f32 %v2962_v47, %v1021_v48 }
 0x169   : > { %2844 = vmatpush3.bf16.msra.mxu1 %v2843_v43  ;;  %2736 = vmatprep.mubr.msk.f32.mxu1 %vm3075_vm1, %v3076_v18 }
 0x16a   : > { %2845 = vmatprep.subr.bf16.mxu1 %v3074_v15  ;;  %v1029_v51 = vadd.f32 %v2626_v41, %v1022_v50 }
 0x16d   : > { %2847 = vmatpush3.bf16.msra.mxu1 %v2846_v49 }
 0x16e   : > { %2744 = vmatprep.subr.mxu1 %v3076_v18 }
 0x170   : > { %2737 = vmatmul.mubr.msk.f32.vlgmr.msra.gmra.mrb[2].mxu1 %vm566_vm0, %v1029_v51 }
 0x171   : > { %2746 = vmatprep.mubr.msk.f32.mxu1 %vm3075_vm1, %v3076_v18 }
 0x23b   : > { %v682_v53 = vpop.f32.mrb[0].mxu1 }
 0x23c   : > { %v3302_v54 = vadd.f32 %v2627_v52, %v682_v53  ;;  %v2727_v55 = vpop.f32.mrb[1].mxu1 }
 0x23e   : > { %687 = vrot.lane.b32.xlu0 %v3302_v54, %s3077_s19  ;;  %690 = vrot.lane.b32.xlu1 %v3302_v54, %s3078_s27 }
 0x242   : > { %693 = vrot.lane.b32.xlu1 %v3302_v54, %s3079_s28 }
 0x243   : > { %v1110_v57 = vpop.f32.mrb[2].mxu1 }
 0x244   : > { %v1111_v58 = vadd.f32 %v2635_v56, %v1110_v57  ;;  %v2738_v59 = vpop.f32.mrb[3].mxu1 }
 0x246   : > { %v1114_v60 = vmul.f32 0.35355338, %v1111_v58 }
 0x248   : > { %1119 = vrot.lane.b32.xlu0 %v1114_v60, %s3078_s27  ;;  %1116 = vrot.lane.b32.xlu1 %v1114_v60, %s3077_s19  ;;  %s2622_s19 = sshll.u32 %s545_s6, 3 }
 0x24c   : > { %1122 = vrot.lane.b32.xlu1 %v1114_v60, %s3079_s28 }
 0x2b0   : > { %v3310_v4 = vpop.permute.xlu1 %690  ;;  %v3318_v9 = vpop.permute.xlu0 %687 }
 0x2b1   : > { %v696_v7 = vcombine.low %v3302_v54, %v3310_v4  ;;  %v697_v8 = vcombine.high %v3302_v54, %v3310_v4 }
 0x2b3   : > { %v704_v14 = vrot.slane %v696_v7, %v3312_v6  ;;  %v711_v16 = vrot.slane %v697_v8, %v3312_v6 }
 0x2b4   : > { %v3320_v10 = vpop.permute.xlu1 %693 }
 0x2b5   : > { %v712_v11 = vcombine.low %v3318_v9, %v3320_v10  ;;  %v713_v12 = vcombine.high %v3318_v9, %v3320_v10 }
 0x2b7   : > { %v720_v17 = vrot.slane %v712_v11, %v3312_v6  ;;  %v727_v19 = vrot.slane %v713_v12, %v3312_v6 }
 0x2b9   : > { %v728_v20 = vcombine.low %v704_v14, %v720_v17  ;;  %v729_v21 = vcombine.high %v704_v14, %v720_v17  ;;  %v744_v22 = vcombine.low %v711_v16, %v727_v19  ;;  %v745_v23 = vcombine.high %v711_v16, %v727_v19 }
 0x2ba   : > { %v1117_v24 = vpop.permute.xlu1 %1116  ;;  %v1120_v29 = vpop.permute.xlu0 %1119 }
 0x2bb   : > { %v736_v25 = vrot.slane %v728_v20, %v3326_v13  ;;  %v743_v26 = vrot.slane %v729_v21, %v3326_v13  ;;  %v752_v27 = vrot.slane %v744_v22, %v3326_v13  ;;  %v759_v28 = vrot.slane %v745_v23, %v3326_v13 }
 0x2bc   : > { %v1125_v34 = vcombine.low %v1114_v60, %v1120_v29  ;;  %v1126_v35 = vcombine.high %v1114_v60, %v1120_v29 }
 0x2bd   : > { %v764_v30 = vcombine.low %v736_v25, %v743_v26  ;;  %v2629_v31 = vcombine.high %v736_v25, %v743_v26  ;;  %v780_v32 = vcombine.low %v752_v27, %v759_v28  ;;  %v2630_v33 = vcombine.high %v752_v27, %v759_v28 }
 0x2be   : > { %v1123_v36 = vpop.permute.xlu1 %1122  ;;  %v1133_v47 = vrot.slane %v1125_v34, %v3312_v6  ;;  %v1140_v48 = vrot.slane %v1126_v35, %v3312_v6  ;;  %v3082_v35 = vmov -inf  }
 0x2bf   : > { %v771_v37 = vrot.slane %v764_v30, %v3312_v6  ;;  %v779_v38 = vrot.slane %v2629_v31, %v3312_v6  ;;  %v787_v39 = vrot.slane %v780_v32, %v3312_v6  ;;  %v795_v40 = vrot.slane %v2630_v33, %v3312_v6  ;;  %1263 = vst.msk [vmem:[#allocation4 + $0x8] sm:$0xff] %vm1261_vm7, %v3082_v35 }
 0x2c0   : > { %v1141_v41 = vcombine.low %v1117_v24, %v1123_v36  ;;  %v1142_v42 = vcombine.high %v1117_v24, %v1123_v36  ;;  %1262 = vst.msk [vmem:[#allocation4] sm:$0xff] %vm1261_vm7, %v3082_v35  ;;  %1264 = vst.msk [vmem:[#allocation4 + $0x10] sm:$0xff] %vm1261_vm7, %v3082_v35  ;;  %v1587_v36 = vld [vmem:[%s558_s2] sm:$0xff]  ;;  %s3086_s2 = smov 8  }
 0x2c1   : > { %v796_v43 = vcombine.low %v771_v37, %v779_v38  ;;  %v797_v44 = vcombine.high %v771_v37, %v779_v38  ;;  %v812_v45 = vcombine.low %v787_v39, %v795_v40  ;;  %v813_v46 = vcombine.high %v787_v39, %v795_v40  ;;  %1265 = vst.msk [vmem:[#allocation4 + $0x18] sm:$0xff] %vm1261_vm7, %v3082_v35 }
 0x2c2   : > { %v1149_v49 = vrot.slane %v1141_v41, %v3312_v6  ;;  %v1156_v50 = vrot.slane %v1142_v42, %v3312_v6  ;;  %vm1588_vm8 = vcmp.eq.f32.partialorder %v1587_v36, 0.0 }
 0x2c3   : > { %v804_v51 = vrot.slane %v796_v43, %v3326_v13  ;;  %v811_v52 = vrot.slane %v797_v44, %v3326_v13  ;;  %v820_v53 = vrot.slane %v812_v45, %v3326_v13  ;;  %v827_v55 = vrot.slane %v813_v46, %v3326_v13 }
 0x2c4   : > { %v1157_v56 = vcombine.low %v1133_v47, %v1149_v49  ;;  %v1158_v57 = vcombine.high %v1133_v47, %v1149_v49  ;;  %v1173_v58 = vcombine.low %v1140_v48, %v1156_v50  ;;  %v1174_v59 = vcombine.high %v1140_v48, %v1156_v50 }
 0x2c5   : > { %v828_v60 = vcombine.low %v804_v51, %v820_v53  ;;  %v829_v61 = vcombine.high %v804_v51, %v820_v53  ;;  %v830_v62 = vcombine.low %v811_v52, %v827_v55  ;;  %v831_v63 = vcombine.high %v811_v52, %v827_v55 }
 0x2c6   : > { %v1165_v0 = vrot.slane %v1157_v56, %v3326_v13  ;;  %v1172_v1 = vrot.slane %v1158_v57, %v3326_v13  ;;  %v1181_v2 = vrot.slane %v1173_v58, %v3326_v13  ;;  %v1188_v3 = vrot.slane %v1174_v59, %v3326_v13  ;;  %v3421_v55 = vld [vmem:[#allocation4 + $0x8] sm:$0xff] }
 0x2c7   : > { %981 = vst.msk [vmem:[#allocation2] sm:$0xff] %vm980_vm6, %v828_v60  ;;  %982 = vst.msk [vmem:[#allocation2 + $0x8] sm:$0xff] %vm980_vm6, %v829_v61  ;;  %v3084_v53 = vmov 0   ;;  %v3423_v56 = vld [vmem:[#allocation4] sm:$0xff]  ;;  %v3431_v60 = vld [vmem:[#allocation4 + $0x10] sm:$0xff] }
 0x2c8   : > { %983 = vst.msk [vmem:[#allocation2 + $0x10] sm:$0xff] %vm980_vm6, %v830_v62  ;;  %984 = vst.msk [vmem:[#allocation2 + $0x18] sm:$0xff] %vm980_vm6, %v831_v63  ;;  %v1193_v5 = vcombine.low %v1165_v0, %v1172_v1  ;;  %v2637_v7 = vcombine.high %v1165_v0, %v1172_v1  ;;  %v1209_v8 = vcombine.low %v1181_v2, %v1188_v3  ;;  %2954 = vset.pattern.permute.xlu1 %v3084_v53  ;;  %v3446_v63 = vld [vmem:[#allocation4 + $0x18] sm:$0xff] }
 0x2c9   : > { %v2638_v11 = vcombine.high %v1181_v2, %v1188_v3  ;;  %2953 = vset.pattern.permute.xlu0 %v3084_v53 }
 0x2ca   : > { %v1200_v12 = vrot.slane %v1193_v5, %v3312_v6  ;;  %v1208_v14 = vrot.slane %v2637_v7, %v3312_v6  ;;  %v1216_v16 = vrot.slane %v1209_v8, %v3312_v6 }
 0x2cb   : > { %v1224_v17 = vrot.slane %v2638_v11, %v3312_v6 }
 0x2cc   : > { %v1226_v19 = vcombine.high %v1200_v12, %v1208_v14  ;;  %v1225_v21 = vcombine.low %v1200_v12, %v1208_v14 }
 0x2cd   : > { %v1242_v20 = vcombine.high %v1216_v16, %v1224_v17  ;;  %v1241_v22 = vcombine.low %v1216_v16, %v1224_v17 }
 0x2ce   : > { %v1275_v23 = vld [vmem:[#allocation2] sm:$0xff]  ;;  %v1276_v24 = vld [vmem:[#allocation2 + $0x8] sm:$0xff]  ;;  %v1233_v25 = vrot.slane %v1225_v21, %v3326_v13  ;;  %v1240_v27 = vrot.slane %v1226_v19, %v3326_v13 }
 0x2cf   : > { %v1249_v26 = vrot.slane %v1241_v22, %v3326_v13  ;;  %2740 = vmatpush3.xpose.msk.msra.mxu0 %vm980_vm6, %v1275_v23  ;;  %2745 = vmatpush3.xpose.msk.msra.mxu1 %vm980_vm6, %v1276_v24  ;;  %v1256_v30 = vrot.slane %v1242_v20, %v3326_v13  ;;  %v1277_v31 = vld [vmem:[#allocation2 + $0x10] sm:$0xff]  ;;  %v1278_v32 = vld [vmem:[#allocation2 + $0x18] sm:$0xff] }
 0x2d0   : > { %2749 = vmatprep.subr.mxu0 %v3076_v18  ;;  %2754 = vmatprep.subr.mxu1 %v3076_v18 }
 0x2d1   : > { %v1257_v28 = vcombine.low %v1233_v25, %v1249_v26  ;;  %v1258_v29 = vcombine.high %v1233_v25, %v1249_v26  ;;  %v1259_v33 = vcombine.low %v1240_v27, %v1256_v30  ;;  %v1260_v34 = vcombine.high %v1240_v27, %v1256_v30 }
 0x2d3   : > { %2742 = vmatmul.mubr.msk.f32.vlgmr.msra.gmra.mrb[0].mxu0 %vm980_vm6, %v1257_v28  ;;  %2747 = vmatmul.mubr.msk.f32.vlgmr.msra.gmra.mrb[4].mxu1 %vm980_vm6, %v1258_v29 }
 0x2d4   : > { %2750 = vmatpush3.xpose.msk.msra.mxu0 %vm980_vm6, %v1277_v31  ;;  %2755 = vmatpush3.xpose.msk.msra.mxu1 %vm980_vm6, %v1278_v32 }
 0x2d5   : > { %2751 = vmatprep.mubr.msk.f32.mxu0 %vm3075_vm1, %v3076_v18  ;;  %2756 = vmatprep.mubr.msk.f32.mxu1 %vm3075_vm1, %v3076_v18 }
 0x2d6   : > { %2759 = vmatprep.subr.mxu0 %v3076_v18  ;;  %2764 = vmatprep.subr.mxu1 %v3076_v18 }
 0x2d7   : > { %2752 = vmatmul.mubr.msk.f32.vlgmr.msra.gmra.mrb[2].mxu0 %vm980_vm6, %v1259_v33  ;;  %2757 = vmatmul.mubr.msk.f32.vlgmr.msra.gmra.mrb[6].mxu1 %vm980_vm6, %v1260_v34 }
 0x2d8   : > { %2761 = vmatprep.mubr.msk.f32.mxu0 %vm3075_vm1, %v3076_v18  ;;  %2766 = vmatprep.mubr.msk.f32.mxu1 %vm3075_vm1, %v3076_v18 }
 0x3a6   : > { %v1355_v37 = vpop.f32.mrb[0].mxu0  ;;  %v1431_v38 = vpop.f32.mrb[4].mxu1 }
 0x3a7   : > { %v3401_v39 = vsel %vm1588_vm8, -8192.0, %v1355_v37  ;;  %v3403_v40 = vsel %vm1588_vm8, -8192.0, %v1431_v38  ;;  %v2743_v41 = vpop.f32.mrb[1].mxu0  ;;  %v2748_v42 = vpop.f32.mrb[5].mxu1 }
 0x3a8   : > { %v1602_v43 = vsel %vm980_vm6, %v3403_v40, -inf  ;;  %v1599_v44 = vsel %vm980_vm6, %v3401_v39, -inf }
 0x3a9   : > { %1603 = vmax.xlane.f32.xlu1 %v1602_v43  ;;  %1600 = vmax.xlane.f32.xlu0 %v1599_v44 }
 0x3aa   : > { %v1507_v45 = vpop.f32.mrb[2].mxu0  ;;  %v1583_v46 = vpop.f32.mrb[6].mxu1 }
 0x3ab   : > { %v3409_v47 = vsel %vm1588_vm8, -8192.0, %v1507_v45  ;;  %v3411_v48 = vsel %vm1588_vm8, -8192.0, %v1583_v46  ;;  %v2753_v49 = vpop.f32.mrb[3].mxu0  ;;  %v2758_v50 = vpop.f32.mrb[7].mxu1 }
 0x3ac   : > { %v1605_v51 = vsel %vm980_vm6, %v3409_v47, -inf  ;;  %v1608_v52 = vsel %vm980_vm6, %v3411_v48, -inf }
 0x3ad   : > { %1606 = vmax.xlane.f32.xlu0 %v1605_v51 }
 0x3b1   : > { %1609 = vmax.xlane.f32.xlu0 %v1608_v52 }
 0x3ba   : > { %834 = vrot.lane.b32.xlu1 %v3318_v9, %s3083_s20 }
 0x3be   : > { %836 = vrot.lane.b32.xlu1 %v3310_v4, %s3083_s20 }
 0x3c2   : > { %838 = vrot.lane.b32.xlu1 %v3320_v10, %s3083_s20 }
 0x3c7   : > { %832 = vrot.lane.b32.xlu0 %v3302_v54, %s3083_s20  ;;  %s3087_s20 = smov 24  }
 0x436   : > { %v1604_v57 = vpop.xlane.xlu1 %1603  ;;  %v1601_v58 = vpop.xlane.xlu0 %1600 }
 0x437   : > { %v3426_v59 = vmax.f32 %v3421_v55, %v1604_v57  ;;  %v3429_v9 = vmax.f32 %v3423_v56, %v1601_v58 }
 0x439   : > { %v1616_v4 = vsub.f32 %v3421_v55, %v3426_v59  ;;  %2016 = vst.msk [vmem:[#allocation4 + $0x8] sm:$0xff] %vm1261_vm7, %v3426_v59  ;;  %v1615_v54 = vsub.f32 %v3423_v56, %v3429_v9  ;;  %2015 = vst.msk [vmem:[#allocation4] sm:$0xff] %vm1261_vm7, %v3429_v9  ;;  %1634 = vperm.xlu1 %2954, %v3426_v59   ;;  %1629 = vperm.xlu0 %2953, %v3429_v9  }
 0x43a   : > { %v835_v10 = vpop.permute.xlu1 %834  ;;  %v1607_v61 = vpop.xlane.xlu0 %1606 }
 0x43b   : > { %v3444_v62 = vmax.f32 %v3431_v60, %v1607_v61  ;;  %v1621_v9 = vmul.f32 1.442695, %v1616_v4 }
 0x43d   : > { %v1617_v0 = vsub.f32 %v3431_v60, %v3444_v62  ;;  %2017 = vst.msk [vmem:[#allocation4 + $0x10] sm:$0xff] %vm1261_vm7, %v3444_v62  ;;  %1639 = vperm.xlu1 %2954, %v3444_v62  }
 0x43e   : > { %v837_v1 = vpop.permute.xlu1 %836  ;;  %v1610_v2 = vpop.xlane.xlu0 %1609 }
 0x43f   : > { %v3454_v3 = vmax.f32 %v3446_v63, %v1610_v2 }
 0x441   : > { %v1618_v5 = vsub.f32 %v3446_v63, %v3454_v3  ;;  %2018 = vst.msk [vmem:[#allocation4 + $0x18] sm:$0xff] %vm1261_vm7, %v3454_v3  ;;  %1644 = vperm.xlu0 %2953, %v3454_v3   ;;  %v1661_v3 = vld [vmem:[#allocation5 + $0x10] sm:$0xff] }
 0x442   : > { %v839_v7 = vpop.permute.xlu1 %838  ;;  %v833_v8 = vpop.permute.xlu0 %832 }
 0x443   : > { %v860_v11 = vcombine.low %v835_v10, %v839_v7  ;;  %v861_v12 = vcombine.high %v835_v10, %v839_v7  ;;  %v844_v14 = vcombine.low %v833_v8, %v837_v1  ;;  %v845_v16 = vcombine.high %v833_v8, %v837_v1 }
 0x444   : > { %v1625_v56 = vmul.f32 1.442695, %v1618_v5 }
 0x445   : > { %v868_v17 = vrot.slane %v860_v11, %v3312_v6  ;;  %v875_v19 = vrot.slane %v861_v12, %v3312_v6  ;;  %v852_v20 = vrot.slane %v844_v14, %v3312_v6  ;;  %v859_v21 = vrot.slane %v845_v16, %v3312_v6 }
 0x447   : > { %v876_v22 = vcombine.low %v852_v20, %v868_v17  ;;  %v877_v23 = vcombine.high %v852_v20, %v868_v17  ;;  %v892_v24 = vcombine.low %v859_v21, %v875_v19  ;;  %v893_v25 = vcombine.high %v859_v21, %v875_v19 }
 0x449   : > { %v884_v26 = vrot.slane %v876_v22, %v3326_v13  ;;  %v891_v27 = vrot.slane %v877_v23, %v3326_v13  ;;  %v900_v28 = vrot.slane %v892_v24, %v3326_v13  ;;  %v907_v29 = vrot.slane %v893_v25, %v3326_v13 }
 0x44a   : > { %v1619_v24 = vmul.f32 1.442695, %v1615_v54 }
 0x44b   : > { %v912_v30 = vcombine.low %v884_v26, %v891_v27  ;;  %v2631_v31 = vcombine.high %v884_v26, %v891_v27  ;;  %v928_v32 = vcombine.low %v900_v28, %v907_v29  ;;  %v2632_v33 = vcombine.high %v900_v28, %v907_v29  ;;  %v1659_v29 = vld [vmem:[#allocation5] sm:$0xff] }
 0x44c   : > { %v1623_v27 = vmul.f32 1.442695, %v1617_v0  ;;  %v1660_v0 = vld [vmem:[#allocation5 + $0x8] sm:$0xff] }
 0x44d   : > { %v919_v34 = vrot.slane %v912_v30, %v3312_v6  ;;  %v927_v35 = vrot.slane %v2631_v31, %v3312_v6  ;;  %v935_v36 = vrot.slane %v928_v32, %v3312_v6  ;;  %v943_v37 = vrot.slane %v2632_v33, %v3312_v6  ;;  %v1662_v33 = vld [vmem:[#allocation5 + $0x18] sm:$0xff] }
 0x44f   : > { %v944_v38 = vcombine.low %v919_v34, %v927_v35  ;;  %v945_v41 = vcombine.high %v919_v34, %v927_v35  ;;  %v960_v42 = vcombine.low %v935_v36, %v943_v37  ;;  %v961_v43 = vcombine.high %v935_v36, %v943_v37 }
 0x451   : > { %v952_v44 = vrot.slane %v944_v38, %v3326_v13  ;;  %v959_v45 = vrot.slane %v945_v41, %v3326_v13  ;;  %v968_v46 = vrot.slane %v960_v42, %v3326_v13  ;;  %v975_v49 = vrot.slane %v961_v43, %v3326_v13 }
 0x453   : > { %v976_v50 = vcombine.low %v952_v44, %v968_v46  ;;  %v977_v51 = vcombine.high %v952_v44, %v968_v46  ;;  %v978_v52 = vcombine.low %v959_v45, %v975_v49  ;;  %v979_v53 = vcombine.high %v959_v45, %v975_v49 }
 0x455   : > { %985 = vst.msk [vmem:[#allocation3] sm:$0xff] %vm980_vm6, %v976_v50  ;;  %986 = vst.msk [vmem:[#allocation3 + $0x8] sm:$0xff] %vm980_vm6, %v977_v51  ;;  %v2208_v50 = vld [vmem:[%s3712_s8] sm:$0xff]  ;;  %v2209_v51 = vld [vmem:[%s3712_s8 + $0x8] sm:$0xff] }
 0x456   : > { %987 = vst.msk [vmem:[#allocation3 + $0x10] sm:$0xff] %vm980_vm6, %v978_v52  ;;  %988 = vst.msk [vmem:[#allocation3 + $0x18] sm:$0xff] %vm980_vm6, %v979_v53  ;;  %v2849_v52 = vpack.c.bf16 %v2209_v51, %v2208_v50 }
 0x45c   : > { %v1279_v57 = vld [vmem:[#allocation3] sm:$0xff]  ;;  %v1280_v58 = vld [vmem:[#allocation3 + $0x8] sm:$0xff] }
 0x45d   : > { %2760 = vmatpush3.msra.mxu0 %v1279_v57  ;;  %2765 = vmatpush3.msra.mxu1 %v1280_v58  ;;  %v1281_v22 = vld [vmem:[#allocation3 + $0x10] sm:$0xff]  ;;  %v1688_v57 = vld [vmem:[#allocation6 + $0x8] sm:$0xff] }
 0x45e   : > { %2769 = vmatprep.subr.mxu0 %v3076_v18  ;;  %2774 = vmatprep.subr.mxu1 %v3076_v18 }
 0x4b8   : > { %v1635_v10 = vpop.permute.xlu1 %1634  ;;  %v1630_v61 = vpop.permute.xlu0 %1629 }
 0x4b9   : > { %v1648_v1 = vsub.f32 %v3403_v40, %v1635_v10  ;;  %v1647_v2 = vsub.f32 %v3401_v39, %v1630_v61  ;;  %v1282_v40 = vld [vmem:[#allocation3 + $0x18] sm:$0xff]  ;;  %v1687_v10 = vld [vmem:[#allocation6] sm:$0xff] }
 0x4bb   : > { %v1653_v7 = vmul.f32 1.442695, %v1648_v1  ;;  %v1651_v8 = vmul.f32 1.442695, %v1647_v2 }
 0x4bc   : > { %v1640_v11 = vpop.permute.xlu1 %1639 }
 0x4bd   : > { %2963 = vpow2.f32 %v1653_v7  ;;  %v1649_v12 = vsub.f32 %v3409_v47, %v1640_v11 }
 0x4be   : > { %2965 = vpow2.f32 %v1651_v8  ;;  %v1689_v8 = vld [vmem:[#allocation6 + $0x10] sm:$0xff] }
 0x4bf   : > { %v1655_v14 = vmul.f32 1.442695, %v1649_v12 }
 0x4c0   : > { %v1645_v16 = vpop.permute.xlu0 %1644 }
 0x4c1   : > { %2967 = vpow2.f32 %v1655_v14  ;;  %v1650_v17 = vsub.f32 %v3411_v48, %v1645_v16 }
 0x4c3   : > { %v1657_v19 = vmul.f32 1.442695, %v1650_v17 }
 0x4c5   : > { %2969 = vpow2.f32 %v1657_v19 }
 0x4c6   : > { %2971 = vpow2.f32 %v1619_v24 }
 0x4c7   : > { %v2964_v20 = vpop.eup %2963  ;;  %2973 = vpow2.f32 %v1623_v27 }
 0x4c8   : > { %v2966_v21 = vpop.eup %2965  ;;  %2767 = vmatmul.mubr.msk.f32.vlgmr.msra.gmra.mrb[8].mxu1 %vm980_vm6, %v2964_v20  ;;  %v1670_v39 = vsel %vm980_vm6, %v2964_v20, 0.0  ;;  %2975 = vpow2.f32 %v1625_v56  ;;  %v1690_v20 = vld [vmem:[#allocation6 + $0x18] sm:$0xff] }
 0x4c9   : > { %2762 = vmatmul.mubr.msk.f32.vlgmr.msra.gmra.mrb[4].mxu0 %vm980_vm6, %v2966_v21  ;;  %2775 = vmatpush3.msra.mxu1 %v1282_v40  ;;  %v1667_v47 = vsel %vm980_vm6, %v2966_v21, 0.0  ;;  %2977 = vpow2.f32 %v1621_v9 }
 0x4ca   : > { %2770 = vmatpush3.msra.mxu0 %v1281_v22  ;;  %1671 = vadd.xlane.f32.xlu0 %v1670_v39 }
 0x4cb   : > { %v2968_v23 = vpop.eup %2967  ;;  %1668 = vadd.xlane.f32.xlu1 %v1667_v47  ;;  %2771 = vmatprep.mubr.msk.f32.mxu0 %vm3075_vm1, %v3076_v18 }
 0x4cc   : > { %v1673_v48 = vsel %vm980_vm6, %v2968_v23, 0.0  ;;  %2776 = vmatprep.mubr.msk.f32.mxu1 %vm3075_vm1, %v3076_v18  ;;  %2848 = vmatprep.subr.bf16.mxu1 %v3074_v15 }
 0x4cd   : > { %2772 = vmatmul.mubr.msk.f32.vlgmr.msra.gmra.mrb[6].mxu0 %vm980_vm6, %v2968_v23  ;;  %2860 = vmatprep.subr.bf16.mxu0 %v3074_v15 }
 0x4ce   : > { %1674 = vadd.xlane.f32.xlu0 %v1673_v48  ;;  %2833 = vmatprep.mubr.msk.f32.mxu0 %vm3075_vm1, %v3076_v18 }
 0x4cf   : > { %v2970_v25 = vpop.eup %2969 }
 0x4d0   : > { %2777 = vmatmul.mubr.msk.f32.vlgmr.msra.gmra.mrb[10].mxu1 %vm980_vm6, %v2970_v25  ;;  %v1676_v26 = vsel %vm980_vm6, %v2970_v25, 0.0  ;;  %v2972_v54 = vpop.eup %2971 }
 0x4d1   : > { %2787 = vmatprep.mubr.msk.f32.mxu1 %vm3075_vm1, %v3076_v18  ;;  %v2974_v28 = vpop.eup %2973  ;;  %v1663_v31 = vmul.f32 %v2972_v54, %v1659_v29  ;;  %2850 = vmatpush3.bf16.msra.mxu1 %v2849_v52 }
 0x4d2   : > { %1677 = vadd.xlane.f32.xlu0 %v1676_v26  ;;  %v2976_v60 = vpop.eup %2975  ;;  %v1665_v59 = vmul.f32 %v2974_v28, %v1661_v3  ;;  %2851 = vmatprep.subr.bf16.mxu1 %v3074_v15 }
 0x4d3   : > { %v2978_v62 = vpop.eup %2977  ;;  %v1666_v35 = vmul.f32 %v2976_v60, %v1662_v33 }
 0x4d4   : > { %v1664_v30 = vmul.f32 %v2978_v62, %v1660_v0 }
 0x4dc   : > { %1693 = vperm.xlu1 %2954, %v2972_v54  }
 0x4e0   : > { %1703 = vperm.xlu1 %2954, %v2974_v28  }
 0x4e4   : > { %1708 = vperm.xlu1 %2954, %v2976_v60  }
 0x4e8   : > { %1698 = vperm.xlu0 %2953, %v2978_v62  }
 0x557   : > { %v1672_v63 = vpop.xlane.xlu0 %1671 }
 0x558   : > { %v1669_v5 = vpop.xlane.xlu1 %1668  ;;  %v1680_v32 = vadd.f32 %v1672_v63, %v1664_v30 }
 0x559   : > { %v1679_v55 = vadd.f32 %v1669_v5, %v1663_v31 }
 0x55a   : > { %1684 = vst.msk [vmem:[#allocation5 + $0x8] sm:$0xff] %vm1261_vm7, %v1680_v32 }
 0x55b   : > { %1683 = vst.msk [vmem:[#allocation5] sm:$0xff] %vm1261_vm7, %v1679_v55  ;;  %v1675_v4 = vpop.xlane.xlu0 %1674 }
 0x55c   : > { %v1681_v34 = vadd.f32 %v1675_v4, %v1665_v59  ;;  %v1694_v53 = vpop.permute.xlu1 %1693 }
 0x55d   : > { %v1711_v2 = vmul.f32 %v1694_v53, %v1687_v10 }
 0x55e   : > { %1685 = vst.msk [vmem:[#allocation5 + $0x10] sm:$0xff] %vm1261_vm7, %v1681_v34 }
 0x55f   : > { %v1678_v36 = vpop.xlane.xlu0 %1677 }
 0x560   : > { %v1682_v37 = vadd.f32 %v1678_v36, %v1666_v35  ;;  %v1704_v61 = vpop.permute.xlu1 %1703 }
 0x561   : > { %v2020_v38 = vld [vmem:[#allocation5 + $0x8] sm:$0xff]  ;;  %v1713_v19 = vmul.f32 %v1704_v61, %v1689_v8 }
 0x562   : > { %1686 = vst.msk [vmem:[#allocation5 + $0x18] sm:$0xff] %vm1261_vm7, %v1682_v37  ;;  %v2019_v41 = vld [vmem:[#allocation5] sm:$0xff]  ;;  %2979 = vrcp.f32 %v2020_v38  ;;  %v2210_v37 = vld [vmem:[%s3712_s8 + $0x10] sm:$0xff]  ;;  %v2211_v38 = vld [vmem:[%s3712_s8 + $0x18] sm:$0xff] }
 0x563   : > { %2981 = vrcp.f32 %v2019_v41 }
 0x564   : > { %v1709_v21 = vpop.permute.xlu1 %1708 }
 0x565   : > { %v2021_v42 = vld [vmem:[#allocation5 + $0x10] sm:$0xff]  ;;  %v1714_v47 = vmul.f32 %v1709_v21, %v1690_v20 }
 0x566   : > { %2983 = vrcp.f32 %v2021_v42 }
 0x567   : > { %v1699_v58 = vpop.permute.xlu0 %1698 }
 0x568   : > { %v1712_v1 = vmul.f32 %v1699_v58, %v1688_v57 }
 0x569   : > { %v2022_v43 = vld [vmem:[#allocation5 + $0x18] sm:$0xff] }
 0x56a   : > { %2985 = vrcp.f32 %v2022_v43 }
 0x56c   : > { %v2980_v44 = vpop.eup %2979 }
 0x56d   : > { %v2982_v45 = vpop.eup %2981  ;;  %2038 = vperm.xlu0 %2953, %v2980_v44  }
 0x56e   : > { %2033 = vperm.xlu1 %2954, %v2982_v45   ;;  %v2852_v45 = vpack.c.bf16 %v2211_v38, %v2210_v37 }
 0x570   : > { %v2984_v46 = vpop.eup %2983  ;;  %2853 = vmatpush3.bf16.msra.mxu1 %v2852_v45  ;;  %v2425_v45 = vld [vmem:[%s3718_s14 + $0x18] sm:$0xff] }
 0x571   : > { %2854 = vmatprep.subr.bf16.mxu1 %v3074_v15 }
 0x572   : > { %2043 = vperm.xlu1 %2954, %v2984_v46  }
 0x574   : > { %v2986_v49 = vpop.eup %2985 }
 0x575   : > { %2048 = vperm.xlu0 %2953, %v2986_v49  }
 0x59b   : > { %v1857_v7 = vpop.f32.mrb[8].mxu1 }
 0x59c   : > { %v1784_v11 = vpop.f32.mrb[4].mxu0  ;;  %v2008_v12 = vadd.f32 %v1857_v7, %v1712_v1  ;;  %v2768_v14 = vpop.f32.mrb[9].mxu1 }
 0x59d   : > { %v2007_v16 = vadd.f32 %v1784_v11, %v1711_v2  ;;  %v2763_v17 = vpop.f32.mrb[5].mxu0 }
 0x59e   : > { %2012 = vst.msk [vmem:[#allocation6 + $0x8] sm:$0xff] %vm980_vm6, %v2008_v12 }
 0x59f   : > { %2011 = vst.msk [vmem:[#allocation6] sm:$0xff] %vm980_vm6, %v2007_v16 }
 0x5a0   : > { %v1930_v40 = vpop.f32.mrb[6].mxu0 }
 0x5a1   : > { %v2009_v39 = vadd.f32 %v1930_v40, %v1713_v19  ;;  %v2773_v22 = vpop.f32.mrb[7].mxu0 }
 0x5a2   : > { %v2653_v22 = vld [vmem:[%s3713_s9] ss:$0 sm:$0xff] }
 0x5a3   : > { %2013 = vst.msk [vmem:[#allocation6 + $0x10] sm:$0xff] %vm980_vm6, %v2009_v39  ;;  %v2003_v23 = vpop.f32.mrb[10].mxu1 }
 0x5a4   : > { %v2010_v48 = vadd.f32 %v2003_v23, %v1714_v47  ;;  %v2778_v24 = vpop.f32.mrb[11].mxu1 }
 0x5a5   : > { %v2028_v60 = vld [vmem:[#allocation6 + $0x8] sm:$0xff]  ;;  %v2993_v24 = vld [vmem:[%s3239_s25] sm:$0xff]  ;;  %s547_s25 = scalar_lea.vmem [#allocation7], %s2622_s19 }
 0x5a6   : > { %2014 = vst.msk [vmem:[#allocation6 + $0x18] sm:$0xff] %vm980_vm6, %v2010_v48  ;;  %v2027_v9 = vld [vmem:[#allocation6] sm:$0xff]  ;;  %s2532_s28 = sshll.u32 %s547_s25, 4  ;;  %s3658_s28 = int_to_ptr.vmem [resolvable:$true] %s2532_s28 }
 0x5a7   : > { %s2994_s24 = scalar_lea.vmem %s3658_s28, 128 }
 0x5a8   : > { %p2995_p12 = scmp.ne.s32.totalorder %s3658_s28, %s2994_s24 }
 0x5aa   : > { %v2029_v56 = vld [vmem:[#allocation6 + $0x10] sm:$0xff]  ;;  %p2996_p13 = pnand %p2995_p12, %p3214_p4 }
 0x5ac   : > { %p2997_p0 = pneg %p2996_p13 }
 0x5ad   : > { %v2030_v62 = vld [vmem:[#allocation6 + $0x18] sm:$0xff] }
 0x5ec   : > { %v2039_v26 = vpop.permute.xlu0 %2038 }
 0x5ed   : > { %v2034_v25 = vpop.permute.xlu1 %2033  ;;  %v2052_v29 = vmul.f32 %v2039_v26, %v2028_v60  ;;  %v2330_v60 = vld [vmem:[%s3716_s12 + $0x8] sm:$0xff] }
 0x5ee   : > { %v2051_v28 = vmul.f32 %v2034_v25, %v2027_v9 }
 0x5f1   : > { %v2044_v27 = vpop.permute.xlu1 %2043 }
 0x5f2   : > { %v2053_v54 = vmul.f32 %v2044_v27, %v2029_v56 }
 0x5f4   : > { %v2049_v0 = vpop.permute.xlu0 %2048  ;;  %v2055_v30 = vcombine.low %v2051_v28, %v2053_v54  ;;  %v2056_v31 = vcombine.high %v2051_v28, %v2053_v54  ;;  %v2329_v28 = vld [vmem:[%s3716_s12] sm:$0xff] }
 0x5f5   : > { %v2054_v63 = vmul.f32 %v2049_v0, %v2030_v62  ;;  %v2331_v62 = vld [vmem:[%s3716_s12 + $0x10] sm:$0xff]  ;;  %v2855_v0 = vpack.c.bf16 %v2330_v60, %v2329_v28 }
 0x5f6   : > { %v2063_v32 = vrot.slane %v2055_v30, %v3312_v6  ;;  %v2070_v55 = vrot.slane %v2056_v31, %v3312_v6  ;;  %v2422_v31 = vld [vmem:[%s3718_s14] sm:$0xff] }
 0x5f7   : > { %v2071_v3 = vcombine.low %v2052_v29, %v2054_v63  ;;  %v2072_v5 = vcombine.high %v2052_v29, %v2054_v63  ;;  %v2332_v29 = vld [vmem:[%s3716_s12 + $0x18] sm:$0xff]  ;;  %v2423_v63 = vld [vmem:[%s3718_s14 + $0x8] sm:$0xff] }
 0x5f8   : > { %v2858_v30 = vpack.c.bf16 %v2332_v29, %v2331_v62 }
 0x5f9   : > { %v2079_v59 = vrot.slane %v2071_v3, %v3312_v6  ;;  %v2086_v4 = vrot.slane %v2072_v5, %v3312_v6  ;;  %v2861_v3 = vpack.c.bf16 %v2423_v63, %v2422_v31 }
 0x5fb   : > { %v2087_v33 = vcombine.low %v2063_v32, %v2079_v59  ;;  %v2088_v34 = vcombine.high %v2063_v32, %v2079_v59  ;;  %v2103_v35 = vcombine.low %v2070_v55, %v2086_v4  ;;  %v2104_v36 = vcombine.high %v2070_v55, %v2086_v4  ;;  %2862 = vmatpush3.bf16.msra.mxu0 %v2861_v3 }
 0x5fc   : > { %2863 = vmatprep.subr.bf16.mxu0 %v3074_v15 }
 0x5fd   : > { %v2095_v41 = vrot.slane %v2087_v33, %v3326_v13  ;;  %v2102_v42 = vrot.slane %v2088_v34, %v3326_v13  ;;  %v2111_v43 = vrot.slane %v2103_v35, %v3326_v13  ;;  %v2118_v44 = vrot.slane %v2104_v36, %v3326_v13  ;;  %v2655_v36 = vld [vmem:[%s3714_s10] ss:$0 sm:$0xff] }
 0x5ff   : > { %v2123_v46 = vcombine.low %v2095_v41, %v2102_v42  ;;  %v2651_v49 = vcombine.high %v2095_v41, %v2102_v42  ;;  %v2139_v50 = vcombine.low %v2111_v43, %v2118_v44  ;;  %v2652_v51 = vcombine.high %v2111_v43, %v2118_v44  ;;  %v2656_v41 = vld [vmem:[%s3715_s11] ss:$0 sm:$0xff]  ;;  %v2424_v44 = vld [vmem:[%s3718_s14 + $0x10] sm:$0xff] }
 0x601   : > { %v2130_v52 = vrot.slane %v2123_v46, %v3312_v6  ;;  %v2138_v53 = vrot.slane %v2651_v49, %v3312_v6  ;;  %v2146_v57 = vrot.slane %v2139_v50, %v3312_v6  ;;  %v2154_v58 = vrot.slane %v2652_v51, %v3312_v6  ;;  %v2426_v49 = vld [vmem:[%s3718_s14 + $0x20] sm:$0xff]  ;;  %v2427_v50 = vld [vmem:[%s3718_s14 + $0x28] sm:$0xff] }
 0x602   : > { %v2864_v46 = vpack.c.bf16 %v2425_v45, %v2424_v44  ;;  %v2867_v51 = vpack.c.bf16 %v2427_v50, %v2426_v49 }
 0x603   : > { %v2156_v10 = vcombine.high %v2130_v52, %v2138_v53  ;;  %v2172_v61 = vcombine.high %v2146_v57, %v2154_v58  ;;  %v2155_v1 = vcombine.low %v2130_v52, %v2138_v53  ;;  %v2171_v2 = vcombine.low %v2146_v57, %v2154_v58  ;;  %v2428_v52 = vld [vmem:[%s3718_s14 + $0x30] sm:$0xff]  ;;  %v2429_v53 = vld [vmem:[%s3718_s14 + $0x38] sm:$0xff]  ;;  %v2430_v58 = vld [vmem:[%s3718_s14 + $0x40] sm:$0xff] }
 0x604   : > { %2865 = vmatpush3.bf16.msra.mxu0 %v2864_v46  ;;  %v2870_v57 = vpack.c.bf16 %v2429_v53, %v2428_v52 }
 0x605   : > { %v2170_v7 = vrot.slane %v2156_v10, %v3326_v13  ;;  %v2186_v8 = vrot.slane %v2172_v61, %v3326_v13  ;;  %v2163_v11 = vrot.slane %v2155_v1, %v3326_v13  ;;  %v2179_v12 = vrot.slane %v2171_v2, %v3326_v13  ;;  %2866 = vmatprep.subr.bf16.mxu0 %v3074_v15  ;;  %v2431_v10 = vld [vmem:[%s3718_s14 + $0x48] sm:$0xff]  ;;  %v2432_v1 = vld [vmem:[%s3718_s14 + $0x50] sm:$0xff]  ;;  %v2433_v2 = vld [vmem:[%s3718_s14 + $0x58] sm:$0xff] }
 0x606   : > { %v2873_v61 = vpack.c.bf16 %v2431_v10, %v2430_v58 }
 0x607   : > { %v2189_v14 = vcombine.low %v2170_v7, %v2186_v8  ;;  %v2188_v16 = vcombine.high %v2163_v11, %v2179_v12  ;;  %v2187_v17 = vcombine.low %v2163_v11, %v2179_v12  ;;  %v2190_v6 = vcombine.high %v2170_v7, %v2186_v8  ;;  %v2434_v8 = vld [vmem:[%s3718_s14 + $0x60] sm:$0xff]  ;;  %v2435_v11 = vld [vmem:[%s3718_s14 + $0x68] sm:$0xff] }
 0x608   : > { %2868 = vmatpush3.bf16.msra.mxu0 %v2867_v51  ;;  %v2876_v7 = vpack.c.bf16 %v2433_v2, %v2432_v1  ;;  %v2879_v12 = vpack.c.bf16 %v2435_v11, %v2434_v8 }
 0x609   : > { %2196 = vrot.lane.b32.xlu0 %v2189_v14, %s3085_s18  ;;  %2192 = vrot.lane.b32.xlu1 %v2188_v16, %s3086_s2  ;;  %v2436_v14 = vld [vmem:[%s3718_s14 + $0x70] sm:$0xff]  ;;  %v2437_v16 = vld [vmem:[%s3718_s14 + $0x78] sm:$0xff]  ;;  %s3656_s18 = scalar_lea.hbm %s3720_s16, %s2661_s30  ;;  %s2518_s2 = scalar_lea.sflag [#allocation8], %s545_s6 }
 0x60a   : > { %2869 = vmatprep.subr.bf16.mxu0 %v3074_v15 }
 0x60c   : > { %2871 = vmatpush3.bf16.msra.mxu0 %v2870_v57 }
 0x60d   : > { %2200 = vrot.lane.b32.xlu1 %v2190_v6, %s3087_s20  ;;  %2872 = vmatprep.subr.bf16.mxu0 %v3074_v15  ;;  %v2657_v6 = vld [vmem:[%s3717_s13] ss:$0 sm:$0xff]  ;;  %s3088_s20 = smov [#allocation7]  }
 0x60e   : > { %s2998_s19 = sshll.u32 %s3088_s20, 4  ;;  %s2999_s19 = int_to_ptr.vmem [resolvable:$false] %s2998_s19 }
 0x60f   : > { %s3000_s27 = scalar_lea.vmem %s2999_s19, 256  ;;  %p3001_p1 = scmp.lt.s32.totalorder %s3658_s28, %s2999_s19 }
 0x610   : > { %2874 = vmatpush3.bf16.msra.mxu0 %v2873_v61  ;;  %p3002_p2 = scmp.lt.s32.totalorder %s3000_s27, %s2994_s24 }
 0x611   : > { %2875 = vmatprep.subr.bf16.mxu0 %v3074_v15 }
 0x612   : > { %p3003_p3 = por %p3002_p2, %p3001_p1 }
 0x614   : > { %2877 = vmatpush3.bf16.msra.mxu0 %v2876_v7  ;;  %p3004_p5 = pnand %p3003_p3, %p2997_p0 }
 0x615   : > { %2878 = vmatprep.subr.bf16.mxu0 %v3074_v15 }
 0x618   : > { %2880 = vmatpush3.bf16.msra.mxu0 %v2879_v12 }
 0x619   : > { %2881 = vmatprep.subr.bf16.mxu0 %v3074_v15 }
 0x67b   : > { %v2193_v19 = vpop.permute.xlu1 %2192  ;;  %v2197_v20 = vpop.permute.xlu0 %2196 }
 0x67c   : > { %v2203_v21 = vsel %vm980_vm6, %v2187_v17, %v2193_v19  ;;  %v2882_v17 = vpack.c.bf16 %v2437_v16, %v2436_v14 }
 0x67d   : > { %v2205_v39 = vsel %vm2204_vm9, %v2203_v21, %v2197_v20 }
 0x67e   : > { %2883 = vmatpush3.bf16.msra.mxu0 %v2882_v17 }
 0x67f   : > { %v2201_v40 = vpop.permute.xlu1 %2200 }
 0x680   : > { %v2207_v13 = vsel %vm2206_vm10, %v2205_v39, %v2201_v40 }
 0x681   : > { %2788 = vmatmul.mubr.msk.f32.vlgmr.msra.gmra.mrb[12].mxu1 %vm566_vm0, %v2207_v13 }
 0x682   : > { %2798 = vmatprep.mubr.msk.f32.mxu1 %vm3075_vm1, %v3076_v18  ;;  %2856 = vmatpush3.bf16.msra.mxu1 %v2855_v0 }
 0x683   : > { %2857 = vmatprep.subr.bf16.mxu1 %v3074_v15 }
 0x686   : > { %2859 = vmatpush3.bf16.msra.mxu1 %v2858_v30 }
 0x754   : > { %v2288_v47 = vpop.f32.mrb[12].mxu1 }
 0x755   : > { %v2289_v23 = vadd.f32 %v2653_v22, %v2288_v47  ;;  %v2789_v48 = vpop.f32.mrb[13].mxu1 }
 0x757   : > { %v3563_v25 = vadd.f32 %v2993_v24, %v2289_v23 }
 0x759   : > { %v2295_v26 = vsel %vm566_vm0, %v3563_v25, 0.0 }
 0x75a   : > { %2296 = vadd.xlane.f32.xlu0 %v2295_v26  ;;  %v2659_v26 = vld [vmem:[%s3719_s15] ss:$0 sm:$0xff] }
 0x7e7   : > { %v2297_v27 = vpop.xlane.xlu0 %2296 }
 0x7e8   : > { %v2298_v56 = vmul.f32 0.03125, %v2297_v27 }
 0x7ea   : > { %v2299_v9 = vsub.f32 %v3563_v25, %v2298_v56 }
 0x7ec   : > { %v2300_v54 = vmul.f32 %v2299_v9, %v2299_v9  ;;  %v2320_v37 = vmul.f32 %v2655_v36, %v2299_v9 }
 0x7ee   : > { %v2301_v18 = vsel %vm566_vm0, %v2300_v54, 0.0 }
 0x7ef   : > { %2302 = vadd.xlane.f32.xlu1 %v2301_v18 }
 0x87c   : > { %v2303_v5 = vpop.xlane.xlu1 %2302 }
 0x87d   : > { %v2304_v32 = vmul.f32 0.032258064, %v2303_v5 }
 0x87f   : > { %2987 = vrsqrt.f32 %v2304_v32  ;;  %vm2307_vm11 = vcmp.eq.f32.partialorder %v2304_v32, inf  ;;  %v2310_v4 = vand.u32 2147483648, %v2304_v32  ;;  %vm2309_vm12 = vcmp.eq.f32.partialorder %v2304_v32, 0.0 }
 0x889   : > { %v2988_v55 = vpop.eup %2987 }
 0x88a   : > { %v2306_v59 = vmul.f32 %v2988_v55, %v2304_v32 }
 0x88c   : > { %v2308_v33 = vsel %vm2307_vm11, %v2304_v32, %v2306_v59 }
 0x88d   : > { %v2311_v34 = vsel %vm2309_vm12, %v2310_v4, %v2308_v33 }
 0x88e   : > { %v2312_v35 = vadd.f32 1e-06, %v2311_v34 }
 0x890   : > { %2989 = vrcp.f32 %v2312_v35 }
 0x89a   : > { %v2990_v38 = vpop.eup %2989 }
 0x89b   : > { %v2321_v42 = vmul.f32 %v2990_v38, %v2320_v37 }
 0x89d   : > { %v2328_v43 = vadd.f32 %v2656_v41, %v2321_v42 }
 0x89f   : > { %2799 = vmatmul.mubr.msk.f32.vlgmr.msra.gmra.mrb[14].mxu1 %vm566_vm0, %v2328_v43 }
 0x972   : > { %v2409_v19 = vpop.f32.mrb[14].mxu1 }
 0x973   : > { %v2410_v20 = vadd.f32 %v2657_v6, %v2409_v19  ;;  %v2800_v21 = vpop.f32.mrb[15].mxu1 }
 0x975   : > { %v2414_v40 = vmul.f32 0.044715, %v2410_v20  ;;  %v2413_v48 = vmul.f32 0.5, %v2410_v20 }
 0x977   : > { %v2415_v39 = vmul.f32 %v2414_v40, %v2410_v20 }
 0x979   : > { %v2416_v13 = vmul.f32 %v2415_v39, %v2410_v20 }
 0x97b   : > { %v2417_v22 = vadd.f32 %v2416_v13, %v2410_v20 }
 0x97d   : > { %v2418_v47 = vmul.f32 0.7978846, %v2417_v22 }
 0x97f   : > { %2991 = vtanh.f32 %v2418_v47 }
 0x989   : > { %v2992_v23 = vpop.eup %2991 }
 0x98a   : > { %v2420_v24 = vadd.f32 1.0, %v2992_v23 }
 0x98c   : > { %v2421_v15 = vmul.f32 %v2420_v24, %v2413_v48 }
 0x98e   : > { %2834 = vmatmul.mubr.f32.vlgmr.msra.gmra.mrb[8].mxu0 %v2421_v15 }
 0xa61   : > { %v2511_v27 = vpop.f32.mrb[8].mxu0 }
 0xa62   : > { %v2512_v56 = vadd.f32 %v2659_v26, %v2511_v27  ;;  %v2835_v9 = vpop.f32.mrb[9].mxu0 }
 0xa64   : > { %v2515_v54 = vadd.f32 %v2512_v56, %v3563_v25 }
 0xa66   : > { %2516 = vst.msk [vmem:[%s547_s25] sm:$0xff] %vm566_vm0, %v2515_v54 }
 0xa67   : > { %3007 = shalt.err (!%p3004_p5)
}
 0xa68   : > { %s3008_s6 = scalar_lea.hbm %s3656_s18, 128  ;;  %s3012_s25 = scalar_lea.hbm %s3720_s16, 256 }
 0xa69   : > { %p3009_p6 = scmp.ne.s32.totalorder %s3656_s18, %s3008_s6  ;;  %p3013_p10 = scmp.lt.u32.totalorder %s3656_s18, %s3720_s16 }
 0xa6a   : > { %p3014_p11 = scmp.lt.u32.totalorder %s3012_s25, %s3008_s6  ;;  %p3016_p13 = scmp.lt.u32.totalorder %s3008_s6, %s3656_s18 }
 0xa6b   : > { %p3010_p7 = pnand %p3009_p6, %p3214_p4 }
 0xa6c   : > { %p3015_p12 = por %p3014_p11, %p3013_p10 }
 0xa6d   : > { %p3011_p9 = pneg %p3010_p7 }
 0xa6e   : > { %p3017_p0 = por %p3016_p13, %p3015_p12 }
 0xa70   : > { %p3018_p1 = pnand %p3017_p0, %p3011_p9 }
 0xa72   : > { %3021 = shalt.err (!%p3018_p1)
}
 0xa73   : > { %2884 = dma.vmem_to_hbm [thread:$0]  (%p3214_p4), %s3658_s28, 128, %s3656_s18, %s2518_s2  }
 0xa74 PF: > { %p2890_p2 = scmp.ge.s32.totalorder %s3072_s26, 2  ;;  %s2544_s20 = sand.u32 1, %s3052_s21  }
 0xa75   : > { %s2545_s19 = scalar_lea.sflag [#allocation8], %s2544_s20 }
 0xa76   : > { %p2887_p3 = pnand %p2890_p2, %p3221_p8 }
 0xa78   : > { %3047 = dma.done.wait (!%p2887_p3), %s2545_s19, 128  }
 0xa79   : > { %3049 = vsyncadd (!%p2887_p3), %s2545_s19, 4294967168  ;;  %s29_s26 = sadd.s32 1, %s3072_s26   ;;  %s3741_s27 = sld [smem:[#allocation10_spill]] }
 0xa7a   : > { %p26_p5 = scmp.ge.s32.totalorder %s29_s26, 4   ;;  %s3742_s23 = sld [smem:[#allocation14_spill]] }
 0xa7b   : > { %s3743_s24 = sld [smem:[#allocation11_spill]]  ;;  %s3744_s25 = sld [smem:[#allocation12_spill]] }
 0xa7c   : > { %s3745_s21 = smov %s3056_s22  ;;  %28 = sbr.rel (!%p26_p5) target bundleno = 8 (0x8), region = 127 }
 0xa7f   : > { %s3746_s22 = smov %s3741_s27 }
 0xa83   :  { %2550 = vsyncpa [#allocation8], 1 }
 0xa84   :  { %2552 = vsyncpa [#allocation8 + $0x1], 1 }

// kernel: tpu_custom_call.1
= control target key start
LH: loop header
LB: loop body
LE: loop exit
PB: predicated region body
PF: predicated region fallthrough
CT: control target
= control target key end

     0   :  { %s3704_s0 = inlined_call_operand.vmem [shape: f32[2,8,32], index: 0, kind: input, shape index: {}]   ;;  %s3705_s1 = inlined_call_operand.vmem [shape: f32[2,1,8,8], index: 1, kind: input, shape index: {}]   ;;  %s3706_s2 = inlined_call_operand.vmem [shape: f32[1,32], index: 2, kind: input, shape index: {}]   ;;  %s3707_s3 = inlined_call_operand.vmem [shape: f32[1,32], index: 3, kind: input, shape index: {}]   ;;  %s3708_s4 = inlined_call_operand.vmem [shape: f32[32,32], index: 4, kind: input, shape index: {}]   ;;  %s3709_s5 = inlined_call_operand.vmem [shape: f32[1,32], index: 5, kind: input, shape index: {}]   ;;  %s3710_s6 = inlined_call_operand.vmem [shape: f32[32,64], index: 6, kind: input, shape index: {}]   ;;  %s3711_s7 = inlined_call_operand.vmem [shape: f32[1,64], index: 7, kind: input, shape index: {}]   ;;  %s3712_s8 = inlined_call_operand.vmem [shape: f32[32,32], index: 8, kind: input, shape index: {}]   ;;  %s3713_s9 = inlined_call_operand.vmem [shape: f32[1,32], index: 9, kind: input, shape index: {}]   ;;  %s3714_s10 = inlined_call_operand.vmem [shape: f32[1,32], index: 10, kind: input, shape index: {}]   ;;  %s3715_s11 = inlined_call_operand.vmem [shape: f32[1,32], index: 11, kind: input, shape index: {}]   ;;  %s3716_s12 = inlined_call_operand.vmem [shape: f32[32,128], index: 12, kind: input, shape index: {}]   ;;  %s3717_s13 = inlined_call_operand.vmem [shape: f32[1,128], index: 13, kind: input, shape index: {}]   ;;  %s3718_s14 = inlined_call_operand.vmem [shape: f32[128,32], index: 14, kind: input, shape index: {}]   ;;  %s3719_s15 = inlined_call_operand.vmem [shape: f32[1,32], index: 15, kind: input, shape index: {}]   ;;  %s3720_s16 = inlined_call_operand.hbm [shape: f32[2,8,32], index: 16, kind: output, shape index: {}]  }
   0x1   :  { %3726 = sst [smem:[#allocation15_spill]] %s3704_s0 }
   0x2   :  { %3727 = sst [smem:[#allocation16_spill]] %s3706_s2 }
   0x3   :  { %3728 = sst [smem:[#allocation17_spill]] %s3710_s6 }
   0x4   :  { %21 = vsyncpa [#allocation8], 0 }
   0x5   :  { %23 = vsyncpa [#allocation8 + $0x1], 0  ;;  %s3174_s21 = smov 0   ;;  %s3176_s22 = smov 0  }
   0x6   :  { %s3178_s23 = smov 0   ;;  %s3180_s24 = smov 0  }
   0x7   :  { %s3182_s25 = smov 0   ;;  %s3184_s26 = smov 0  }
   0x8 LB: > { %3729 = sst [smem:[#allocation10_spill]] %s3060_s23  ;;  %s2617_s27 = sadd.s32 4294967295, %s3072_s26   ;;  %s3072_s26 = sphi %s3184_s26, %s29_s26   ;;  %s3068_s25 = sphi %s3182_s25, %s3744_s25   ;;  %s3064_s24 = sphi %s3180_s24, %s3743_s24   ;;  %s3060_s23 = sphi %s3178_s23, %s3742_s23   ;;  %s3056_s22 = sphi %s3176_s22, %s3746_s22   ;;  %s3052_s21 = sphi %s3174_s21, %s3745_s21  }
   0x9   : > { %3730 = sst [smem:[#allocation11_spill]] %s3068_s25  ;;  %s2618_s28 = sadd.s32 4294967294, %s3072_s26  }
   0xa   : > { %s41_s29 = sadd.s32 1, %s3068_s25  ;;  %s398_s30 = sadd.s32 1, %s3060_s23 }
   0xb   : > { %p43_p0 = scmp.ge.s32.totalorder %s41_s29, 2  ;;  %p408_p1 = scmp.ne.s32.totalorder %s3060_s23, %s3056_s22 }
   0xc   : > { %p409_p2 = scmp.eq.s32.totalorder %s2617_s27, 1  ;;  %p414_p3 = scmp.ne.s32.totalorder %s3056_s22, %s3052_s21 }
   0xd   : > { %s3748_s29 = smov (%p43_p0, %s41_s29), 0  ;;  %p415_p5 = scmp.eq.s32.totalorder %s2618_s28, 1 }
   0xe   : > { %3731 = sst [smem:[#allocation12_spill]] %s3748_s29  ;;  %p3214_p4 = por %p409_p2, %p408_p1 }
   0xf   : > { %s393_s17 = ssub.s32 %s3068_s25, %s3748_s29  ;;  %p2621_p6 = scmp.ge.s32.totalorder %s3072_s26, 1 }
  0x10   : > { %p396_p7 = scmp.eq.s32.totalorder %s393_s17, 0  ;;  %p3221_p8 = por %p415_p5, %p414_p3 }
  0x11   : > { %p492_p9 = scmp.lt.s32.totalorder %s3072_s26, 3 }
  0x12   : > { %s3733_s18 = scalar_select %p3221_p8, 1, 0 }
  0x13   : > { %s3227_s19 = scalar_select %p396_p7, %s3060_s23, %s398_s30  }
  0x14   : > { %3734 = sst [smem:[#allocation13_spill]] %s3733_s18  ;;  %p493_p10 = pnand %p2621_p6, %p492_p9 }
  0x15   : > { %3735 = sst [smem:[#allocation14_spill]] %s3227_s19  ;;  %p548_p11 = scmp.lt.s32.totalorder (!%p493_p10), %s3064_s24, 1  ;;  %vm566_vm0 = vcmask (!%p493_p10), 261120   ;;  %v3074_v15 = vmov (!%p493_p10), 0.0|0.0   ;;  %vm3075_vm1 = vmmov (!%p493_p10), 0   ;;  %v3076_v18 = vmov (!%p493_p10), 0.0  }
  0x16   : > { %496 = sbr.rel (%p493_p10) target bundleno = 2676 (0xa74), region = 84  ;;  %s3736_s29 = sld [smem:[#allocation15_spill]] (!%p493_p10)  ;;  %2836 = vmatprep.subr.bf16.mxu1 (!%p493_p10), %v3074_v15  ;;  %2725 = vmatprep.mubr.msk.f32.mxu1 (!%p493_p10), %vm3075_vm1, %v3076_v18  ;;  %v1030_v38 = vld [vmem:[%s3708_s4] sm:$0xff] (!%p493_p10)  ;;  %v1031_v39 = vld [vmem:[%s3708_s4 + $0x8] sm:$0xff] (!%p493_p10)  ;;  %v1032_v45 = vld [vmem:[%s3708_s4 + $0x10] sm:$0xff] (!%p493_p10)  ;;  %vm980_vm6 = vcmask (!%p493_p10), 64512   ;;  %v701_v63 = vlaneseq (!%p493_p10) }
  0x17   : > { %s3737_s6 = sld [smem:[#allocation17_spill]] (!%p493_p10)  ;;  %2739 = vmatprep.subr.mxu0 (!%p493_p10), %v3076_v18  ;;  %2741 = vmatprep.mubr.msk.f32.mxu0 (!%p493_p10), %vm3075_vm1, %v3076_v18  ;;  %s3738_s2 = sld [smem:[#allocation16_spill]] (!%p493_p10)  ;;  %v2626_v41 = vld [vmem:[%s3707_s3] ss:$0 sm:$0xff] (!%p493_p10)  ;;  %v2843_v43 = vpack.c.bf16 (!%p493_p10), %v1031_v39, %v1030_v38  ;;  %v1033_v46 = vld [vmem:[%s3708_s4 + $0x18] sm:$0xff] (!%p493_p10)  ;;  %1271 = vst.msk [vmem:[#allocation6] sm:$0xff] (!%p493_p10), %vm980_vm6, %v3076_v18 }
  0x18   : > { %v2846_v49 = vpack.c.bf16 (!%p493_p10), %v1033_v46, %v1032_v45  ;;  %1272 = vst.msk [vmem:[#allocation6 + $0x8] sm:$0xff] (!%p493_p10), %vm980_vm6, %v3076_v18  ;;  %1273 = vst.msk [vmem:[#allocation6 + $0x10] sm:$0xff] (!%p493_p10), %vm980_vm6, %v3076_v18  ;;  %v2627_v52 = vld [vmem:[%s3711_s7] ss:$0 sm:$0xff] (!%p493_p10)  ;;  %s3077_s19 = smov (!%p493_p10), 120   ;;  %s3079_s28 = smov (!%p493_p10), 104  }
  0x19   : > { %1274 = vst.msk [vmem:[#allocation6 + $0x18] sm:$0xff] (!%p493_p10), %vm980_vm6, %v3076_v18  ;;  %v2635_v56 = vld [vmem:[%s3709_s5] ss:$0 sm:$0xff] (!%p493_p10)  ;;  %v3080_v61 = vmov (!%p493_p10), 1983009808   ;;  %vm1261_vm7 = vcmask (!%p493_p10), 7168  }
  0x1a   : > { %v699_v62 = vunpack.c.l.s4 (!%p493_p10), %v3080_v61  ;;  %1266 = vst.msk [vmem:[#allocation5] sm:$0xff] (!%p493_p10), %vm1261_vm7, %v3076_v18  ;;  %1267 = vst.msk [vmem:[#allocation5 + $0x8] sm:$0xff] (!%p493_p10), %vm1261_vm7, %v3076_v18  ;;  %s3085_s18 = smov (!%p493_p10), 16   ;;  %vm2204_vm9 = vcmask (!%p493_p10), 130048   ;;  %vm2206_vm10 = vcmask (!%p493_p10), 195584   ;;  %s2661_s30 = sshll.u32 (!%p493_p10), %s3064_s24, 7 }
  0x1b   : > { %1268 = vst.msk [vmem:[#allocation5 + $0x10] sm:$0xff] (!%p493_p10), %vm1261_vm7, %v3076_v18  ;;  %1269 = vst.msk [vmem:[#allocation5 + $0x18] sm:$0xff] (!%p493_p10), %vm1261_vm7, %v3076_v18 }
  0x1d   : > { %s3231_s20 = scalar_select %p548_p11, %s3064_s24, 1  ;;  %v602_v12 = vld [vmem:[%s3737_s6] sm:$0xff]  ;;  %v603_v13 = vld [vmem:[%s3737_s6 + $0x8] sm:$0xff]  ;;  %v604_v14 = vld [vmem:[%s3737_s6 + $0x10] sm:$0xff] }
  0x1e   : > { %v2837_v16 = vpack.c.bf16 %v603_v13, %v602_v12  ;;  %v605_v17 = vld [vmem:[%s3737_s6 + $0x18] sm:$0xff]  ;;  %v2625_v36 = vld [vmem:[%s3738_s2] ss:$0 sm:$0xff]  ;;  %s545_s6 = sand.u32 1, %s3056_s22  }
  0x1f   : > { %s3723_s27 = sshll.u32 %s3231_s20, 3  ;;  %v2840_v19 = vpack.c.bf16 %v605_v17, %v604_v14  ;;  %s3739_s17 = sshll.u32 %s3231_s20, 3 }
  0x20   : > { %s3239_s25 = scalar_lea.vmem %s3736_s29, %s3723_s27  ;;  %2838 = vmatpush3.bf16.msra.mxu1 %v2837_v16  ;;  %s3078_s27 = smov 112  }
  0x21   : > { %v563_v0 = vld [vmem:[%s3239_s25] sm:$0xff]  ;;  %2839 = vmatprep.subr.bf16.mxu1 %v3074_v15  ;;  %s558_s2 = scalar_lea.vmem %s3705_s1, %s3739_s17  ;;  %s3083_s20 = smov 96  }
  0x22   : > { %v567_v1 = vsel %vm566_vm0, %v563_v0, 0.0 }
  0x23   : > { %568 = vadd.xlane.f32.xlu0 %v567_v1 }
  0x24   : > { %2841 = vmatpush3.bf16.msra.mxu1 %v2840_v19 }
  0x25   : > { %2842 = vmatprep.subr.bf16.mxu1 %v3074_v15 }
  0x27   : > { %996 = vadd.xlane.f32.xlu0 %v567_v1 }
  0xb0   : > { %v569_v2 = vpop.xlane.xlu0 %568 }
  0xb1   : > { %v571_v3 = vmul.f32 0.03125, %v569_v2  ;;  %v700_v2 = vunpack.c.0.s8 %v699_v62 }
  0xb3   : > { %v572_v4 = vsub.f32 %v563_v0, %v571_v3  ;;  %v702_v3 = vshrl.u32 %v701_v63, 7 }
  0xb4   : > { %v997_v5 = vpop.xlane.xlu0 %996 }
  0xb5   : > { %v999_v6 = vmul.f32 0.03125, %v997_v5  ;;  %v573_v7 = vmul.f32 %v572_v4, %v572_v4  ;;  %v593_v37 = vmul.f32 %v2625_v36, %v572_v4 }
  0xb7   : > { %v1000_v8 = vsub.f32 %v563_v0, %v999_v6  ;;  %v574_v9 = vsel %vm566_vm0, %v573_v7, 0.0  ;;  %v3081_v0 = vmov 1934713408   ;;  %v3312_v6 = vsub.s32 %v700_v2, %v702_v3 }
  0xb8   : > { %575 = vadd.xlane.f32.xlu1 %v574_v9  ;;  %v731_v1 = vunpack.c.l.s4 %v3081_v0 }
  0xb9   : > { %v1001_v10 = vmul.f32 %v1000_v8, %v1000_v8  ;;  %v1021_v48 = vmul.f32 %v2625_v36, %v1000_v8 }
  0xba   : > { %v732_v5 = vunpack.c.0.s8 %v731_v1 }
  0xbb   : > { %v1002_v11 = vsel %vm566_vm0, %v1001_v10, 0.0 }
  0xbc   : > { %1003 = vadd.xlane.f32.xlu1 %v1002_v11  ;;  %v3326_v13 = vsub.s32 %v732_v5, %v702_v3 }
 0x145   : > { %v576_v20 = vpop.xlane.xlu1 %575 }
 0x146   : > { %v577_v21 = vmul.f32 0.032258064, %v576_v20 }
 0x148   : > { %2955 = vrsqrt.f32 %v577_v21  ;;  %vm580_vm2 = vcmp.eq.f32.partialorder %v577_v21, inf  ;;  %v583_v26 = vand.u32 2147483648, %v577_v21  ;;  %vm582_vm3 = vcmp.eq.f32.partialorder %v577_v21, 0.0 }
 0x149   : > { %v1004_v22 = vpop.xlane.xlu1 %1003 }
 0x14a   : > { %v1005_v23 = vmul.f32 0.032258064, %v1004_v22 }
 0x14c   : > { %2957 = vrsqrt.f32 %v1005_v23  ;;  %vm1008_vm4 = vcmp.eq.f32.partialorder %v1005_v23, inf  ;;  %v1011_v32 = vand.u32 2147483648, %v1005_v23  ;;  %vm1010_vm5 = vcmp.eq.f32.partialorder %v1005_v23, 0.0 }
 0x152   : > { %v2956_v24 = vpop.eup %2955 }
 0x153   : > { %v579_v25 = vmul.f32 %v2956_v24, %v577_v21 }
 0x155   : > { %v581_v27 = vsel %vm580_vm2, %v577_v21, %v579_v25 }
 0x156   : > { %v2958_v28 = vpop.eup %2957  ;;  %v584_v29 = vsel %vm582_vm3, %v583_v26, %v581_v27 }
 0x157   : > { %v1007_v30 = vmul.f32 %v2958_v28, %v1005_v23  ;;  %v585_v31 = vadd.f32 1e-06, %v584_v29 }
 0x159   : > { %v1009_v33 = vsel %vm1008_vm4, %v1005_v23, %v1007_v30  ;;  %2959 = vrcp.f32 %v585_v31 }
 0x15a   : > { %v1012_v34 = vsel %vm1010_vm5, %v1011_v32, %v1009_v33 }
 0x15b   : > { %v1013_v35 = vadd.f32 1e-06, %v1012_v34 }
 0x15d   : > { %2961 = vrcp.f32 %v1013_v35 }
 0x163   : > { %v2960_v40 = vpop.eup %2959 }
 0x164   : > { %v594_v42 = vmul.f32 %v2960_v40, %v593_v37 }
 0x166   : > { %v601_v44 = vadd.f32 %v2626_v41, %v594_v42 }
 0x167   : > { %v2962_v47 = vpop.eup %2961 }
 0x168   : > { %2726 = vmatmul.mubr.msk.f32.vlgmr.msra.gmra.mrb[0].mxu1 %vm566_vm0, %v601_v44  ;;  %v1022_v50 = vmul.f32 %v2962_v47, %v1021_v48 }
 0x169   : > { %2844 = vmatpush3.bf16.msra.mxu1 %v2843_v43  ;;  %2736 = vmatprep.mubr.msk.f32.mxu1 %vm3075_vm1, %v3076_v18 }
 0x16a   : > { %2845 = vmatprep.subr.bf16.mxu1 %v3074_v15  ;;  %v1029_v51 = vadd.f32 %v2626_v41, %v1022_v50 }
 0x16d   : > { %2847 = vmatpush3.bf16.msra.mxu1 %v2846_v49 }
 0x16e   : > { %2744 = vmatprep.subr.mxu1 %v3076_v18 }
 0x170   : > { %2737 = vmatmul.mubr.msk.f32.vlgmr.msra.gmra.mrb[2].mxu1 %vm566_vm0, %v1029_v51 }
 0x171   : > { %2746 = vmatprep.mubr.msk.f32.mxu1 %vm3075_vm1, %v3076_v18 }
 0x23b   : > { %v682_v53 = vpop.f32.mrb[0].mxu1 }
 0x23c   : > { %v3302_v54 = vadd.f32 %v2627_v52, %v682_v53  ;;  %v2727_v55 = vpop.f32.mrb[1].mxu1 }
 0x23e   : > { %687 = vrot.lane.b32.xlu0 %v3302_v54, %s3077_s19  ;;  %690 = vrot.lane.b32.xlu1 %v3302_v54, %s3078_s27 }
 0x242   : > { %693 = vrot.lane.b32.xlu1 %v3302_v54, %s3079_s28 }
 0x243   : > { %v1110_v57 = vpop.f32.mrb[2].mxu1 }
 0x244   : > { %v1111_v58 = vadd.f32 %v2635_v56, %v1110_v57  ;;  %v2738_v59 = vpop.f32.mrb[3].mxu1 }
 0x246   : > { %v1114_v60 = vmul.f32 0.35355338, %v1111_v58 }
 0x248   : > { %1119 = vrot.lane.b32.xlu0 %v1114_v60, %s3078_s27  ;;  %1116 = vrot.lane.b32.xlu1 %v1114_v60, %s3077_s19  ;;  %s2622_s19 = sshll.u32 %s545_s6, 3 }
 0x24c   : > { %1122 = vrot.lane.b32.xlu1 %v1114_v60, %s3079_s28 }
 0x2b0   : > { %v3310_v4 = vpop.permute.xlu1 %690  ;;  %v3318_v9 = vpop.permute.xlu0 %687 }
 0x2b1   : > { %v696_v7 = vcombine.low %v3302_v54, %v3310_v4  ;;  %v697_v8 = vcombine.high %v3302_v54, %v3310_v4 }
 0x2b3   : > { %v704_v14 = vrot.slane %v696_v7, %v3312_v6  ;;  %v711_v16 = vrot.slane %v697_v8, %v3312_v6 }
 0x2b4   : > { %v3320_v10 = vpop.permute.xlu1 %693 }
 0x2b5   : > { %v712_v11 = vcombine.low %v3318_v9, %v3320_v10  ;;  %v713_v12 = vcombine.high %v3318_v9, %v3320_v10 }
 0x2b7   : > { %v720_v17 = vrot.slane %v712_v11, %v3312_v6  ;;  %v727_v19 = vrot.slane %v713_v12, %v3312_v6 }
 0x2b9   : > { %v728_v20 = vcombine.low %v704_v14, %v720_v17  ;;  %v729_v21 = vcombine.high %v704_v14, %v720_v17  ;;  %v744_v22 = vcombine.low %v711_v16, %v727_v19  ;;  %v745_v23 = vcombine.high %v711_v16, %v727_v19 }
 0x2ba   : > { %v1117_v24 = vpop.permute.xlu1 %1116  ;;  %v1120_v29 = vpop.permute.xlu0 %1119 }
 0x2bb   : > { %v736_v25 = vrot.slane %v728_v20, %v3326_v13  ;;  %v743_v26 = vrot.slane %v729_v21, %v3326_v13  ;;  %v752_v27 = vrot.slane %v744_v22, %v3326_v13  ;;  %v759_v28 = vrot.slane %v745_v23, %v3326_v13 }
 0x2bc   : > { %v1125_v34 = vcombine.low %v1114_v60, %v1120_v29  ;;  %v1126_v35 = vcombine.high %v1114_v60, %v1120_v29 }
 0x2bd   : > { %v764_v30 = vcombine.low %v736_v25, %v743_v26  ;;  %v2629_v31 = vcombine.high %v736_v25, %v743_v26  ;;  %v780_v32 = vcombine.low %v752_v27, %v759_v28  ;;  %v2630_v33 = vcombine.high %v752_v27, %v759_v28 }
 0x2be   : > { %v1123_v36 = vpop.permute.xlu1 %1122  ;;  %v1133_v47 = vrot.slane %v1125_v34, %v3312_v6  ;;  %v1140_v48 = vrot.slane %v1126_v35, %v3312_v6  ;;  %v3082_v35 = vmov -inf  }
 0x2bf   : > { %v771_v37 = vrot.slane %v764_v30, %v3312_v6  ;;  %v779_v38 = vrot.slane %v2629_v31, %v3312_v6  ;;  %v787_v39 = vrot.slane %v780_v32, %v3312_v6  ;;  %v795_v40 = vrot.slane %v2630_v33, %v3312_v6  ;;  %1263 = vst.msk [vmem:[#allocation4 + $0x8] sm:$0xff] %vm1261_vm7, %v3082_v35 }
 0x2c0   : > { %v1141_v41 = vcombine.low %v1117_v24, %v1123_v36  ;;  %v1142_v42 = vcombine.high %v1117_v24, %v1123_v36  ;;  %1262 = vst.msk [vmem:[#allocation4] sm:$0xff] %vm1261_vm7, %v3082_v35  ;;  %1264 = vst.msk [vmem:[#allocation4 + $0x10] sm:$0xff] %vm1261_vm7, %v3082_v35  ;;  %v1587_v36 = vld [vmem:[%s558_s2] sm:$0xff]  ;;  %s3086_s2 = smov 8  }
 0x2c1   : > { %v796_v43 = vcombine.low %v771_v37, %v779_v38  ;;  %v797_v44 = vcombine.high %v771_v37, %v779_v38  ;;  %v812_v45 = vcombine.low %v787_v39, %v795_v40  ;;  %v813_v46 = vcombine.high %v787_v39, %v795_v40  ;;  %1265 = vst.msk [vmem:[#allocation4 + $0x18] sm:$0xff] %vm1261_vm7, %v3082_v35 }
 0x2c2   : > { %v1149_v49 = vrot.slane %v1141_v41, %v3312_v6  ;;  %v1156_v50 = vrot.slane %v1142_v42, %v3312_v6  ;;  %vm1588_vm8 = vcmp.eq.f32.partialorder %v1587_v36, 0.0 }
 0x2c3   : > { %v804_v51 = vrot.slane %v796_v43, %v3326_v13  ;;  %v811_v52 = vrot.slane %v797_v44, %v3326_v13  ;;  %v820_v53 = vrot.slane %v812_v45, %v3326_v13  ;;  %v827_v55 = vrot.slane %v813_v46, %v3326_v13 }
 0x2c4   : > { %v1157_v56 = vcombine.low %v1133_v47, %v1149_v49  ;;  %v1158_v57 = vcombine.high %v1133_v47, %v1149_v49  ;;  %v1173_v58 = vcombine.low %v1140_v48, %v1156_v50  ;;  %v1174_v59 = vcombine.high %v1140_v48, %v1156_v50 }
 0x2c5   : > { %v828_v60 = vcombine.low %v804_v51, %v820_v53  ;;  %v829_v61 = vcombine.high %v804_v51, %v820_v53  ;;  %v830_v62 = vcombine.low %v811_v52, %v827_v55  ;;  %v831_v63 = vcombine.high %v811_v52, %v827_v55 }
 0x2c6   : > { %v1165_v0 = vrot.slane %v1157_v56, %v3326_v13  ;;  %v1172_v1 = vrot.slane %v1158_v57, %v3326_v13  ;;  %v1181_v2 = vrot.slane %v1173_v58, %v3326_v13  ;;  %v1188_v3 = vrot.slane %v1174_v59, %v3326_v13  ;;  %v3421_v55 = vld [vmem:[#allocation4 + $0x8] sm:$0xff] }
 0x2c7   : > { %981 = vst.msk [vmem:[#allocation2] sm:$0xff] %vm980_vm6, %v828_v60  ;;  %982 = vst.msk [vmem:[#allocation2 + $0x8] sm:$0xff] %vm980_vm6, %v829_v61  ;;  %v3084_v53 = vmov 0   ;;  %v3423_v56 = vld [vmem:[#allocation4] sm:$0xff]  ;;  %v3431_v60 = vld [vmem:[#allocation4 + $0x10] sm:$0xff] }
 0x2c8   : > { %983 = vst.msk [vmem:[#allocation2 + $0x10] sm:$0xff] %vm980_vm6, %v830_v62  ;;  %984 = vst.msk [vmem:[#allocation2 + $0x18] sm:$0xff] %vm980_vm6, %v831_v63  ;;  %v1193_v5 = vcombine.low %v1165_v0, %v1172_v1  ;;  %v2637_v7 = vcombine.high %v1165_v0, %v1172_v1  ;;  %v1209_v8 = vcombine.low %v1181_v2, %v1188_v3  ;;  %2954 = vset.pattern.permute.xlu1 %v3084_v53  ;;  %v3446_v63 = vld [vmem:[#allocation4 + $0x18] sm:$0xff] }
 0x2c9   : > { %v2638_v11 = vcombine.high %v1181_v2, %v1188_v3  ;;  %2953 = vset.pattern.permute.xlu0 %v3084_v53 }
 0x2ca   : > { %v1200_v12 = vrot.slane %v1193_v5, %v3312_v6  ;;  %v1208_v14 = vrot.slane %v2637_v7, %v3312_v6  ;;  %v1216_v16 = vrot.slane %v1209_v8, %v3312_v6 }
 0x2cb   : > { %v1224_v17 = vrot.slane %v2638_v11, %v3312_v6 }
 0x2cc   : > { %v1226_v19 = vcombine.high %v1200_v12, %v1208_v14  ;;  %v1225_v21 = vcombine.low %v1200_v12, %v1208_v14 }
 0x2cd   : > { %v1242_v20 = vcombine.high %v1216_v16, %v1224_v17  ;;  %v1241_v22 = vcombine.low %v1216_v16, %v1224_v17 }
 0x2ce   : > { %v1275_v23 = vld [vmem:[#allocation2] sm:$0xff]  ;;  %v1276_v24 = vld [vmem:[#allocation2 + $0x8] sm:$0xff]  ;;  %v1233_v25 = vrot.slane %v1225_v21, %v3326_v13  ;;  %v1240_v27 = vrot.slane %v1226_v19, %v3326_v13 }
 0x2cf   : > { %v1249_v26 = vrot.slane %v1241_v22, %v3326_v13  ;;  %2740 = vmatpush3.xpose.msk.msra.mxu0 %vm980_vm6, %v1275_v23  ;;  %2745 = vmatpush3.xpose.msk.msra.mxu1 %vm980_vm6, %v1276_v24  ;;  %v1256_v30 = vrot.slane %v1242_v20, %v3326_v13  ;;  %v1277_v31 = vld [vmem:[#allocation2 + $0x10] sm:$0xff]  ;;  %v1278_v32 = vld [vmem:[#allocation2 + $0x18] sm:$0xff] }
 0x2d0   : > { %2749 = vmatprep.subr.mxu0 %v3076_v18  ;;  %2754 = vmatprep.subr.mxu1 %v3076_v18 }
 0x2d1   : > { %v1257_v28 = vcombine.low %v1233_v25, %v1249_v26  ;;  %v1258_v29 = vcombine.high %v1233_v25, %v1249_v26  ;;  %v1259_v33 = vcombine.low %v1240_v27, %v1256_v30  ;;  %v1260_v34 = vcombine.high %v1240_v27, %v1256_v30 }
 0x2d3   : > { %2742 = vmatmul.mubr.msk.f32.vlgmr.msra.gmra.mrb[0].mxu0 %vm980_vm6, %v1257_v28  ;;  %2747 = vmatmul.mubr.msk.f32.vlgmr.msra.gmra.mrb[4].mxu1 %vm980_vm6, %v1258_v29 }
 0x2d4   : > { %2750 = vmatpush3.xpose.msk.msra.mxu0 %vm980_vm6, %v1277_v31  ;;  %2755 = vmatpush3.xpose.msk.msra.mxu1 %vm980_vm6, %v1278_v32 }
 0x2d5   : > { %2751 = vmatprep.mubr.msk.f32.mxu0 %vm3075_vm1, %v3076_v18  ;;  %2756 = vmatprep.mubr.msk.f32.mxu1 %vm3075_vm1, %v3076_v18 }
 0x2d6   : > { %2759 = vmatprep.subr.mxu0 %v3076_v18  ;;  %2764 = vmatprep.subr.mxu1 %v3076_v18 }
 0x2d7   : > { %2752 = vmatmul.mubr.msk.f32.vlgmr.msra.gmra.mrb[2].mxu0 %vm980_vm6, %v1259_v33  ;;  %2757 = vmatmul.mubr.msk.f32.vlgmr.msra.gmra.mrb[6].mxu1 %vm980_vm6, %v1260_v34 }
 0x2d8   : > { %2761 = vmatprep.mubr.msk.f32.mxu0 %vm3075_vm1, %v3076_v18  ;;  %2766 = vmatprep.mubr.msk.f32.mxu1 %vm3075_vm1, %v3076_v18 }
 0x3a6   : > { %v1355_v37 = vpop.f32.mrb[0].mxu0  ;;  %v1431_v38 = vpop.f32.mrb[4].mxu1 }
 0x3a7   : > { %v3401_v39 = vsel %vm1588_vm8, -8192.0, %v1355_v37  ;;  %v3403_v40 = vsel %vm1588_vm8, -8192.0, %v1431_v38  ;;  %v2743_v41 = vpop.f32.mrb[1].mxu0  ;;  %v2748_v42 = vpop.f32.mrb[5].mxu1 }
 0x3a8   : > { %v1602_v43 = vsel %vm980_vm6, %v3403_v40, -inf  ;;  %v1599_v44 = vsel %vm980_vm6, %v3401_v39, -inf }
 0x3a9   : > { %1603 = vmax.xlane.f32.xlu1 %v1602_v43  ;;  %1600 = vmax.xlane.f32.xlu0 %v1599_v44 }
 0x3aa   : > { %v1507_v45 = vpop.f32.mrb[2].mxu0  ;;  %v1583_v46 = vpop.f32.mrb[6].mxu1 }
 0x3ab   : > { %v3409_v47 = vsel %vm1588_vm8, -8192.0, %v1507_v45  ;;  %v3411_v48 = vsel %vm1588_vm8, -8192.0, %v1583_v46  ;;  %v2753_v49 = vpop.f32.mrb[3].mxu0  ;;  %v2758_v50 = vpop.f32.mrb[7].mxu1 }
 0x3ac   : > { %v1605_v51 = vsel %vm980_vm6, %v3409_v47, -inf  ;;  %v1608_v52 = vsel %vm980_vm6, %v3411_v48, -inf }
 0x3ad   : > { %1606 = vmax.xlane.f32.xlu0 %v1605_v51 }
 0x3b1   : > { %1609 = vmax.xlane.f32.xlu0 %v1608_v52 }
 0x3ba   : > { %834 = vrot.lane.b32.xlu1 %v3318_v9, %s3083_s20 }
 0x3be   : > { %836 = vrot.lane.b32.xlu1 %v3310_v4, %s3083_s20 }
 0x3c2   : > { %838 = vrot.lane.b32.xlu1 %v3320_v10, %s3083_s20 }
 0x3c7   : > { %832 = vrot.lane.b32.xlu0 %v3302_v54, %s3083_s20  ;;  %s3087_s20 = smov 24  }
 0x436   : > { %v1604_v57 = vpop.xlane.xlu1 %1603  ;;  %v1601_v58 = vpop.xlane.xlu0 %1600 }
 0x437   : > { %v3426_v59 = vmax.f32 %v3421_v55, %v1604_v57  ;;  %v3429_v9 = vmax.f32 %v3423_v56, %v1601_v58 }
 0x439   : > { %v1616_v4 = vsub.f32 %v3421_v55, %v3426_v59  ;;  %2016 = vst.msk [vmem:[#allocation4 + $0x8] sm:$0xff] %vm1261_vm7, %v3426_v59  ;;  %v1615_v54 = vsub.f32 %v3423_v56, %v3429_v9  ;;  %2015 = vst.msk [vmem:[#allocation4] sm:$0xff] %vm1261_vm7, %v3429_v9  ;;  %1634 = vperm.xlu1 %2954, %v3426_v59   ;;  %1629 = vperm.xlu0 %2953, %v3429_v9  }
 0x43a   : > { %v835_v10 = vpop.permute.xlu1 %834  ;;  %v1607_v61 = vpop.xlane.xlu0 %1606 }
 0x43b   : > { %v3444_v62 = vmax.f32 %v3431_v60, %v1607_v61  ;;  %v1621_v9 = vmul.f32 1.442695, %v1616_v4 }
 0x43d   : > { %v1617_v0 = vsub.f32 %v3431_v60, %v3444_v62  ;;  %2017 = vst.msk [vmem:[#allocation4 + $0x10] sm:$0xff] %vm1261_vm7, %v3444_v62  ;;  %1639 = vperm.xlu1 %2954, %v3444_v62  }
 0x43e   : > { %v837_v1 = vpop.permute.xlu1 %836  ;;  %v1610_v2 = vpop.xlane.xlu0 %1609 }
 0x43f   : > { %v3454_v3 = vmax.f32 %v3446_v63, %v1610_v2 }
 0x441   : > { %v1618_v5 = vsub.f32 %v3446_v63, %v3454_v3  ;;  %2018 = vst.msk [vmem:[#allocation4 + $0x18] sm:$0xff] %vm1261_vm7, %v3454_v3  ;;  %1644 = vperm.xlu0 %2953, %v3454_v3   ;;  %v1661_v3 = vld [vmem:[#allocation5 + $0x10] sm:$0xff] }
 0x442   : > { %v839_v7 = vpop.permute.xlu1 %838  ;;  %v833_v8 = vpop.permute.xlu0 %832 }
 0x443   : > { %v860_v11 = vcombine.low %v835_v10, %v839_v7  ;;  %v861_v12 = vcombine.high %v835_v10, %v839_v7  ;;  %v844_v14 = vcombine.low %v833_v8, %v837_v1  ;;  %v845_v16 = vcombine.high %v833_v8, %v837_v1 }
 0x444   : > { %v1625_v56 = vmul.f32 1.442695, %v1618_v5 }
 0x445   : > { %v868_v17 = vrot.slane %v860_v11, %v3312_v6  ;;  %v875_v19 = vrot.slane %v861_v12, %v3312_v6  ;;  %v852_v20 = vrot.slane %v844_v14, %v3312_v6  ;;  %v859_v21 = vrot.slane %v845_v16, %v3312_v6 }
 0x447   : > { %v876_v22 = vcombine.low %v852_v20, %v868_v17  ;;  %v877_v23 = vcombine.high %v852_v20, %v868_v17  ;;  %v892_v24 = vcombine.low %v859_v21, %v875_v19  ;;  %v893_v25 = vcombine.high %v859_v21, %v875_v19 }
 0x449   : > { %v884_v26 = vrot.slane %v876_v22, %v3326_v13  ;;  %v891_v27 = vrot.slane %v877_v23, %v3326_v13  ;;  %v900_v28 = vrot.slane %v892_v24, %v3326_v13  ;;  %v907_v29 = vrot.slane %v893_v25, %v3326_v13 }
 0x44a   : > { %v1619_v24 = vmul.f32 1.442695, %v1615_v54 }
 0x44b   : > { %v912_v30 = vcombine.low %v884_v26, %v891_v27  ;;  %v2631_v31 = vcombine.high %v884_v26, %v891_v27  ;;  %v928_v32 = vcombine.low %v900_v28, %v907_v29  ;;  %v2632_v33 = vcombine.high %v900_v28, %v907_v29  ;;  %v1659_v29 = vld [vmem:[#allocation5] sm:$0xff] }
 0x44c   : > { %v1623_v27 = vmul.f32 1.442695, %v1617_v0  ;;  %v1660_v0 = vld [vmem:[#allocation5 + $0x8] sm:$0xff] }
 0x44d   : > { %v919_v34 = vrot.slane %v912_v30, %v3312_v6  ;;  %v927_v35 = vrot.slane %v2631_v31, %v3312_v6  ;;  %v935_v36 = vrot.slane %v928_v32, %v3312_v6  ;;  %v943_v37 = vrot.slane %v2632_v33, %v3312_v6  ;;  %v1662_v33 = vld [vmem:[#allocation5 + $0x18] sm:$0xff] }
 0x44f   : > { %v944_v38 = vcombine.low %v919_v34, %v927_v35  ;;  %v945_v41 = vcombine.high %v919_v34, %v927_v35  ;;  %v960_v42 = vcombine.low %v935_v36, %v943_v37  ;;  %v961_v43 = vcombine.high %v935_v36, %v943_v37 }
 0x451   : > { %v952_v44 = vrot.slane %v944_v38, %v3326_v13  ;;  %v959_v45 = vrot.slane %v945_v41, %v3326_v13  ;;  %v968_v46 = vrot.slane %v960_v42, %v3326_v13  ;;  %v975_v49 = vrot.slane %v961_v43, %v3326_v13 }
 0x453   : > { %v976_v50 = vcombine.low %v952_v44, %v968_v46  ;;  %v977_v51 = vcombine.high %v952_v44, %v968_v46  ;;  %v978_v52 = vcombine.low %v959_v45, %v975_v49  ;;  %v979_v53 = vcombine.high %v959_v45, %v975_v49 }
 0x455   : > { %985 = vst.msk [vmem:[#allocation3] sm:$0xff] %vm980_vm6, %v976_v50  ;;  %986 = vst.msk [vmem:[#allocation3 + $0x8] sm:$0xff] %vm980_vm6, %v977_v51  ;;  %v2208_v50 = vld [vmem:[%s3712_s8] sm:$0xff]  ;;  %v2209_v51 = vld [vmem:[%s3712_s8 + $0x8] sm:$0xff] }
 0x456   : > { %987 = vst.msk [vmem:[#allocation3 + $0x10] sm:$0xff] %vm980_vm6, %v978_v52  ;;  %988 = vst.msk [vmem:[#allocation3 + $0x18] sm:$0xff] %vm980_vm6, %v979_v53  ;;  %v2849_v52 = vpack.c.bf16 %v2209_v51, %v2208_v50 }
 0x45c   : > { %v1279_v57 = vld [vmem:[#allocation3] sm:$0xff]  ;;  %v1280_v58 = vld [vmem:[#allocation3 + $0x8] sm:$0xff] }
 0x45d   : > { %2760 = vmatpush3.msra.mxu0 %v1279_v57  ;;  %2765 = vmatpush3.msra.mxu1 %v1280_v58  ;;  %v1281_v22 = vld [vmem:[#allocation3 + $0x10] sm:$0xff]  ;;  %v1688_v57 = vld [vmem:[#allocation6 + $0x8] sm:$0xff] }
 0x45e   : > { %2769 = vmatprep.subr.mxu0 %v3076_v18  ;;  %2774 = vmatprep.subr.mxu1 %v3076_v18 }
 0x4b8   : > { %v1635_v10 = vpop.permute.xlu1 %1634  ;;  %v1630_v61 = vpop.permute.xlu0 %1629 }
 0x4b9   : > { %v1648_v1 = vsub.f32 %v3403_v40, %v1635_v10  ;;  %v1647_v2 = vsub.f32 %v3401_v39, %v1630_v61  ;;  %v1282_v40 = vld [vmem:[#allocation3 + $0x18] sm:$0xff]  ;;  %v1687_v10 = vld [vmem:[#allocation6] sm:$0xff] }
 0x4bb   : > { %v1653_v7 = vmul.f32 1.442695, %v1648_v1  ;;  %v1651_v8 = vmul.f32 1.442695, %v1647_v2 }
 0x4bc   : > { %v1640_v11 = vpop.permute.xlu1 %1639 }
 0x4bd   : > { %2963 = vpow2.f32 %v1653_v7  ;;  %v1649_v12 = vsub.f32 %v3409_v47, %v1640_v11 }
 0x4be   : > { %2965 = vpow2.f32 %v1651_v8  ;;  %v1689_v8 = vld [vmem:[#allocation6 + $0x10] sm:$0xff] }
 0x4bf   : > { %v1655_v14 = vmul.f32 1.442695, %v1649_v12 }
 0x4c0   : > { %v1645_v16 = vpop.permute.xlu0 %1644 }
 0x4c1   : > { %2967 = vpow2.f32 %v1655_v14  ;;  %v1650_v17 = vsub.f32 %v3411_v48, %v1645_v16 }
 0x4c3   : > { %v1657_v19 = vmul.f32 1.442695, %v1650_v17 }
 0x4c5   : > { %2969 = vpow2.f32 %v1657_v19 }
 0x4c6   : > { %2971 = vpow2.f32 %v1619_v24 }
 0x4c7   : > { %v2964_v20 = vpop.eup %2963  ;;  %2973 = vpow2.f32 %v1623_v27 }
 0x4c8   : > { %v2966_v21 = vpop.eup %2965  ;;  %2767 = vmatmul.mubr.msk.f32.vlgmr.msra.gmra.mrb[8].mxu1 %vm980_vm6, %v2964_v20  ;;  %v1670_v39 = vsel %vm980_vm6, %v2964_v20, 0.0  ;;  %2975 = vpow2.f32 %v1625_v56  ;;  %v1690_v20 = vld [vmem:[#allocation6 + $0x18] sm:$0xff] }
 0x4c9   : > { %2762 = vmatmul.mubr.msk.f32.vlgmr.msra.gmra.mrb[4].mxu0 %vm980_vm6, %v2966_v21  ;;  %2775 = vmatpush3.msra.mxu1 %v1282_v40  ;;  %v1667_v47 = vsel %vm980_vm6, %v2966_v21, 0.0  ;;  %2977 = vpow2.f32 %v1621_v9 }
 0x4ca   : > { %2770 = vmatpush3.msra.mxu0 %v1281_v22  ;;  %1671 = vadd.xlane.f32.xlu0 %v1670_v39 }
 0x4cb   : > { %v2968_v23 = vpop.eup %2967  ;;  %1668 = vadd.xlane.f32.xlu1 %v1667_v47  ;;  %2771 = vmatprep.mubr.msk.f32.mxu0 %vm3075_vm1, %v3076_v18 }
 0x4cc   : > { %v1673_v48 = vsel %vm980_vm6, %v2968_v23, 0.0  ;;  %2776 = vmatprep.mubr.msk.f32.mxu1 %vm3075_vm1, %v3076_v18  ;;  %2848 = vmatprep.subr.bf16.mxu1 %v3074_v15 }
 0x4cd   : > { %2772 = vmatmul.mubr.msk.f32.vlgmr.msra.gmra.mrb[6].mxu0 %vm980_vm6, %v2968_v23  ;;  %2860 = vmatprep.subr.bf16.mxu0 %v3074_v15 }
 0x4ce   : > { %1674 = vadd.xlane.f32.xlu0 %v1673_v48  ;;  %2833 = vmatprep.mubr.msk.f32.mxu0 %vm3075_vm1, %v3076_v18 }
 0x4cf   : > { %v2970_v25 = vpop.eup %2969 }
 0x4d0   : > { %2777 = vmatmul.mubr.msk.f32.vlgmr.msra.gmra.mrb[10].mxu1 %vm980_vm6, %v2970_v25  ;;  %v1676_v26 = vsel %vm980_vm6, %v2970_v25, 0.0  ;;  %v2972_v54 = vpop.eup %2971 }
 0x4d1   : > { %2787 = vmatprep.mubr.msk.f32.mxu1 %vm3075_vm1, %v3076_v18  ;;  %v2974_v28 = vpop.eup %2973  ;;  %v1663_v31 = vmul.f32 %v2972_v54, %v1659_v29  ;;  %2850 = vmatpush3.bf16.msra.mxu1 %v2849_v52 }
 0x4d2   : > { %1677 = vadd.xlane.f32.xlu0 %v1676_v26  ;;  %v2976_v60 = vpop.eup %2975  ;;  %v1665_v59 = vmul.f32 %v2974_v28, %v1661_v3  ;;  %2851 = vmatprep.subr.bf16.mxu1 %v3074_v15 }
 0x4d3   : > { %v2978_v62 = vpop.eup %2977  ;;  %v1666_v35 = vmul.f32 %v2976_v60, %v1662_v33 }
 0x4d4   : > { %v1664_v30 = vmul.f32 %v2978_v62, %v1660_v0 }
 0x4dc   : > { %1693 = vperm.xlu1 %2954, %v2972_v54  }
 0x4e0   : > { %1703 = vperm.xlu1 %2954, %v2974_v28  }
 0x4e4   : > { %1708 = vperm.xlu1 %2954, %v2976_v60  }
 0x4e8   : > { %1698 = vperm.xlu0 %2953, %v2978_v62  }
 0x557   : > { %v1672_v63 = vpop.xlane.xlu0 %1671 }
 0x558   : > { %v1669_v5 = vpop.xlane.xlu1 %1668  ;;  %v1680_v32 = vadd.f32 %v1672_v63, %v1664_v30 }
 0x559   : > { %v1679_v55 = vadd.f32 %v1669_v5, %v1663_v31 }
 0x55a   : > { %1684 = vst.msk [vmem:[#allocation5 + $0x8] sm:$0xff] %vm1261_vm7, %v1680_v32 }
 0x55b   : > { %1683 = vst.msk [vmem:[#allocation5] sm:$0xff] %vm1261_vm7, %v1679_v55  ;;  %v1675_v4 = vpop.xlane.xlu0 %1674 }
 0x55c   : > { %v1681_v34 = vadd.f32 %v1675_v4, %v1665_v59  ;;  %v1694_v53 = vpop.permute.xlu1 %1693 }
 0x55d   : > { %v1711_v2 = vmul.f32 %v1694_v53, %v1687_v10 }
 0x55e   : > { %1685 = vst.msk [vmem:[#allocation5 + $0x10] sm:$0xff] %vm1261_vm7, %v1681_v34 }
 0x55f   : > { %v1678_v36 = vpop.xlane.xlu0 %1677 }
 0x560   : > { %v1682_v37 = vadd.f32 %v1678_v36, %v1666_v35  ;;  %v1704_v61 = vpop.permute.xlu1 %1703 }
 0x561   : > { %v2020_v38 = vld [vmem:[#allocation5 + $0x8] sm:$0xff]  ;;  %v1713_v19 = vmul.f32 %v1704_v61, %v1689_v8 }
 0x562   : > { %1686 = vst.msk [vmem:[#allocation5 + $0x18] sm:$0xff] %vm1261_vm7, %v1682_v37  ;;  %v2019_v41 = vld [vmem:[#allocation5] sm:$0xff]  ;;  %2979 = vrcp.f32 %v2020_v38  ;;  %v2210_v37 = vld [vmem:[%s3712_s8 + $0x10] sm:$0xff]  ;;  %v2211_v38 = vld [vmem:[%s3712_s8 + $0x18] sm:$0xff] }
 0x563   : > { %2981 = vrcp.f32 %v2019_v41 }
 0x564   : > { %v1709_v21 = vpop.permute.xlu1 %1708 }
 0x565   : > { %v2021_v42 = vld [vmem:[#allocation5 + $0x10] sm:$0xff]  ;;  %v1714_v47 = vmul.f32 %v1709_v21, %v1690_v20 }
 0x566   : > { %2983 = vrcp.f32 %v2021_v42 }
 0x567   : > { %v1699_v58 = vpop.permute.xlu0 %1698 }
 0x568   : > { %v1712_v1 = vmul.f32 %v1699_v58, %v1688_v57 }
 0x569   : > { %v2022_v43 = vld [vmem:[#allocation5 + $0x18] sm:$0xff] }
 0x56a   : > { %2985 = vrcp.f32 %v2022_v43 }
 0x56c   : > { %v2980_v44 = vpop.eup %2979 }
 0x56d   : > { %v2982_v45 = vpop.eup %2981  ;;  %2038 = vperm.xlu0 %2953, %v2980_v44  }
 0x56e   : > { %2033 = vperm.xlu1 %2954, %v2982_v45   ;;  %v2852_v45 = vpack.c.bf16 %v2211_v38, %v2210_v37 }
 0x570   : > { %v2984_v46 = vpop.eup %2983  ;;  %2853 = vmatpush3.bf16.msra.mxu1 %v2852_v45  ;;  %v2425_v45 = vld [vmem:[%s3718_s14 + $0x18] sm:$0xff] }
 0x571   : > { %2854 = vmatprep.subr.bf16.mxu1 %v3074_v15 }
 0x572   : > { %2043 = vperm.xlu1 %2954, %v2984_v46  }
 0x574   : > { %v2986_v49 = vpop.eup %2985 }
 0x575   : > { %2048 = vperm.xlu0 %2953, %v2986_v49  }
 0x59b   : > { %v1857_v7 = vpop.f32.mrb[8].mxu1 }
 0x59c   : > { %v1784_v11 = vpop.f32.mrb[4].mxu0  ;;  %v2008_v12 = vadd.f32 %v1857_v7, %v1712_v1  ;;  %v2768_v14 = vpop.f32.mrb[9].mxu1 }
 0x59d   : > { %v2007_v16 = vadd.f32 %v1784_v11, %v1711_v2  ;;  %v2763_v17 = vpop.f32.mrb[5].mxu0 }
 0x59e   : > { %2012 = vst.msk [vmem:[#allocation6 + $0x8] sm:$0xff] %vm980_vm6, %v2008_v12 }
 0x59f   : > { %2011 = vst.msk [vmem:[#allocation6] sm:$0xff] %vm980_vm6, %v2007_v16 }
 0x5a0   : > { %v1930_v40 = vpop.f32.mrb[6].mxu0 }
 0x5a1   : > { %v2009_v39 = vadd.f32 %v1930_v40, %v1713_v19  ;;  %v2773_v22 = vpop.f32.mrb[7].mxu0 }
 0x5a2   : > { %v2653_v22 = vld [vmem:[%s3713_s9] ss:$0 sm:$0xff] }
 0x5a3   : > { %2013 = vst.msk [vmem:[#allocation6 + $0x10] sm:$0xff] %vm980_vm6, %v2009_v39  ;;  %v2003_v23 = vpop.f32.mrb[10].mxu1 }
 0x5a4   : > { %v2010_v48 = vadd.f32 %v2003_v23, %v1714_v47  ;;  %v2778_v24 = vpop.f32.mrb[11].mxu1 }
 0x5a5   : > { %v2028_v60 = vld [vmem:[#allocation6 + $0x8] sm:$0xff]  ;;  %v2993_v24 = vld [vmem:[%s3239_s25] sm:$0xff]  ;;  %s547_s25 = scalar_lea.vmem [#allocation7], %s2622_s19 }
 0x5a6   : > { %2014 = vst.msk [vmem:[#allocation6 + $0x18] sm:$0xff] %vm980_vm6, %v2010_v48  ;;  %v2027_v9 = vld [vmem:[#allocation6] sm:$0xff]  ;;  %s2532_s28 = sshll.u32 %s547_s25, 4  ;;  %s3658_s28 = int_to_ptr.vmem [resolvable:$true] %s2532_s28 }
 0x5a7   : > { %s2994_s24 = scalar_lea.vmem %s3658_s28, 128 }
 0x5a8   : > { %p2995_p12 = scmp.ne.s32.totalorder %s3658_s28, %s2994_s24 }
 0x5aa   : > { %v2029_v56 = vld [vmem:[#allocation6 + $0x10] sm:$0xff]  ;;  %p2996_p13 = pnand %p2995_p12, %p3214_p4 }
 0x5ac   : > { %p2997_p0 = pneg %p2996_p13 }
 0x5ad   : > { %v2030_v62 = vld [vmem:[#allocation6 + $0x18] sm:$0xff] }
 0x5ec   : > { %v2039_v26 = vpop.permute.xlu0 %2038 }
 0x5ed   : > { %v2034_v25 = vpop.permute.xlu1 %2033  ;;  %v2052_v29 = vmul.f32 %v2039_v26, %v2028_v60  ;;  %v2330_v60 = vld [vmem:[%s3716_s12 + $0x8] sm:$0xff] }
 0x5ee   : > { %v2051_v28 = vmul.f32 %v2034_v25, %v2027_v9 }
 0x5f1   : > { %v2044_v27 = vpop.permute.xlu1 %2043 }
 0x5f2   : > { %v2053_v54 = vmul.f32 %v2044_v27, %v2029_v56 }
 0x5f4   : > { %v2049_v0 = vpop.permute.xlu0 %2048  ;;  %v2055_v30 = vcombine.low %v2051_v28, %v2053_v54  ;;  %v2056_v31 = vcombine.high %v2051_v28, %v2053_v54  ;;  %v2329_v28 = vld [vmem:[%s3716_s12] sm:$0xff] }
 0x5f5   : > { %v2054_v63 = vmul.f32 %v2049_v0, %v2030_v62  ;;  %v2331_v62 = vld [vmem:[%s3716_s12 + $0x10] sm:$0xff]  ;;  %v2855_v0 = vpack.c.bf16 %v2330_v60, %v2329_v28 }
 0x5f6   : > { %v2063_v32 = vrot.slane %v2055_v30, %v3312_v6  ;;  %v2070_v55 = vrot.slane %v2056_v31, %v3312_v6  ;;  %v2422_v31 = vld [vmem:[%s3718_s14] sm:$0xff] }
 0x5f7   : > { %v2071_v3 = vcombine.low %v2052_v29, %v2054_v63  ;;  %v2072_v5 = vcombine.high %v2052_v29, %v2054_v63  ;;  %v2332_v29 = vld [vmem:[%s3716_s12 + $0x18] sm:$0xff]  ;;  %v2423_v63 = vld [vmem:[%s3718_s14 + $0x8] sm:$0xff] }
 0x5f8   : > { %v2858_v30 = vpack.c.bf16 %v2332_v29, %v2331_v62 }
 0x5f9   : > { %v2079_v59 = vrot.slane %v2071_v3, %v3312_v6  ;;  %v2086_v4 = vrot.slane %v2072_v5, %v3312_v6  ;;  %v2861_v3 = vpack.c.bf16 %v2423_v63, %v2422_v31 }
 0x5fb   : > { %v2087_v33 = vcombine.low %v2063_v32, %v2079_v59  ;;  %v2088_v34 = vcombine.high %v2063_v32, %v2079_v59  ;;  %v2103_v35 = vcombine.low %v2070_v55, %v2086_v4  ;;  %v2104_v36 = vcombine.high %v2070_v55, %v2086_v4  ;;  %2862 = vmatpush3.bf16.msra.mxu0 %v2861_v3 }
 0x5fc   : > { %2863 = vmatprep.subr.bf16.mxu0 %v3074_v15 }
 0x5fd   : > { %v2095_v41 = vrot.slane %v2087_v33, %v3326_v13  ;;  %v2102_v42 = vrot.slane %v2088_v34, %v3326_v13  ;;  %v2111_v43 = vrot.slane %v2103_v35, %v3326_v13  ;;  %v2118_v44 = vrot.slane %v2104_v36, %v3326_v13  ;;  %v2655_v36 = vld [vmem:[%s3714_s10] ss:$0 sm:$0xff] }
 0x5ff   : > { %v2123_v46 = vcombine.low %v2095_v41, %v2102_v42  ;;  %v2651_v49 = vcombine.high %v2095_v41, %v2102_v42  ;;  %v2139_v50 = vcombine.low %v2111_v43, %v2118_v44  ;;  %v2652_v51 = vcombine.high %v2111_v43, %v2118_v44  ;;  %v2656_v41 = vld [vmem:[%s3715_s11] ss:$0 sm:$0xff]  ;;  %v2424_v44 = vld [vmem:[%s3718_s14 + $0x10] sm:$0xff] }
 0x601   : > { %v2130_v52 = vrot.slane %v2123_v46, %v3312_v6  ;;  %v2138_v53 = vrot.slane %v2651_v49, %v3312_v6  ;;  %v2146_v57 = vrot.slane %v2139_v50, %v3312_v6  ;;  %v2154_v58 = vrot.slane %v2652_v51, %v3312_v6  ;;  %v2426_v49 = vld [vmem:[%s3718_s14 + $0x20] sm:$0xff]  ;;  %v2427_v50 = vld [vmem:[%s3718_s14 + $0x28] sm:$0xff] }
 0x602   : > { %v2864_v46 = vpack.c.bf16 %v2425_v45, %v2424_v44  ;;  %v2867_v51 = vpack.c.bf16 %v2427_v50, %v2426_v49 }
 0x603   : > { %v2156_v10 = vcombine.high %v2130_v52, %v2138_v53  ;;  %v2172_v61 = vcombine.high %v2146_v57, %v2154_v58  ;;  %v2155_v1 = vcombine.low %v2130_v52, %v2138_v53  ;;  %v2171_v2 = vcombine.low %v2146_v57, %v2154_v58  ;;  %v2428_v52 = vld [vmem:[%s3718_s14 + $0x30] sm:$0xff]  ;;  %v2429_v53 = vld [vmem:[%s3718_s14 + $0x38] sm:$0xff]  ;;  %v2430_v58 = vld [vmem:[%s3718_s14 + $0x40] sm:$0xff] }
 0x604   : > { %2865 = vmatpush3.bf16.msra.mxu0 %v2864_v46  ;;  %v2870_v57 = vpack.c.bf16 %v2429_v53, %v2428_v52 }
 0x605   : > { %v2170_v7 = vrot.slane %v2156_v10, %v3326_v13  ;;  %v2186_v8 = vrot.slane %v2172_v61, %v3326_v13  ;;  %v2163_v11 = vrot.slane %v2155_v1, %v3326_v13  ;;  %v2179_v12 = vrot.slane %v2171_v2, %v3326_v13  ;;  %2866 = vmatprep.subr.bf16.mxu0 %v3074_v15  ;;  %v2431_v10 = vld [vmem:[%s3718_s14 + $0x48] sm:$0xff]  ;;  %v2432_v1 = vld [vmem:[%s3718_s14 + $0x50] sm:$0xff]  ;;  %v2433_v2 = vld [vmem:[%s3718_s14 + $0x58] sm:$0xff] }
 0x606   : > { %v2873_v61 = vpack.c.bf16 %v2431_v10, %v2430_v58 }
 0x607   : > { %v2189_v14 = vcombine.low %v2170_v7, %v2186_v8  ;;  %v2188_v16 = vcombine.high %v2163_v11, %v2179_v12  ;;  %v2187_v17 = vcombine.low %v2163_v11, %v2179_v12  ;;  %v2190_v6 = vcombine.high %v2170_v7, %v2186_v8  ;;  %v2434_v8 = vld [vmem:[%s3718_s14 + $0x60] sm:$0xff]  ;;  %v2435_v11 = vld [vmem:[%s3718_s14 + $0x68] sm:$0xff] }
 0x608   : > { %2868 = vmatpush3.bf16.msra.mxu0 %v2867_v51  ;;  %v2876_v7 = vpack.c.bf16 %v2433_v2, %v2432_v1  ;;  %v2879_v12 = vpack.c.bf16 %v2435_v11, %v2434_v8 }
 0x609   : > { %2196 = vrot.lane.b32.xlu0 %v2189_v14, %s3085_s18  ;;  %2192 = vrot.lane.b32.xlu1 %v2188_v16, %s3086_s2  ;;  %v2436_v14 = vld [vmem:[%s3718_s14 + $0x70] sm:$0xff]  ;;  %v2437_v16 = vld [vmem:[%s3718_s14 + $0x78] sm:$0xff]  ;;  %s3656_s18 = scalar_lea.hbm %s3720_s16, %s2661_s30  ;;  %s2518_s2 = scalar_lea.sflag [#allocation8], %s545_s6 }
 0x60a   : > { %2869 = vmatprep.subr.bf16.mxu0 %v3074_v15 }
 0x60c   : > { %2871 = vmatpush3.bf16.msra.mxu0 %v2870_v57 }
 0x60d   : > { %2200 = vrot.lane.b32.xlu1 %v2190_v6, %s3087_s20  ;;  %2872 = vmatprep.subr.bf16.mxu0 %v3074_v15  ;;  %v2657_v6 = vld [vmem:[%s3717_s13] ss:$0 sm:$0xff]  ;;  %s3088_s20 = smov [#allocation7]  }
 0x60e   : > { %s2998_s19 = sshll.u32 %s3088_s20, 4  ;;  %s2999_s19 = int_to_ptr.vmem [resolvable:$false] %s2998_s19 }
 0x60f   : > { %s3000_s27 = scalar_lea.vmem %s2999_s19, 256  ;;  %p3001_p1 = scmp.lt.s32.totalorder %s3658_s28, %s2999_s19 }
 0x610   : > { %2874 = vmatpush3.bf16.msra.mxu0 %v2873_v61  ;;  %p3002_p2 = scmp.lt.s32.totalorder %s3000_s27, %s2994_s24 }
 0x611   : > { %2875 = vmatprep.subr.bf16.mxu0 %v3074_v15 }
 0x612   : > { %p3003_p3 = por %p3002_p2, %p3001_p1 }
 0x614   : > { %2877 = vmatpush3.bf16.msra.mxu0 %v2876_v7  ;;  %p3004_p5 = pnand %p3003_p3, %p2997_p0 }
 0x615   : > { %2878 = vmatprep.subr.bf16.mxu0 %v3074_v15 }
 0x618   : > { %2880 = vmatpush3.bf16.msra.mxu0 %v2879_v12 }
 0x619   : > { %2881 = vmatprep.subr.bf16.mxu0 %v3074_v15 }
 0x67b   : > { %v2193_v19 = vpop.permute.xlu1 %2192  ;;  %v2197_v20 = vpop.permute.xlu0 %2196 }
 0x67c   : > { %v2203_v21 = vsel %vm980_vm6, %v2187_v17, %v2193_v19  ;;  %v2882_v17 = vpack.c.bf16 %v2437_v16, %v2436_v14 }
 0x67d   : > { %v2205_v39 = vsel %vm2204_vm9, %v2203_v21, %v2197_v20 }
 0x67e   : > { %2883 = vmatpush3.bf16.msra.mxu0 %v2882_v17 }
 0x67f   : > { %v2201_v40 = vpop.permute.xlu1 %2200 }
 0x680   : > { %v2207_v13 = vsel %vm2206_vm10, %v2205_v39, %v2201_v40 }
 0x681   : > { %2788 = vmatmul.mubr.msk.f32.vlgmr.msra.gmra.mrb[12].mxu1 %vm566_vm0, %v2207_v13 }
 0x682   : > { %2798 = vmatprep.mubr.msk.f32.mxu1 %vm3075_vm1, %v3076_v18  ;;  %2856 = vmatpush3.bf16.msra.mxu1 %v2855_v0 }
 0x683   : > { %2857 = vmatprep.subr.bf16.mxu1 %v3074_v15 }
 0x686   : > { %2859 = vmatpush3.bf16.msra.mxu1 %v2858_v30 }
 0x754   : > { %v2288_v47 = vpop.f32.mrb[12].mxu1 }
 0x755   : > { %v2289_v23 = vadd.f32 %v2653_v22, %v2288_v47  ;;  %v2789_v48 = vpop.f32.mrb[13].mxu1 }
 0x757   : > { %v3563_v25 = vadd.f32 %v2993_v24, %v2289_v23 }
 0x759   : > { %v2295_v26 = vsel %vm566_vm0, %v3563_v25, 0.0 }
 0x75a   : > { %2296 = vadd.xlane.f32.xlu0 %v2295_v26  ;;  %v2659_v26 = vld [vmem:[%s3719_s15] ss:$0 sm:$0xff] }
 0x7e7   : > { %v2297_v27 = vpop.xlane.xlu0 %2296 }
 0x7e8   : > { %v2298_v56 = vmul.f32 0.03125, %v2297_v27 }
 0x7ea   : > { %v2299_v9 = vsub.f32 %v3563_v25, %v2298_v56 }
 0x7ec   : > { %v2300_v54 = vmul.f32 %v2299_v9, %v2299_v9  ;;  %v2320_v37 = vmul.f32 %v2655_v36, %v2299_v9 }
 0x7ee   : > { %v2301_v18 = vsel %vm566_vm0, %v2300_v54, 0.0 }
 0x7ef   : > { %2302 = vadd.xlane.f32.xlu1 %v2301_v18 }
 0x87c   : > { %v2303_v5 = vpop.xlane.xlu1 %2302 }
 0x87d   : > { %v2304_v32 = vmul.f32 0.032258064, %v2303_v5 }
 0x87f   : > { %2987 = vrsqrt.f32 %v2304_v32  ;;  %vm2307_vm11 = vcmp.eq.f32.partialorder %v2304_v32, inf  ;;  %v2310_v4 = vand.u32 2147483648, %v2304_v32  ;;  %vm2309_vm12 = vcmp.eq.f32.partialorder %v2304_v32, 0.0 }
 0x889   : > { %v2988_v55 = vpop.eup %2987 }
 0x88a   : > { %v2306_v59 = vmul.f32 %v2988_v55, %v2304_v32 }
 0x88c   : > { %v2308_v33 = vsel %vm2307_vm11, %v2304_v32, %v2306_v59 }
 0x88d   : > { %v2311_v34 = vsel %vm2309_vm12, %v2310_v4, %v2308_v33 }
 0x88e   : > { %v2312_v35 = vadd.f32 1e-06, %v2311_v34 }
 0x890   : > { %2989 = vrcp.f32 %v2312_v35 }
 0x89a   : > { %v2990_v38 = vpop.eup %2989 }
 0x89b   : > { %v2321_v42 = vmul.f32 %v2990_v38, %v2320_v37 }
 0x89d   : > { %v2328_v43 = vadd.f32 %v2656_v41, %v2321_v42 }
 0x89f   : > { %2799 = vmatmul.mubr.msk.f32.vlgmr.msra.gmra.mrb[14].mxu1 %vm566_vm0, %v2328_v43 }
 0x972   : > { %v2409_v19 = vpop.f32.mrb[14].mxu1 }
 0x973   : > { %v2410_v20 = vadd.f32 %v2657_v6, %v2409_v19  ;;  %v2800_v21 = vpop.f32.mrb[15].mxu1 }
 0x975   : > { %v2414_v40 = vmul.f32 0.044715, %v2410_v20  ;;  %v2413_v48 = vmul.f32 0.5, %v2410_v20 }
 0x977   : > { %v2415_v39 = vmul.f32 %v2414_v40, %v2410_v20 }
 0x979   : > { %v2416_v13 = vmul.f32 %v2415_v39, %v2410_v20 }
 0x97b   : > { %v2417_v22 = vadd.f32 %v2416_v13, %v2410_v20 }
 0x97d   : > { %v2418_v47 = vmul.f32 0.7978846, %v2417_v22 }
 0x97f   : > { %2991 = vtanh.f32 %v2418_v47 }
 0x989   : > { %v2992_v23 = vpop.eup %2991 }
 0x98a   : > { %v2420_v24 = vadd.f32 1.0, %v2992_v23 }
 0x98c   : > { %v2421_v15 = vmul.f32 %v2420_v24, %v2413_v48 }
 0x98e   : > { %2834 = vmatmul.mubr.f32.vlgmr.msra.gmra.mrb[8].mxu0 %v2421_v15 }
 0xa61   : > { %v2511_v27 = vpop.f32.mrb[8].mxu0 }
 0xa62   : > { %v2512_v56 = vadd.f32 %v2659_v26, %v2511_v27  ;;  %v2835_v9 = vpop.f32.mrb[9].mxu0 }
 0xa64   : > { %v2515_v54 = vadd.f32 %v2512_v56, %v3563_v25 }
 0xa66   : > { %2516 = vst.msk [vmem:[%s547_s25] sm:$0xff] %vm566_vm0, %v2515_v54 }
 0xa67   : > { %3007 = shalt.err (!%p3004_p5)
}
 0xa68   : > { %s3008_s6 = scalar_lea.hbm %s3656_s18, 128  ;;  %s3012_s25 = scalar_lea.hbm %s3720_s16, 256 }
 0xa69   : > { %p3009_p6 = scmp.ne.s32.totalorder %s3656_s18, %s3008_s6  ;;  %p3013_p10 = scmp.lt.u32.totalorder %s3656_s18, %s3720_s16 }
 0xa6a   : > { %p3014_p11 = scmp.lt.u32.totalorder %s3012_s25, %s3008_s6  ;;  %p3016_p13 = scmp.lt.u32.totalorder %s3008_s6, %s3656_s18 }
 0xa6b   : > { %p3010_p7 = pnand %p3009_p6, %p3214_p4 }
 0xa6c   : > { %p3015_p12 = por %p3014_p11, %p3013_p10 }
 0xa6d   : > { %p3011_p9 = pneg %p3010_p7 }
 0xa6e   : > { %p3017_p0 = por %p3016_p13, %p3015_p12 }
 0xa70   : > { %p3018_p1 = pnand %p3017_p0, %p3011_p9 }
 0xa72   : > { %3021 = shalt.err (!%p3018_p1)
}
 0xa73   : > { %2884 = dma.vmem_to_hbm [thread:$0]  (%p3214_p4), %s3658_s28, 128, %s3656_s18, %s2518_s2  }
 0xa74 PF: > { %p2890_p2 = scmp.ge.s32.totalorder %s3072_s26, 2  ;;  %s2544_s20 = sand.u32 1, %s3052_s21  }
 0xa75   : > { %s2545_s19 = scalar_lea.sflag [#allocation8], %s2544_s20 }
 0xa76   : > { %p2887_p3 = pnand %p2890_p2, %p3221_p8 }
 0xa78   : > { %3047 = dma.done.wait (!%p2887_p3), %s2545_s19, 128  }
 0xa79   : > { %3049 = vsyncadd (!%p2887_p3), %s2545_s19, 4294967168  ;;  %s29_s26 = sadd.s32 1, %s3072_s26   ;;  %s3741_s27 = sld [smem:[#allocation10_spill]] }
 0xa7a   : > { %p26_p5 = scmp.ge.s32.totalorder %s29_s26, 4   ;;  %s3742_s23 = sld [smem:[#allocation14_spill]] }
 0xa7b   : > { %s3743_s24 = sld [smem:[#allocation11_spill]]  ;;  %s3744_s25 = sld [smem:[#allocation12_spill]] }
 0xa7c   : > { %s3745_s21 = smov %s3056_s22  ;;  %28 = sbr.rel (!%p26_p5) target bundleno = 8 (0x8), region = 127 }
 0xa7f   : > { %s3746_s22 = smov %s3741_s27 }
 0xa83   :  { %2550 = vsyncpa [#allocation8], 1 }
 0xa84   :  { %2552 = vsyncpa [#allocation8 + $0x1], 1 }

</bundles_post_ra>
